<compile_context>
chip_gen: v5e
topology: v5e:2x2
jax: 0.10.0
libtpu: 0.0.40
codegen_flags: <defaults>
</compile_context>

<pallas_src>
import functools

import jax
import jax.numpy as jnp
from jax import lax
from jax.experimental import pallas as pl
from jax.experimental.pallas import tpu as pltpu

EMB_DIM = 768            # matches nn.LSTM(768, hidden_dim, ...) in the PyTorch module
SUBLANE = 8              # f32 sublane tile
FC_LANE_PAD = 128        # pad FC output columns to a full lane width
MM_DTYPE = jnp.bfloat16  # matmul-input dtype (f32 accumulation). jnp.float32 to disable.


def _round_up(x, m):
    return (x + m - 1) // m * m


# ----------------------------- Pallas kernel --------------------------------

def _bilstm_layer_kernel(*refs, n_in, is_last, hidden_dim, seq_len, batch,
                         unroll):
    """One fused bidirectional LSTM layer.

    refs (in order):
      inputs : x_0..x_{n_in-1}  [S*B, D_i]   (f32 or bf16; cast to W dtype)
               w_0..w_{n_in-1}  [D_i, 8H]    (bf16)   fwd|rev gates concatenated
               bias             [1, 8H]      (f32)    b_ih + b_hh, fwd|rev
               whh_f, whh_r     [H, 4H]      (f32)
               h0, c0           [2, B, H]    (f32)    [fwd, rev] initial state
               (is_last only) wfc_pad [2H,128] f32, bfc_pad [1,128] f32
      outputs: mid layer  -> yf [S*B, H], yr [S*B, H]  (f32)
               last layer -> out [B, 128]              (f32)
      scratch: gin [S*B, 8H] f32
    """
    H, S, B = hidden_dim, seq_len, batch
    idx = 0
    x_refs = refs[idx:idx + n_in]; idx += n_in
    w_refs = refs[idx:idx + n_in]; idx += n_in
    b_ref = refs[idx]; idx += 1
    whhf_ref = refs[idx]; whhr_ref = refs[idx + 1]; idx += 2
    h0_ref = refs[idx]; c0_ref = refs[idx + 1]; idx += 2
    if is_last:
        wfc_ref = refs[idx]; bfc_ref = refs[idx + 1]; idx += 2
        out_ref = refs[idx]; idx += 1
        yf_ref = yr_ref = None
    else:
        yf_ref = refs[idx]; yr_ref = refs[idx + 1]; idx += 2
        wfc_ref = bfc_ref = out_ref = None
    gin_scr = refs[idx]

    # Hoisted input projection: every timestep, both directions, one MXU pass.
    gin = jnp.dot(x_refs[0][...].astype(w_refs[0].dtype), w_refs[0][...],
                  preferred_element_type=jnp.float32)
    for i in range(1, n_in):
        gin = gin + jnp.dot(x_refs[i][...].astype(w_refs[i].dtype),
                            w_refs[i][...],
                            preferred_element_type=jnp.float32)
    gin_scr[...] = gin + b_ref[...]          # bias folded in once, up front

    def cell(pre, c):
        # Full-vreg EUP nonlinearities, then static slices (gate order i,f,g,o).
        sig = jax.nn.sigmoid(pre)
        tnh = jnp.tanh(pre)
        i_g = sig[:, 0 * H:1 * H]
        f_g = sig[:, 1 * H:2 * H]
        g_g = tnh[:, 2 * H:3 * H]
        o_g = sig[:, 3 * H:4 * H]
        c_new = f_g * c + i_g * g_g
        return o_g * jnp.tanh(c_new), c_new

    def step(t, carry):
        hf, cf, hr, cr = carry
        tr = S - 1 - t
        off_f = pl.multiple_of(t * B, SUBLANE)
        off_r = pl.multiple_of(tr * B, SUBLANE)
        gin_f = gin_scr[pl.ds(off_f, B), :]      # [B, 8H]: [:4H] fwd, [4H:] rev
        gin_r = gin_scr[pl.ds(off_r, B), :]
        pre_f = gin_f[:, :4 * H] + jnp.dot(hf, whhf_ref[...],
                                           preferred_element_type=jnp.float32)
        pre_r = gin_r[:, 4 * H:] + jnp.dot(hr, whhr_ref[...],
                                           preferred_element_type=jnp.float32)
        hf, cf = cell(pre_f, cf)
        hr, cr = cell(pre_r, cr)
        if not is_last:
            yf_ref[pl.ds(off_f, B), :] = hf
            yr_ref[pl.ds(off_r, B), :] = hr
        return hf, cf, hr, cr

    hf, cf, hr, cr = lax.fori_loop(
        0, S, step, (h0_ref[0], c0_ref[0], h0_ref[1], c0_ref[1]),
        unroll=unroll)

    if is_last:
        # FC head fused into the epilogue (dropout is identity in eval).
        wfc = wfc_ref[...]
        out_ref[...] = (jnp.dot(hf, wfc[:H], preferred_element_type=jnp.float32)
                        + jnp.dot(hr, wfc[H:],
                                  preferred_element_type=jnp.float32)
                        + bfc_ref[...])


# ------------------------------ wrappers ------------------------------------

def _bilstm_layer(x_list, w_list, bias, whh_f, whh_r, h0, c0, *, hidden_dim,
                  seq_len, batch, fc=None):
    vspec = pl.BlockSpec(memory_space=pltpu.MemorySpace.VMEM)
    is_last = fc is not None
    unroll = True if seq_len <= 32 else 4
    kernel = functools.partial(
        _bilstm_layer_kernel, n_in=len(x_list), is_last=is_last,
        hidden_dim=hidden_dim, seq_len=seq_len, batch=batch, unroll=unroll)

    inputs = [*x_list, *w_list, bias, whh_f, whh_r, h0, c0]
    if is_last:
        wfc, bfc = fc
        inputs += [wfc, bfc]
        out_shape = jax.ShapeDtypeStruct((batch, wfc.shape[1]), jnp.float32)
        out_specs = vspec
    else:
        out_shape = (jax.ShapeDtypeStruct((seq_len * batch, hidden_dim),
                                          jnp.float32),
                     jax.ShapeDtypeStruct((seq_len * batch, hidden_dim),
                                          jnp.float32))
        out_specs = (vspec, vspec)

    return pl.pallas_call(
        kernel,
        out_shape=out_shape,
        in_specs=[vspec] * len(inputs),
        out_specs=out_specs,
        scratch_shapes=[pltpu.VMEM((seq_len * batch, 8 * hidden_dim),
                                   jnp.float32)],
    )(*inputs)


# ------------------------------ parameters ----------------------------------

def init_params(key, hidden_dim, output_size, n_layers, vocab_size):
    params = {}
    key, k_emb = jax.random.split(key)
    params["embedding"] = 0.02 * jax.random.normal(
        k_emb, (vocab_size, EMB_DIM), jnp.float32)

    lstm = []
    for l in range(n_layers):
        d_in = EMB_DIM if l == 0 else 2 * hidden_dim
        bound = 1.0 / float(jnp.sqrt(hidden_dim))
        layer = {}
        for direction in ("fwd", "rev"):
            key, k1, k2, k3, k4 = jax.random.split(key, 5)
            layer[direction] = {
                "w_ih": jax.random.uniform(k1, (d_in, 4 * hidden_dim),
                                           jnp.float32, -bound, bound),
                "w_hh": jax.random.uniform(k2, (hidden_dim, 4 * hidden_dim),
                                           jnp.float32, -bound, bound),
                # b_ih + b_hh folded into one bias row
                "bias": (jax.random.uniform(k3, (1, 4 * hidden_dim),
                                            jnp.float32, -bound, bound)
                         + jax.random.uniform(k4, (1, 4 * hidden_dim),
                                              jnp.float32, -bound, bound)),
            }
        lstm.append(layer)
    params["lstm"] = lstm

    key, kf1, kf2 = jax.random.split(key, 3)
    bound = 1.0 / float(jnp.sqrt(2 * hidden_dim))
    params["fc_w"] = jax.random.uniform(kf1, (2 * hidden_dim, output_size),
                                        jnp.float32, -bound, bound)
    params["fc_b"] = jax.random.uniform(kf2, (1, output_size),
                                        jnp.float32, -bound, bound)
    return params


def prepare_params(params, *, hidden_dim, output_size, n_layers,
                   mm_dtype=MM_DTYPE):
    """Pack raw (PyTorch-layout) params into fused/cast/padded kernel operands."""
    H = hidden_dim
    prepped = {"embedding": params["embedding"]}
    layers = []
    for l in range(n_layers):
        lp = params["lstm"][l]
        w_ih_cat = jnp.concatenate([lp["fwd"]["w_ih"], lp["rev"]["w_ih"]],
                                   axis=1)                        # [D_in, 8H]
        bias_cat = jnp.concatenate([lp["fwd"]["bias"], lp["rev"]["bias"]],
                                   axis=1)                        # [1, 8H]
        entry = {
            "bias_cat": bias_cat.astype(jnp.float32),
            "whh_f": lp["fwd"]["w_hh"].astype(jnp.float32),
            "whh_r": lp["rev"]["w_hh"].astype(jnp.float32),
        }
        if l == 0:
            entry["w_ih_cat"] = w_ih_cat.astype(mm_dtype)
        else:
            entry["w_ih_a"] = w_ih_cat[:H].astype(mm_dtype)  # rows for fwd feats
            entry["w_ih_b"] = w_ih_cat[H:].astype(mm_dtype)  # rows for rev feats
        layers.append(entry)
    prepped["lstm"] = layers

    wfc_pad = jnp.zeros((2 * hidden_dim, FC_LANE_PAD), jnp.float32)
    wfc_pad = wfc_pad.at[:, :output_size].set(params["fc_w"])
    bfc_pad = jnp.zeros((1, FC_LANE_PAD), jnp.float32)
    bfc_pad = bfc_pad.at[:, :output_size].set(params["fc_b"][0])
    prepped["fc_w_pad"] = wfc_pad
    prepped["fc_b_pad"] = bfc_pad
    return prepped


# ------------------------------- forward ------------------------------------

def bert_lstm_forward(prepped, token_ids, hidden, *, n_layers, hidden_dim,
                      output_size):
    # TODO(synk): the pretrained BERT encoder cannot be reproduced in-script;
    # it is replaced by a deterministic embedding lookup producing [B, S, 768].
    h0_all, c0_all = hidden                                 # [n_layers*2, B, H]
    B, S = token_ids.shape
    H = hidden_dim
    B_pad = _round_up(B, SUBLANE)

    emb = jnp.take(prepped["embedding"], token_ids, axis=0)  # [B, S, 768]
    x = jnp.transpose(emb, (1, 0, 2)).astype(jnp.float32)    # time-major [S, B, 768]
    if B_pad != B:
        x = jnp.pad(x, ((0, 0), (0, B_pad - B), (0, 0)))
        h0_all = jnp.pad(h0_all, ((0, 0), (0, B_pad - B), (0, 0)))
        c0_all = jnp.pad(c0_all, ((0, 0), (0, B_pad - B), (0, 0)))
    x2d = x.reshape(S * B_pad, EMB_DIM)                      # f32; cast in-kernel

    yf2d = yr2d = None
    out_pad = None
    for l in range(n_layers):
        lp = prepped["lstm"][l]
        if l == 0:
            x_list, w_list = [x2d], [lp["w_ih_cat"]]
        else:
            x_list, w_list = [yf2d, yr2d], [lp["w_ih_a"], lp["w_ih_b"]]
        h0 = jnp.stack([h0_all[2 * l], h0_all[2 * l + 1]])   # [2, B_pad, H]
        c0 = jnp.stack([c0_all[2 * l], c0_all[2 * l + 1]])

        if l < n_layers - 1:
            yf2d, yr2d = _bilstm_layer(x_list, w_list, lp["bias_cat"],
                                       lp["whh_f"], lp["whh_r"], h0, c0,
                                       hidden_dim=H, seq_len=S, batch=B_pad)
        else:
            out_pad = _bilstm_layer(x_list, w_list, lp["bias_cat"],
                                    lp["whh_f"], lp["whh_r"], h0, c0,
                                    hidden_dim=H, seq_len=S, batch=B_pad,
                                    fc=(prepped["fc_w_pad"],
                                        prepped["fc_b_pad"]))
    return out_pad[:B, :output_size]


# ------------------------- pure-JAX references (check) -----------------------

def _ref_scan_dir(gin_dir, whh, h0, c0, reverse, H):
    g_seq = gin_dir[::-1] if reverse else gin_dir

    def step(carry, g_t):
        h, c = carry
        pre = g_t + jnp.dot(h, whh, preferred_element_type=jnp.float32)
        i = jax.nn.sigmoid(pre[:, 0 * H:1 * H])
        f = jax.nn.sigmoid(pre[:, 1 * H:2 * H])
        g = jnp.tanh(pre[:, 2 * H:3 * H])
        o = jax.nn.sigmoid(pre[:, 3 * H:4 * H])
        c = f * c + i * g
        h = o * jnp.tanh(c)
        return (h, c), h

    (h_last, _), y = lax.scan(step, (h0, c0), g_seq)
    return (y[::-1] if reverse else y), h_last


def _ref_forward(params, token_ids, hidden, *, n_layers, hidden_dim,
                 mm_dtype=None):
    """Pure-JAX reference. mm_dtype=None -> full f32; else mirrors the kernel
    precision (bf16 matmul inputs, f32 accumulation)."""
    H = hidden_dim
    h0_all, c0_all = hidden
    emb = jnp.take(params["embedding"], token_ids, axis=0)
    x = jnp.transpose(emb, (1, 0, 2)).astype(jnp.float32)     # [S, B, 768]

    def mm(a, b):
        if mm_dtype is None:
            return jnp.dot(a, b, preferred_element_type=jnp.float32)
        return jnp.dot(a.astype(mm_dtype), b.astype(mm_dtype),
                       preferred_element_type=jnp.float32)

    yf, yr = x, None
    h_f = h_r = None
    for l in range(n_layers):
        lp = params["lstm"][l]
        if l == 0:
            gin_f = mm(yf, lp["fwd"]["w_ih"]) + lp["fwd"]["bias"]
            gin_r = mm(yf, lp["rev"]["w_ih"]) + lp["rev"]["bias"]
        else:
            gin_f = (mm(yf, lp["fwd"]["w_ih"][:H]) + mm(yr, lp["fwd"]["w_ih"][H:])
                     + lp["fwd"]["bias"])
            gin_r = (mm(yf, lp["rev"]["w_ih"][:H]) + mm(yr, lp["rev"]["w_ih"][H:])
                     + lp["rev"]["bias"])
        yf, h_f = _ref_scan_dir(gin_f, lp["fwd"]["w_hh"], h0_all[2 * l],
                                c0_all[2 * l], False, H)
        yr, h_r = _ref_scan_dir(gin_r, lp["rev"]["w_hh"], h0_all[2 * l + 1],
                                c0_all[2 * l + 1], True, H)

    h_out = jnp.concatenate([h_f, h_r], axis=-1)
    return h_out @ params["fc_w"] + params["fc_b"]


# --------------------------------- main --------------------------------------

if __name__ == "__main__":
    B, S = 2, 8
    hidden_dim, output_size, n_layers = 32, 4, 2
    vocab = 100

    key = jax.random.PRNGKey(0)
    k_tok, k_par = jax.random.split(key)
    params = init_params(k_par, hidden_dim, output_size, n_layers, vocab)
    prepped = prepare_params(params, hidden_dim=hidden_dim,
                             output_size=output_size, n_layers=n_layers)
    token_ids = jax.random.randint(k_tok, (B, S), 0, vocab, dtype=jnp.int32)

    # init_hidden(batch_size): zeros of shape [n_layers * 2, B, H]
    hidden = (jnp.zeros((n_layers * 2, B, hidden_dim), jnp.float32),
              jnp.zeros((n_layers * 2, B, hidden_dim), jnp.float32))

    fwd = jax.jit(functools.partial(bert_lstm_forward, n_layers=n_layers,
                                    hidden_dim=hidden_dim,
                                    output_size=output_size))
    out = jax.block_until_ready(fwd(prepped, token_ids, hidden))
    assert out.shape == (B, output_size), out.shape

    # Check 1 (tight): against a pure-JAX reference using the same matmul
    # precision as the kernels (bf16 inputs, f32 accumulation).
    ref_mirror = jax.block_until_ready(
        _ref_forward(params, token_ids, hidden, n_layers=n_layers,
                     hidden_dim=hidden_dim, mm_dtype=MM_DTYPE))
    assert jnp.allclose(out, ref_mirror, rtol=1e-3, atol=1e-3), (out, ref_mirror)

    # Check 2 (loose): against the full-f32 reference (bf16 matmul drift only).
    ref_f32 = jax.block_until_ready(
        _ref_forward(params, token_ids, hidden, n_layers=n_layers,
                     hidden_dim=hidden_dim, mm_dtype=None))
    assert jnp.allclose(out, ref_f32, rtol=2e-2, atol=2e-2), (out, ref_f32)

    print("KERNEL_OK")
</pallas_src>

<mosaic_0001>
module attributes {stable_mosaic.version = 11 : i64} {
  func.func @_bilstm_layer_kernel(%arg0: memref<64x32xf32, #tpu.memory_space<vmem>>, %arg1: memref<64x32xf32, #tpu.memory_space<vmem>>, %arg2: memref<32x256xbf16, #tpu.memory_space<vmem>>, %arg3: memref<32x256xbf16, #tpu.memory_space<vmem>>, %arg4: memref<1x256xf32, #tpu.memory_space<vmem>>, %arg5: memref<32x128xf32, #tpu.memory_space<vmem>>, %arg6: memref<32x128xf32, #tpu.memory_space<vmem>>, %arg7: memref<2x8x32xf32, #tpu.memory_space<vmem>>, %arg8: memref<2x8x32xf32, #tpu.memory_space<vmem>>, %arg9: memref<64x128xf32, #tpu.memory_space<vmem>>, %arg10: memref<1x128xf32, #tpu.memory_space<vmem>>, %arg11: memref<8x128xf32, #tpu.memory_space<vmem>>, %arg12: memref<64x256xf32, #tpu.memory_space<vmem>>) attributes {dimension_semantics = [], scalar_prefetch = 0 : i64, scratch_operands = 1 : i64, tpu.core_type = #tpu.core_type<tc>} {
    %c0 = arith.constant 0 : index
    %c0_0 = arith.constant 0 : index
    %0 = vector.load %arg0[%c0, %c0_0] : memref<64x32xf32, #tpu.memory_space<vmem>>, vector<64x32xf32>
    %1 = arith.truncf %0 : vector<64x32xf32> to vector<64x32xbf16>
    %c0_1 = arith.constant 0 : index
    %c0_2 = arith.constant 0 : index
    %2 = vector.load %arg2[%c0_1, %c0_2] : memref<32x256xbf16, #tpu.memory_space<vmem>>, vector<32x256xbf16>
    %cst = arith.constant dense<0.000000e+00> : vector<64x256xf32>
    %3 = tpu.matmul %1, %2, %cst {dimension_numbers = #tpu.dot_dimension_numbers<[1], [0], [0], [1], [0, 0, 1, 1], [], []>} : vector<64x32xbf16>, vector<32x256xbf16>, vector<64x256xf32> -> vector<64x256xf32>
    %c0_3 = arith.constant 0 : index
    %c0_4 = arith.constant 0 : index
    %4 = vector.load %arg1[%c0_3, %c0_4] : memref<64x32xf32, #tpu.memory_space<vmem>>, vector<64x32xf32>
    %5 = arith.truncf %4 : vector<64x32xf32> to vector<64x32xbf16>
    %c0_5 = arith.constant 0 : index
    %c0_6 = arith.constant 0 : index
    %6 = vector.load %arg3[%c0_5, %c0_6] : memref<32x256xbf16, #tpu.memory_space<vmem>>, vector<32x256xbf16>
    %cst_7 = arith.constant dense<0.000000e+00> : vector<64x256xf32>
    %7 = tpu.matmul %5, %6, %cst_7 {dimension_numbers = #tpu.dot_dimension_numbers<[1], [0], [0], [1], [0, 0, 1, 1], [], []>} : vector<64x32xbf16>, vector<32x256xbf16>, vector<64x256xf32> -> vector<64x256xf32>
    %8 = arith.addf %3, %7 : vector<64x256xf32>
    %c0_8 = arith.constant 0 : index
    %c0_9 = arith.constant 0 : index
    %9 = vector.load %arg4[%c0_8, %c0_9] : memref<1x256xf32, #tpu.memory_space<vmem>>, vector<1x256xf32>
    %10 = vector.broadcast %9 : vector<1x256xf32> to vector<64x256xf32>
    %11 = arith.addf %8, %10 : vector<64x256xf32>
    %c0_10 = arith.constant 0 : index
    %c0_11 = arith.constant 0 : index
    %12 = vector.load %arg12[%c0_10, %c0_11] : memref<64x256xf32, #tpu.memory_space<vmem>>, vector<64x256xf32>
    tpu.vector_store %arg12[%c0_10, %c0_11], %11 {strides = array<i32>} : memref<64x256xf32, #tpu.memory_space<vmem>>, vector<64x256xf32>,
    %c0_12 = arith.constant 0 : index
    %c0_13 = arith.constant 0 : index
    %c0_14 = arith.constant 0 : index
    %13 = vector.load %arg7[%c0_12, %c0_13, %c0_14] : memref<2x8x32xf32, #tpu.memory_space<vmem>>, vector<1x8x32xf32>
    %14 = vector.shape_cast %13 : vector<1x8x32xf32> to vector<8x32xf32>
    %c0_15 = arith.constant 0 : index
    %c0_16 = arith.constant 0 : index
    %c0_17 = arith.constant 0 : index
    %15 = vector.load %arg8[%c0_15, %c0_16, %c0_17] : memref<2x8x32xf32, #tpu.memory_space<vmem>>, vector<1x8x32xf32>
    %16 = vector.shape_cast %15 : vector<1x8x32xf32> to vector<8x32xf32>
    %c1 = arith.constant 1 : index
    %c0_18 = arith.constant 0 : index
    %c0_19 = arith.constant 0 : index
    %17 = vector.load %arg7[%c1, %c0_18, %c0_19] : memref<2x8x32xf32, #tpu.memory_space<vmem>>, vector<1x8x32xf32>
    %18 = vector.shape_cast %17 : vector<1x8x32xf32> to vector<8x32xf32>
    %c1_20 = arith.constant 1 : index
    %c0_21 = arith.constant 0 : index
    %c0_22 = arith.constant 0 : index
    %19 = vector.load %arg8[%c1_20, %c0_21, %c0_22] : memref<2x8x32xf32, #tpu.memory_space<vmem>>, vector<1x8x32xf32>
    %20 = vector.shape_cast %19 : vector<1x8x32xf32> to vector<8x32xf32>
    %c0_i32 = arith.constant 0 : i32
    %c7_i32 = arith.constant 7 : i32
    %21 = arith.subi %c7_i32, %c0_i32 : i32
    %c8_i32 = arith.constant 8 : i32
    %22 = arith.muli %c0_i32, %c8_i32 : i32
    %23 = tpu.assume_multiple %22, 8 : i32
    %c8_i32_23 = arith.constant 8 : i32
    %24 = arith.muli %21, %c8_i32_23 : i32
    %25 = tpu.assume_multiple %24, 8 : i32
    %26 = arith.index_cast %23 : i32 to index
    %c0_24 = arith.constant 0 : index
    %27 = vector.load %arg12[%26, %c0_24] : memref<64x256xf32, #tpu.memory_space<vmem>>, vector<8x256xf32>
    %28 = arith.index_cast %25 : i32 to index
    %c0_25 = arith.constant 0 : index
    %29 = vector.load %arg12[%28, %c0_25] : memref<64x256xf32, #tpu.memory_space<vmem>>, vector<8x256xf32>
    %30 = vector.extract_strided_slice %27 {offsets = [0, 0], sizes = [8, 128], strides = [1, 1]} : vector<8x256xf32> to vector<8x128xf32>
    %c0_26 = arith.constant 0 : index
    %c0_27 = arith.constant 0 : index
    %31 = vector.load %arg5[%c0_26, %c0_27] : memref<32x128xf32, #tpu.memory_space<vmem>>, vector<32x128xf32>
    %cst_28 = arith.constant dense<0.000000e+00> : vector<8x128xf32>
    %32 = tpu.matmul %14, %31, %cst_28 {dimension_numbers = #tpu.dot_dimension_numbers<[1], [0], [0], [1], [0, 0, 1, 1], [], []>} : vector<8x32xf32>, vector<32x128xf32>, vector<8x128xf32> -> vector<8x128xf32>
    %33 = arith.addf %30, %32 : vector<8x128xf32>
    %34 = vector.extract_strided_slice %29 {offsets = [0, 128], sizes = [8, 128], strides = [1, 1]} : vector<8x256xf32> to vector<8x128xf32>
    %c0_29 = arith.constant 0 : index
    %c0_30 = arith.constant 0 : index
    %35 = vector.load %arg6[%c0_29, %c0_30] : memref<32x128xf32, #tpu.memory_space<vmem>>, vector<32x128xf32>
    %cst_31 = arith.constant dense<0.000000e+00> : vector<8x128xf32>
    %36 = tpu.matmul %18, %35, %cst_31 {dimension_numbers = #tpu.dot_dimension_numbers<[1], [0], [0], [1], [0, 0, 1, 1], [], []>} : vector<8x32xf32>, vector<32x128xf32>, vector<8x128xf32> -> vector<8x128xf32>
    %37 = arith.addf %34, %36 : vector<8x128xf32>
    %38 = arith.negf %33 : vector<8x128xf32>
    %39 = math.exp %38 : vector<8x128xf32>
    %cst_32 = arith.constant 1.000000e+00 : f32
    %40 = vector.broadcast %cst_32 : f32 to vector<8x128xf32>
    %41 = arith.addf %40, %39 : vector<8x128xf32>
    %42 = arith.divf %40, %41 : vector<8x128xf32>
    %43 = math.tanh %33 : vector<8x128xf32>
    %44 = vector.extract_strided_slice %42 {offsets = [0, 0], sizes = [8, 32], strides = [1, 1]} : vector<8x128xf32> to vector<8x32xf32>
    %45 = vector.extract_strided_slice %42 {offsets = [0, 32], sizes = [8, 32], strides = [1, 1]} : vector<8x128xf32> to vector<8x32xf32>
    %46 = vector.extract_strided_slice %43 {offsets = [0, 64], sizes = [8, 32], strides = [1, 1]} : vector<8x128xf32> to vector<8x32xf32>
    %47 = vector.extract_strided_slice %42 {offsets = [0, 96], sizes = [8, 32], strides = [1, 1]} : vector<8x128xf32> to vector<8x32xf32>
    %48 = arith.mulf %45, %16 : vector<8x32xf32>
    %49 = arith.mulf %44, %46 : vector<8x32xf32>
    %50 = arith.addf %48, %49 : vector<8x32xf32>
    %51 = math.tanh %50 : vector<8x32xf32>
    %52 = arith.mulf %47, %51 : vector<8x32xf32>
    %53 = arith.negf %37 : vector<8x128xf32>
    %54 = math.exp %53 : vector<8x128xf32>
    %cst_33 = arith.constant 1.000000e+00 : f32
    %55 = vector.broadcast %cst_33 : f32 to vector<8x128xf32>
    %56 = arith.addf %55, %54 : vector<8x128xf32>
    %57 = arith.divf %55, %56 : vector<8x128xf32>
    %58 = math.tanh %37 : vector<8x128xf32>
    %59 = vector.extract_strided_slice %57 {offsets = [0, 0], sizes = [8, 32], strides = [1, 1]} : vector<8x128xf32> to vector<8x32xf32>
    %60 = vector.extract_strided_slice %57 {offsets = [0, 32], sizes = [8, 32], strides = [1, 1]} : vector<8x128xf32> to vector<8x32xf32>
    %61 = vector.extract_strided_slice %58 {offsets = [0, 64], sizes = [8, 32], strides = [1, 1]} : vector<8x128xf32> to vector<8x32xf32>
    %62 = vector.extract_strided_slice %57 {offsets = [0, 96], sizes = [8, 32], strides = [1, 1]} : vector<8x128xf32> to vector<8x32xf32>
    %63 = arith.mulf %60, %20 : vector<8x32xf32>
    %64 = arith.mulf %59, %61 : vector<8x32xf32>
    %65 = arith.addf %63, %64 : vector<8x32xf32>
    %66 = math.tanh %65 : vector<8x32xf32>
    %67 = arith.mulf %62, %66 : vector<8x32xf32>
    %c1_i32 = arith.constant 1 : i32
    %c7_i32_34 = arith.constant 7 : i32
    %68 = arith.subi %c7_i32_34, %c1_i32 : i32
    %c8_i32_35 = arith.constant 8 : i32
    %69 = arith.muli %c1_i32, %c8_i32_35 : i32
    %70 = tpu.assume_multiple %69, 8 : i32
    %c8_i32_36 = arith.constant 8 : i32
    %71 = arith.muli %68, %c8_i32_36 : i32
    %72 = tpu.assume_multiple %71, 8 : i32
    %73 = arith.index_cast %70 : i32 to index
    %c0_37 = arith.constant 0 : index
    %74 = vector.load %arg12[%73, %c0_37] : memref<64x256xf32, #tpu.memory_space<vmem>>, vector<8x256xf32>
    %75 = arith.index_cast %72 : i32 to index
    %c0_38 = arith.constant 0 : index
    %76 = vector.load %arg12[%75, %c0_38] : memref<64x256xf32, #tpu.memory_space<vmem>>, vector<8x256xf32>
    %77 = vector.extract_strided_slice %74 {offsets = [0, 0], sizes = [8, 128], strides = [1, 1]} : vector<8x256xf32> to vector<8x128xf32>
    %c0_39 = arith.constant 0 : index
    %c0_40 = arith.constant 0 : index
    %78 = vector.load %arg5[%c0_39, %c0_40] : memref<32x128xf32, #tpu.memory_space<vmem>>, vector<32x128xf32>
    %cst_41 = arith.constant dense<0.000000e+00> : vector<8x128xf32>
    %79 = tpu.matmul %52, %78, %cst_41 {dimension_numbers = #tpu.dot_dimension_numbers<[1], [0], [0], [1], [0, 0, 1, 1], [], []>} : vector<8x32xf32>, vector<32x128xf32>, vector<8x128xf32> -> vector<8x128xf32>
    %80 = arith.addf %77, %79 : vector<8x128xf32>
    %81 = vector.extract_strided_slice %76 {offsets = [0, 128], sizes = [8, 128], strides = [1, 1]} : vector<8x256xf32> to vector<8x128xf32>
    %c0_42 = arith.constant 0 : index
    %c0_43 = arith.constant 0 : index
    %82 = vector.load %arg6[%c0_42, %c0_43] : memref<32x128xf32, #tpu.memory_space<vmem>>, vector<32x128xf32>
    %cst_44 = arith.constant dense<0.000000e+00> : vector<8x128xf32>
    %83 = tpu.matmul %67, %82, %cst_44 {dimension_numbers = #tpu.dot_dimension_numbers<[1], [0], [0], [1], [0, 0, 1, 1], [], []>} : vector<8x32xf32>, vector<32x128xf32>, vector<8x128xf32> -> vector<8x128xf32>
    %84 = arith.addf %81, %83 : vector<8x128xf32>
    %85 = arith.negf %80 : vector<8x128xf32>
    %86 = math.exp %85 : vector<8x128xf32>
    %cst_45 = arith.constant 1.000000e+00 : f32
    %87 = vector.broadcast %cst_45 : f32 to vector<8x128xf32>
    %88 = arith.addf %87, %86 : vector<8x128xf32>
    %89 = arith.divf %87, %88 : vector<8x128xf32>
    %90 = math.tanh %80 : vector<8x128xf32>
    %91 = vector.extract_strided_slice %89 {offsets = [0, 0], sizes = [8, 32], strides = [1, 1]} : vector<8x128xf32> to vector<8x32xf32>
    %92 = vector.extract_strided_slice %89 {offsets = [0, 32], sizes = [8, 32], strides = [1, 1]} : vector<8x128xf32> to vector<8x32xf32>
    %93 = vector.extract_strided_slice %90 {offsets = [0, 64], sizes = [8, 32], strides = [1, 1]} : vector<8x128xf32> to vector<8x32xf32>
    %94 = vector.extract_strided_slice %89 {offsets = [0, 96], sizes = [8, 32], strides = [1, 1]} : vector<8x128xf32> to vector<8x32xf32>
    %95 = arith.mulf %92, %50 : vector<8x32xf32>
    %96 = arith.mulf %91, %93 : vector<8x32xf32>
    %97 = arith.addf %95, %96 : vector<8x32xf32>
    %98 = math.tanh %97 : vector<8x32xf32>
    %99 = arith.mulf %94, %98 : vector<8x32xf32>
    %100 = arith.negf %84 : vector<8x128xf32>
    %101 = math.exp %100 : vector<8x128xf32>
    %cst_46 = arith.constant 1.000000e+00 : f32
    %102 = vector.broadcast %cst_46 : f32 to vector<8x128xf32>
    %103 = arith.addf %102, %101 : vector<8x128xf32>
    %104 = arith.divf %102, %103 : vector<8x128xf32>
    %105 = math.tanh %84 : vector<8x128xf32>
    %106 = vector.extract_strided_slice %104 {offsets = [0, 0], sizes = [8, 32], strides = [1, 1]} : vector<8x128xf32> to vector<8x32xf32>
    %107 = vector.extract_strided_slice %104 {offsets = [0, 32], sizes = [8, 32], strides = [1, 1]} : vector<8x128xf32> to vector<8x32xf32>
    %108 = vector.extract_strided_slice %105 {offsets = [0, 64], sizes = [8, 32], strides = [1, 1]} : vector<8x128xf32> to vector<8x32xf32>
    %109 = vector.extract_strided_slice %104 {offsets = [0, 96], sizes = [8, 32], strides = [1, 1]} : vector<8x128xf32> to vector<8x32xf32>
    %110 = arith.mulf %107, %65 : vector<8x32xf32>
    %111 = arith.mulf %106, %108 : vector<8x32xf32>
    %112 = arith.addf %110, %111 : vector<8x32xf32>
    %113 = math.tanh %112 : vector<8x32xf32>
    %114 = arith.mulf %109, %113 : vector<8x32xf32>
    %c2_i32 = arith.constant 2 : i32
    %c7_i32_47 = arith.constant 7 : i32
    %115 = arith.subi %c7_i32_47, %c2_i32 : i32
    %c8_i32_48 = arith.constant 8 : i32
    %116 = arith.muli %c2_i32, %c8_i32_48 : i32
    %117 = tpu.assume_multiple %116, 8 : i32
    %c8_i32_49 = arith.constant 8 : i32
    %118 = arith.muli %115, %c8_i32_49 : i32
    %119 = tpu.assume_multiple %118, 8 : i32
    %120 = arith.index_cast %117 : i32 to index
    %c0_50 = arith.constant 0 : index
    %121 = vector.load %arg12[%120, %c0_50] : memref<64x256xf32, #tpu.memory_space<vmem>>, vector<8x256xf32>
    %122 = arith.index_cast %119 : i32 to index
    %c0_51 = arith.constant 0 : index
    %123 = vector.load %arg12[%122, %c0_51] : memref<64x256xf32, #tpu.memory_space<vmem>>, vector<8x256xf32>
    %124 = vector.extract_strided_slice %121 {offsets = [0, 0], sizes = [8, 128], strides = [1, 1]} : vector<8x256xf32> to vector<8x128xf32>
    %c0_52 = arith.constant 0 : index
    %c0_53 = arith.constant 0 : index
    %125 = vector.load %arg5[%c0_52, %c0_53] : memref<32x128xf32, #tpu.memory_space<vmem>>, vector<32x128xf32>
    %cst_54 = arith.constant dense<0.000000e+00> : vector<8x128xf32>
    %126 = tpu.matmul %99, %125, %cst_54 {dimension_numbers = #tpu.dot_dimension_numbers<[1], [0], [0], [1], [0, 0, 1, 1], [], []>} : vector<8x32xf32>, vector<32x128xf32>, vector<8x128xf32> -> vector<8x128xf32>
    %127 = arith.addf %124, %126 : vector<8x128xf32>
    %128 = vector.extract_strided_slice %123 {offsets = [0, 128], sizes = [8, 128], strides = [1, 1]} : vector<8x256xf32> to vector<8x128xf32>
    %c0_55 = arith.constant 0 : index
    %c0_56 = arith.constant 0 : index
    %129 = vector.load %arg6[%c0_55, %c0_56] : memref<32x128xf32, #tpu.memory_space<vmem>>, vector<32x128xf32>
    %cst_57 = arith.constant dense<0.000000e+00> : vector<8x128xf32>
    %130 = tpu.matmul %114, %129, %cst_57 {dimension_numbers = #tpu.dot_dimension_numbers<[1], [0], [0], [1], [0, 0, 1, 1], [], []>} : vector<8x32xf32>, vector<32x128xf32>, vector<8x128xf32> -> vector<8x128xf32>
    %131 = arith.addf %128, %130 : vector<8x128xf32>
    %132 = arith.negf %127 : vector<8x128xf32>
    %133 = math.exp %132 : vector<8x128xf32>
    %cst_58 = arith.constant 1.000000e+00 : f32
    %134 = vector.broadcast %cst_58 : f32 to vector<8x128xf32>
    %135 = arith.addf %134, %133 : vector<8x128xf32>
    %136 = arith.divf %134, %135 : vector<8x128xf32>
    %137 = math.tanh %127 : vector<8x128xf32>
    %138 = vector.extract_strided_slice %136 {offsets = [0, 0], sizes = [8, 32], strides = [1, 1]} : vector<8x128xf32> to vector<8x32xf32>
    %139 = vector.extract_strided_slice %136 {offsets = [0, 32], sizes = [8, 32], strides = [1, 1]} : vector<8x128xf32> to vector<8x32xf32>
    %140 = vector.extract_strided_slice %137 {offsets = [0, 64], sizes = [8, 32], strides = [1, 1]} : vector<8x128xf32> to vector<8x32xf32>
    %141 = vector.extract_strided_slice %136 {offsets = [0, 96], sizes = [8, 32], strides = [1, 1]} : vector<8x128xf32> to vector<8x32xf32>
    %142 = arith.mulf %139, %97 : vector<8x32xf32>
    %143 = arith.mulf %138, %140 : vector<8x32xf32>
    %144 = arith.addf %142, %143 : vector<8x32xf32>
    %145 = math.tanh %144 : vector<8x32xf32>
    %146 = arith.mulf %141, %145 : vector<8x32xf32>
    %147 = arith.negf %131 : vector<8x128xf32>
    %148 = math.exp %147 : vector<8x128xf32>
    %cst_59 = arith.constant 1.000000e+00 : f32
    %149 = vector.broadcast %cst_59 : f32 to vector<8x128xf32>
    %150 = arith.addf %149, %148 : vector<8x128xf32>
    %151 = arith.divf %149, %150 : vector<8x128xf32>
    %152 = math.tanh %131 : vector<8x128xf32>
    %153 = vector.extract_strided_slice %151 {offsets = [0, 0], sizes = [8, 32], strides = [1, 1]} : vector<8x128xf32> to vector<8x32xf32>
    %154 = vector.extract_strided_slice %151 {offsets = [0, 32], sizes = [8, 32], strides = [1, 1]} : vector<8x128xf32> to vector<8x32xf32>
    %155 = vector.extract_strided_slice %152 {offsets = [0, 64], sizes = [8, 32], strides = [1, 1]} : vector<8x128xf32> to vector<8x32xf32>
    %156 = vector.extract_strided_slice %151 {offsets = [0, 96], sizes = [8, 32], strides = [1, 1]} : vector<8x128xf32> to vector<8x32xf32>
    %157 = arith.mulf %154, %112 : vector<8x32xf32>
    %158 = arith.mulf %153, %155 : vector<8x32xf32>
    %159 = arith.addf %157, %158 : vector<8x32xf32>
    %160 = math.tanh %159 : vector<8x32xf32>
    %161 = arith.mulf %156, %160 : vector<8x32xf32>
    %c3_i32 = arith.constant 3 : i32
    %c7_i32_60 = arith.constant 7 : i32
    %162 = arith.subi %c7_i32_60, %c3_i32 : i32
    %c8_i32_61 = arith.constant 8 : i32
    %163 = arith.muli %c3_i32, %c8_i32_61 : i32
    %164 = tpu.assume_multiple %163, 8 : i32
    %c8_i32_62 = arith.constant 8 : i32
    %165 = arith.muli %162, %c8_i32_62 : i32
    %166 = tpu.assume_multiple %165, 8 : i32
    %167 = arith.index_cast %164 : i32 to index
    %c0_63 = arith.constant 0 : index
    %168 = vector.load %arg12[%167, %c0_63] : memref<64x256xf32, #tpu.memory_space<vmem>>, vector<8x256xf32>
    %169 = arith.index_cast %166 : i32 to index
    %c0_64 = arith.constant 0 : index
    %170 = vector.load %arg12[%169, %c0_64] : memref<64x256xf32, #tpu.memory_space<vmem>>, vector<8x256xf32>
    %171 = vector.extract_strided_slice %168 {offsets = [0, 0], sizes = [8, 128], strides = [1, 1]} : vector<8x256xf32> to vector<8x128xf32>
    %c0_65 = arith.constant 0 : index
    %c0_66 = arith.constant 0 : index
    %172 = vector.load %arg5[%c0_65, %c0_66] : memref<32x128xf32, #tpu.memory_space<vmem>>, vector<32x128xf32>
    %cst_67 = arith.constant dense<0.000000e+00> : vector<8x128xf32>
    %173 = tpu.matmul %146, %172, %cst_67 {dimension_numbers = #tpu.dot_dimension_numbers<[1], [0], [0], [1], [0, 0, 1, 1], [], []>} : vector<8x32xf32>, vector<32x128xf32>, vector<8x128xf32> -> vector<8x128xf32>
    %174 = arith.addf %171, %173 : vector<8x128xf32>
    %175 = vector.extract_strided_slice %170 {offsets = [0, 128], sizes = [8, 128], strides = [1, 1]} : vector<8x256xf32> to vector<8x128xf32>
    %c0_68 = arith.constant 0 : index
    %c0_69 = arith.constant 0 : index
    %176 = vector.load %arg6[%c0_68, %c0_69] : memref<32x128xf32, #tpu.memory_space<vmem>>, vector<32x128xf32>
    %cst_70 = arith.constant dense<0.000000e+00> : vector<8x128xf32>
    %177 = tpu.matmul %161, %176, %cst_70 {dimension_numbers = #tpu.dot_dimension_numbers<[1], [0], [0], [1], [0, 0, 1, 1], [], []>} : vector<8x32xf32>, vector<32x128xf32>, vector<8x128xf32> -> vector<8x128xf32>
    %178 = arith.addf %175, %177 : vector<8x128xf32>
    %179 = arith.negf %174 : vector<8x128xf32>
    %180 = math.exp %179 : vector<8x128xf32>
    %cst_71 = arith.constant 1.000000e+00 : f32
    %181 = vector.broadcast %cst_71 : f32 to vector<8x128xf32>
    %182 = arith.addf %181, %180 : vector<8x128xf32>
    %183 = arith.divf %181, %182 : vector<8x128xf32>
    %184 = math.tanh %174 : vector<8x128xf32>
    %185 = vector.extract_strided_slice %183 {offsets = [0, 0], sizes = [8, 32], strides = [1, 1]} : vector<8x128xf32> to vector<8x32xf32>
    %186 = vector.extract_strided_slice %183 {offsets = [0, 32], sizes = [8, 32], strides = [1, 1]} : vector<8x128xf32> to vector<8x32xf32>
    %187 = vector.extract_strided_slice %184 {offsets = [0, 64], sizes = [8, 32], strides = [1, 1]} : vector<8x128xf32> to vector<8x32xf32>
    %188 = vector.extract_strided_slice %183 {offsets = [0, 96], sizes = [8, 32], strides = [1, 1]} : vector<8x128xf32> to vector<8x32xf32>
    %189 = arith.mulf %186, %144 : vector<8x32xf32>
    %190 = arith.mulf %185, %187 : vector<8x32xf32>
    %191 = arith.addf %189, %190 : vector<8x32xf32>
    %192 = math.tanh %191 : vector<8x32xf32>
    %193 = arith.mulf %188, %192 : vector<8x32xf32>
    %194 = arith.negf %178 : vector<8x128xf32>
    %195 = math.exp %194 : vector<8x128xf32>
    %cst_72 = arith.constant 1.000000e+00 : f32
    %196 = vector.broadcast %cst_72 : f32 to vector<8x128xf32>
    %197 = arith.addf %196, %195 : vector<8x128xf32>
    %198 = arith.divf %196, %197 : vector<8x128xf32>
    %199 = math.tanh %178 : vector<8x128xf32>
    %200 = vector.extract_strided_slice %198 {offsets = [0, 0], sizes = [8, 32], strides = [1, 1]} : vector<8x128xf32> to vector<8x32xf32>
    %201 = vector.extract_strided_slice %198 {offsets = [0, 32], sizes = [8, 32], strides = [1, 1]} : vector<8x128xf32> to vector<8x32xf32>
    %202 = vector.extract_strided_slice %199 {offsets = [0, 64], sizes = [8, 32], strides = [1, 1]} : vector<8x128xf32> to vector<8x32xf32>
    %203 = vector.extract_strided_slice %198 {offsets = [0, 96], sizes = [8, 32], strides = [1, 1]} : vector<8x128xf32> to vector<8x32xf32>
    %204 = arith.mulf %201, %159 : vector<8x32xf32>
    %205 = arith.mulf %200, %202 : vector<8x32xf32>
    %206 = arith.addf %204, %205 : vector<8x32xf32>
    %207 = math.tanh %206 : vector<8x32xf32>
    %208 = arith.mulf %203, %207 : vector<8x32xf32>
    %c4_i32 = arith.constant 4 : i32
    %c7_i32_73 = arith.constant 7 : i32
    %209 = arith.subi %c7_i32_73, %c4_i32 : i32
    %c8_i32_74 = arith.constant 8 : i32
    %210 = arith.muli %c4_i32, %c8_i32_74 : i32
    %211 = tpu.assume_multiple %210, 8 : i32
    %c8_i32_75 = arith.constant 8 : i32
    %212 = arith.muli %209, %c8_i32_75 : i32
    %213 = tpu.assume_multiple %212, 8 : i32
    %214 = arith.index_cast %211 : i32 to index
    %c0_76 = arith.constant 0 : index
    %215 = vector.load %arg12[%214, %c0_76] : memref<64x256xf32, #tpu.memory_space<vmem>>, vector<8x256xf32>
    %216 = arith.index_cast %213 : i32 to index
    %c0_77 = arith.constant 0 : index
    %217 = vector.load %arg12[%216, %c0_77] : memref<64x256xf32, #tpu.memory_space<vmem>>, vector<8x256xf32>
    %218 = vector.extract_strided_slice %215 {offsets = [0, 0], sizes = [8, 128], strides = [1, 1]} : vector<8x256xf32> to vector<8x128xf32>
    %c0_78 = arith.constant 0 : index
    %c0_79 = arith.constant 0 : index
    %219 = vector.load %arg5[%c0_78, %c0_79] : memref<32x128xf32, #tpu.memory_space<vmem>>, vector<32x128xf32>
    %cst_80 = arith.constant dense<0.000000e+00> : vector<8x128xf32>
    %220 = tpu.matmul %193, %219, %cst_80 {dimension_numbers = #tpu.dot_dimension_numbers<[1], [0], [0], [1], [0, 0, 1, 1], [], []>} : vector<8x32xf32>, vector<32x128xf32>, vector<8x128xf32> -> vector<8x128xf32>
    %221 = arith.addf %218, %220 : vector<8x128xf32>
    %222 = vector.extract_strided_slice %217 {offsets = [0, 128], sizes = [8, 128], strides = [1, 1]} : vector<8x256xf32> to vector<8x128xf32>
    %c0_81 = arith.constant 0 : index
    %c0_82 = arith.constant 0 : index
    %223 = vector.load %arg6[%c0_81, %c0_82] : memref<32x128xf32, #tpu.memory_space<vmem>>, vector<32x128xf32>
    %cst_83 = arith.constant dense<0.000000e+00> : vector<8x128xf32>
    %224 = tpu.matmul %208, %223, %cst_83 {dimension_numbers = #tpu.dot_dimension_numbers<[1], [0], [0], [1], [0, 0, 1, 1], [], []>} : vector<8x32xf32>, vector<32x128xf32>, vector<8x128xf32> -> vector<8x128xf32>
    %225 = arith.addf %222, %224 : vector<8x128xf32>
    %226 = arith.negf %221 : vector<8x128xf32>
    %227 = math.exp %226 : vector<8x128xf32>
    %cst_84 = arith.constant 1.000000e+00 : f32
    %228 = vector.broadcast %cst_84 : f32 to vector<8x128xf32>
    %229 = arith.addf %228, %227 : vector<8x128xf32>
    %230 = arith.divf %228, %229 : vector<8x128xf32>
    %231 = math.tanh %221 : vector<8x128xf32>
    %232 = vector.extract_strided_slice %230 {offsets = [0, 0], sizes = [8, 32], strides = [1, 1]} : vector<8x128xf32> to vector<8x32xf32>
    %233 = vector.extract_strided_slice %230 {offsets = [0, 32], sizes = [8, 32], strides = [1, 1]} : vector<8x128xf32> to vector<8x32xf32>
    %234 = vector.extract_strided_slice %231 {offsets = [0, 64], sizes = [8, 32], strides = [1, 1]} : vector<8x128xf32> to vector<8x32xf32>
    %235 = vector.extract_strided_slice %230 {offsets = [0, 96], sizes = [8, 32], strides = [1, 1]} : vector<8x128xf32> to vector<8x32xf32>
    %236 = arith.mulf %233, %191 : vector<8x32xf32>
    %237 = arith.mulf %232, %234 : vector<8x32xf32>
    %238 = arith.addf %236, %237 : vector<8x32xf32>
    %239 = math.tanh %238 : vector<8x32xf32>
    %240 = arith.mulf %235, %239 : vector<8x32xf32>
    %241 = arith.negf %225 : vector<8x128xf32>
    %242 = math.exp %241 : vector<8x128xf32>
    %cst_85 = arith.constant 1.000000e+00 : f32
    %243 = vector.broadcast %cst_85 : f32 to vector<8x128xf32>
    %244 = arith.addf %243, %242 : vector<8x128xf32>
    %245 = arith.divf %243, %244 : vector<8x128xf32>
    %246 = math.tanh %225 : vector<8x128xf32>
    %247 = vector.extract_strided_slice %245 {offsets = [0, 0], sizes = [8, 32], strides = [1, 1]} : vector<8x128xf32> to vector<8x32xf32>
    %248 = vector.extract_strided_slice %245 {offsets = [0, 32], sizes = [8, 32], strides = [1, 1]} : vector<8x128xf32> to vector<8x32xf32>
    %249 = vector.extract_strided_slice %246 {offsets = [0, 64], sizes = [8, 32], strides = [1, 1]} : vector<8x128xf32> to vector<8x32xf32>
    %250 = vector.extract_strided_slice %245 {offsets = [0, 96], sizes = [8, 32], strides = [1, 1]} : vector<8x128xf32> to vector<8x32xf32>
    %251 = arith.mulf %248, %206 : vector<8x32xf32>
    %252 = arith.mulf %247, %249 : vector<8x32xf32>
    %253 = arith.addf %251, %252 : vector<8x32xf32>
    %254 = math.tanh %253 : vector<8x32xf32>
    %255 = arith.mulf %250, %254 : vector<8x32xf32>
    %c5_i32 = arith.constant 5 : i32
    %c7_i32_86 = arith.constant 7 : i32
    %256 = arith.subi %c7_i32_86, %c5_i32 : i32
    %c8_i32_87 = arith.constant 8 : i32
    %257 = arith.muli %c5_i32, %c8_i32_87 : i32
    %258 = tpu.assume_multiple %257, 8 : i32
    %c8_i32_88 = arith.constant 8 : i32
    %259 = arith.muli %256, %c8_i32_88 : i32
    %260 = tpu.assume_multiple %259, 8 : i32
    %261 = arith.index_cast %258 : i32 to index
    %c0_89 = arith.constant 0 : index
    %262 = vector.load %arg12[%261, %c0_89] : memref<64x256xf32, #tpu.memory_space<vmem>>, vector<8x256xf32>
    %263 = arith.index_cast %260 : i32 to index
    %c0_90 = arith.constant 0 : index
    %264 = vector.load %arg12[%263, %c0_90] : memref<64x256xf32, #tpu.memory_space<vmem>>, vector<8x256xf32>
    %265 = vector.extract_strided_slice %262 {offsets = [0, 0], sizes = [8, 128], strides = [1, 1]} : vector<8x256xf32> to vector<8x128xf32>
    %c0_91 = arith.constant 0 : index
    %c0_92 = arith.constant 0 : index
    %266 = vector.load %arg5[%c0_91, %c0_92] : memref<32x128xf32, #tpu.memory_space<vmem>>, vector<32x128xf32>
    %cst_93 = arith.constant dense<0.000000e+00> : vector<8x128xf32>
    %267 = tpu.matmul %240, %266, %cst_93 {dimension_numbers = #tpu.dot_dimension_numbers<[1], [0], [0], [1], [0, 0, 1, 1], [], []>} : vector<8x32xf32>, vector<32x128xf32>, vector<8x128xf32> -> vector<8x128xf32>
    %268 = arith.addf %265, %267 : vector<8x128xf32>
    %269 = vector.extract_strided_slice %264 {offsets = [0, 128], sizes = [8, 128], strides = [1, 1]} : vector<8x256xf32> to vector<8x128xf32>
    %c0_94 = arith.constant 0 : index
    %c0_95 = arith.constant 0 : index
    %270 = vector.load %arg6[%c0_94, %c0_95] : memref<32x128xf32, #tpu.memory_space<vmem>>, vector<32x128xf32>
    %cst_96 = arith.constant dense<0.000000e+00> : vector<8x128xf32>
    %271 = tpu.matmul %255, %270, %cst_96 {dimension_numbers = #tpu.dot_dimension_numbers<[1], [0], [0], [1], [0, 0, 1, 1], [], []>} : vector<8x32xf32>, vector<32x128xf32>, vector<8x128xf32> -> vector<8x128xf32>
    %272 = arith.addf %269, %271 : vector<8x128xf32>
    %273 = arith.negf %268 : vector<8x128xf32>
    %274 = math.exp %273 : vector<8x128xf32>
    %cst_97 = arith.constant 1.000000e+00 : f32
    %275 = vector.broadcast %cst_97 : f32 to vector<8x128xf32>
    %276 = arith.addf %275, %274 : vector<8x128xf32>
    %277 = arith.divf %275, %276 : vector<8x128xf32>
    %278 = math.tanh %268 : vector<8x128xf32>
    %279 = vector.extract_strided_slice %277 {offsets = [0, 0], sizes = [8, 32], strides = [1, 1]} : vector<8x128xf32> to vector<8x32xf32>
    %280 = vector.extract_strided_slice %277 {offsets = [0, 32], sizes = [8, 32], strides = [1, 1]} : vector<8x128xf32> to vector<8x32xf32>
    %281 = vector.extract_strided_slice %278 {offsets = [0, 64], sizes = [8, 32], strides = [1, 1]} : vector<8x128xf32> to vector<8x32xf32>
    %282 = vector.extract_strided_slice %277 {offsets = [0, 96], sizes = [8, 32], strides = [1, 1]} : vector<8x128xf32> to vector<8x32xf32>
    %283 = arith.mulf %280, %238 : vector<8x32xf32>
    %284 = arith.mulf %279, %281 : vector<8x32xf32>
    %285 = arith.addf %283, %284 : vector<8x32xf32>
    %286 = math.tanh %285 : vector<8x32xf32>
    %287 = arith.mulf %282, %286 : vector<8x32xf32>
    %288 = arith.negf %272 : vector<8x128xf32>
    %289 = math.exp %288 : vector<8x128xf32>
    %cst_98 = arith.constant 1.000000e+00 : f32
    %290 = vector.broadcast %cst_98 : f32 to vector<8x128xf32>
    %291 = arith.addf %290, %289 : vector<8x128xf32>
    %292 = arith.divf %290, %291 : vector<8x128xf32>
    %293 = math.tanh %272 : vector<8x128xf32>
    %294 = vector.extract_strided_slice %292 {offsets = [0, 0], sizes = [8, 32], strides = [1, 1]} : vector<8x128xf32> to vector<8x32xf32>
    %295 = vector.extract_strided_slice %292 {offsets = [0, 32], sizes = [8, 32], strides = [1, 1]} : vector<8x128xf32> to vector<8x32xf32>
    %296 = vector.extract_strided_slice %293 {offsets = [0, 64], sizes = [8, 32], strides = [1, 1]} : vector<8x128xf32> to vector<8x32xf32>
    %297 = vector.extract_strided_slice %292 {offsets = [0, 96], sizes = [8, 32], strides = [1, 1]} : vector<8x128xf32> to vector<8x32xf32>
    %298 = arith.mulf %295, %253 : vector<8x32xf32>
    %299 = arith.mulf %294, %296 : vector<8x32xf32>
    %300 = arith.addf %298, %299 : vector<8x32xf32>
    %301 = math.tanh %300 : vector<8x32xf32>
    %302 = arith.mulf %297, %301 : vector<8x32xf32>
    %c6_i32 = arith.constant 6 : i32
    %c7_i32_99 = arith.constant 7 : i32
    %303 = arith.subi %c7_i32_99, %c6_i32 : i32
    %c8_i32_100 = arith.constant 8 : i32
    %304 = arith.muli %c6_i32, %c8_i32_100 : i32
    %305 = tpu.assume_multiple %304, 8 : i32
    %c8_i32_101 = arith.constant 8 : i32
    %306 = arith.muli %303, %c8_i32_101 : i32
    %307 = tpu.assume_multiple %306, 8 : i32
    %308 = arith.index_cast %305 : i32 to index
    %c0_102 = arith.constant 0 : index
    %309 = vector.load %arg12[%308, %c0_102] : memref<64x256xf32, #tpu.memory_space<vmem>>, vector<8x256xf32>
    %310 = arith.index_cast %307 : i32 to index
    %c0_103 = arith.constant 0 : index
    %311 = vector.load %arg12[%310, %c0_103] : memref<64x256xf32, #tpu.memory_space<vmem>>, vector<8x256xf32>
    %312 = vector.extract_strided_slice %309 {offsets = [0, 0], sizes = [8, 128], strides = [1, 1]} : vector<8x256xf32> to vector<8x128xf32>
    %c0_104 = arith.constant 0 : index
    %c0_105 = arith.constant 0 : index
    %313 = vector.load %arg5[%c0_104, %c0_105] : memref<32x128xf32, #tpu.memory_space<vmem>>, vector<32x128xf32>
    %cst_106 = arith.constant dense<0.000000e+00> : vector<8x128xf32>
    %314 = tpu.matmul %287, %313, %cst_106 {dimension_numbers = #tpu.dot_dimension_numbers<[1], [0], [0], [1], [0, 0, 1, 1], [], []>} : vector<8x32xf32>, vector<32x128xf32>, vector<8x128xf32> -> vector<8x128xf32>
    %315 = arith.addf %312, %314 : vector<8x128xf32>
    %316 = vector.extract_strided_slice %311 {offsets = [0, 128], sizes = [8, 128], strides = [1, 1]} : vector<8x256xf32> to vector<8x128xf32>
    %c0_107 = arith.constant 0 : index
    %c0_108 = arith.constant 0 : index
    %317 = vector.load %arg6[%c0_107, %c0_108] : memref<32x128xf32, #tpu.memory_space<vmem>>, vector<32x128xf32>
    %cst_109 = arith.constant dense<0.000000e+00> : vector<8x128xf32>
    %318 = tpu.matmul %302, %317, %cst_109 {dimension_numbers = #tpu.dot_dimension_numbers<[1], [0], [0], [1], [0, 0, 1, 1], [], []>} : vector<8x32xf32>, vector<32x128xf32>, vector<8x128xf32> -> vector<8x128xf32>
    %319 = arith.addf %316, %318 : vector<8x128xf32>
    %320 = arith.negf %315 : vector<8x128xf32>
    %321 = math.exp %320 : vector<8x128xf32>
    %cst_110 = arith.constant 1.000000e+00 : f32
    %322 = vector.broadcast %cst_110 : f32 to vector<8x128xf32>
    %323 = arith.addf %322, %321 : vector<8x128xf32>
    %324 = arith.divf %322, %323 : vector<8x128xf32>
    %325 = math.tanh %315 : vector<8x128xf32>
    %326 = vector.extract_strided_slice %324 {offsets = [0, 0], sizes = [8, 32], strides = [1, 1]} : vector<8x128xf32> to vector<8x32xf32>
    %327 = vector.extract_strided_slice %324 {offsets = [0, 32], sizes = [8, 32], strides = [1, 1]} : vector<8x128xf32> to vector<8x32xf32>
    %328 = vector.extract_strided_slice %325 {offsets = [0, 64], sizes = [8, 32], strides = [1, 1]} : vector<8x128xf32> to vector<8x32xf32>
    %329 = vector.extract_strided_slice %324 {offsets = [0, 96], sizes = [8, 32], strides = [1, 1]} : vector<8x128xf32> to vector<8x32xf32>
    %330 = arith.mulf %327, %285 : vector<8x32xf32>
    %331 = arith.mulf %326, %328 : vector<8x32xf32>
    %332 = arith.addf %330, %331 : vector<8x32xf32>
    %333 = math.tanh %332 : vector<8x32xf32>
    %334 = arith.mulf %329, %333 : vector<8x32xf32>
    %335 = arith.negf %319 : vector<8x128xf32>
    %336 = math.exp %335 : vector<8x128xf32>
    %cst_111 = arith.constant 1.000000e+00 : f32
    %337 = vector.broadcast %cst_111 : f32 to vector<8x128xf32>
    %338 = arith.addf %337, %336 : vector<8x128xf32>
    %339 = arith.divf %337, %338 : vector<8x128xf32>
    %340 = math.tanh %319 : vector<8x128xf32>
    %341 = vector.extract_strided_slice %339 {offsets = [0, 0], sizes = [8, 32], strides = [1, 1]} : vector<8x128xf32> to vector<8x32xf32>
    %342 = vector.extract_strided_slice %339 {offsets = [0, 32], sizes = [8, 32], strides = [1, 1]} : vector<8x128xf32> to vector<8x32xf32>
    %343 = vector.extract_strided_slice %340 {offsets = [0, 64], sizes = [8, 32], strides = [1, 1]} : vector<8x128xf32> to vector<8x32xf32>
    %344 = vector.extract_strided_slice %339 {offsets = [0, 96], sizes = [8, 32], strides = [1, 1]} : vector<8x128xf32> to vector<8x32xf32>
    %345 = arith.mulf %342, %300 : vector<8x32xf32>
    %346 = arith.mulf %341, %343 : vector<8x32xf32>
    %347 = arith.addf %345, %346 : vector<8x32xf32>
    %348 = math.tanh %347 : vector<8x32xf32>
    %349 = arith.mulf %344, %348 : vector<8x32xf32>
    %c7_i32_112 = arith.constant 7 : i32
    %c7_i32_113 = arith.constant 7 : i32
    %350 = arith.subi %c7_i32_113, %c7_i32_112 : i32
    %c8_i32_114 = arith.constant 8 : i32
    %351 = arith.muli %c7_i32_112, %c8_i32_114 : i32
    %352 = tpu.assume_multiple %351, 8 : i32
    %c8_i32_115 = arith.constant 8 : i32
    %353 = arith.muli %350, %c8_i32_115 : i32
    %354 = tpu.assume_multiple %353, 8 : i32
    %355 = arith.index_cast %352 : i32 to index
    %c0_116 = arith.constant 0 : index
    %356 = vector.load %arg12[%355, %c0_116] : memref<64x256xf32, #tpu.memory_space<vmem>>, vector<8x256xf32>
    %357 = arith.index_cast %354 : i32 to index
    %c0_117 = arith.constant 0 : index
    %358 = vector.load %arg12[%357, %c0_117] : memref<64x256xf32, #tpu.memory_space<vmem>>, vector<8x256xf32>
    %359 = vector.extract_strided_slice %356 {offsets = [0, 0], sizes = [8, 128], strides = [1, 1]} : vector<8x256xf32> to vector<8x128xf32>
    %c0_118 = arith.constant 0 : index
    %c0_119 = arith.constant 0 : index
    %360 = vector.load %arg5[%c0_118, %c0_119] : memref<32x128xf32, #tpu.memory_space<vmem>>, vector<32x128xf32>
    %cst_120 = arith.constant dense<0.000000e+00> : vector<8x128xf32>
    %361 = tpu.matmul %334, %360, %cst_120 {dimension_numbers = #tpu.dot_dimension_numbers<[1], [0], [0], [1], [0, 0, 1, 1], [], []>} : vector<8x32xf32>, vector<32x128xf32>, vector<8x128xf32> -> vector<8x128xf32>
    %362 = arith.addf %359, %361 : vector<8x128xf32>
    %363 = vector.extract_strided_slice %358 {offsets = [0, 128], sizes = [8, 128], strides = [1, 1]} : vector<8x256xf32> to vector<8x128xf32>
    %c0_121 = arith.constant 0 : index
    %c0_122 = arith.constant 0 : index
    %364 = vector.load %arg6[%c0_121, %c0_122] : memref<32x128xf32, #tpu.memory_space<vmem>>, vector<32x128xf32>
    %cst_123 = arith.constant dense<0.000000e+00> : vector<8x128xf32>
    %365 = tpu.matmul %349, %364, %cst_123 {dimension_numbers = #tpu.dot_dimension_numbers<[1], [0], [0], [1], [0, 0, 1, 1], [], []>} : vector<8x32xf32>, vector<32x128xf32>, vector<8x128xf32> -> vector<8x128xf32>
    %366 = arith.addf %363, %365 : vector<8x128xf32>
    %367 = arith.negf %362 : vector<8x128xf32>
    %368 = math.exp %367 : vector<8x128xf32>
    %cst_124 = arith.constant 1.000000e+00 : f32
    %369 = vector.broadcast %cst_124 : f32 to vector<8x128xf32>
    %370 = arith.addf %369, %368 : vector<8x128xf32>
    %371 = arith.divf %369, %370 : vector<8x128xf32>
    %372 = math.tanh %362 : vector<8x128xf32>
    %373 = vector.extract_strided_slice %371 {offsets = [0, 0], sizes = [8, 32], strides = [1, 1]} : vector<8x128xf32> to vector<8x32xf32>
    %374 = vector.extract_strided_slice %371 {offsets = [0, 32], sizes = [8, 32], strides = [1, 1]} : vector<8x128xf32> to vector<8x32xf32>
    %375 = vector.extract_strided_slice %372 {offsets = [0, 64], sizes = [8, 32], strides = [1, 1]} : vector<8x128xf32> to vector<8x32xf32>
    %376 = vector.extract_strided_slice %371 {offsets = [0, 96], sizes = [8, 32], strides = [1, 1]} : vector<8x128xf32> to vector<8x32xf32>
    %377 = arith.mulf %374, %332 : vector<8x32xf32>
    %378 = arith.mulf %373, %375 : vector<8x32xf32>
    %379 = arith.addf %377, %378 : vector<8x32xf32>
    %380 = math.tanh %379 : vector<8x32xf32>
    %381 = arith.mulf %376, %380 : vector<8x32xf32>
    %382 = arith.negf %366 : vector<8x128xf32>
    %383 = math.exp %382 : vector<8x128xf32>
    %cst_125 = arith.constant 1.000000e+00 : f32
    %384 = vector.broadcast %cst_125 : f32 to vector<8x128xf32>
    %385 = arith.addf %384, %383 : vector<8x128xf32>
    %386 = arith.divf %384, %385 : vector<8x128xf32>
    %387 = math.tanh %366 : vector<8x128xf32>
    %388 = vector.extract_strided_slice %386 {offsets = [0, 0], sizes = [8, 32], strides = [1, 1]} : vector<8x128xf32> to vector<8x32xf32>
    %389 = vector.extract_strided_slice %386 {offsets = [0, 32], sizes = [8, 32], strides = [1, 1]} : vector<8x128xf32> to vector<8x32xf32>
    %390 = vector.extract_strided_slice %387 {offsets = [0, 64], sizes = [8, 32], strides = [1, 1]} : vector<8x128xf32> to vector<8x32xf32>
    %391 = vector.extract_strided_slice %386 {offsets = [0, 96], sizes = [8, 32], strides = [1, 1]} : vector<8x128xf32> to vector<8x32xf32>
    %392 = arith.mulf %389, %347 : vector<8x32xf32>
    %393 = arith.mulf %388, %390 : vector<8x32xf32>
    %394 = arith.addf %392, %393 : vector<8x32xf32>
    %395 = math.tanh %394 : vector<8x32xf32>
    %396 = arith.mulf %391, %395 : vector<8x32xf32>
    %c8_i32_126 = arith.constant 8 : i32
    %c0_127 = arith.constant 0 : index
    %c0_128 = arith.constant 0 : index
    %397 = vector.load %arg9[%c0_127, %c0_128] : memref<64x128xf32, #tpu.memory_space<vmem>>, vector<64x128xf32>
    %398 = vector.extract_strided_slice %397 {offsets = [0, 0], sizes = [32, 128], strides = [1, 1]} : vector<64x128xf32> to vector<32x128xf32>
    %cst_129 = arith.constant dense<0.000000e+00> : vector<8x128xf32>
    %399 = tpu.matmul %381, %398, %cst_129 {dimension_numbers = #tpu.dot_dimension_numbers<[1], [0], [0], [1], [0, 0, 1, 1], [], []>} : vector<8x32xf32>, vector<32x128xf32>, vector<8x128xf32> -> vector<8x128xf32>
    %400 = vector.extract_strided_slice %397 {offsets = [32, 0], sizes = [32, 128], strides = [1, 1]} : vector<64x128xf32> to vector<32x128xf32>
    %cst_130 = arith.constant dense<0.000000e+00> : vector<8x128xf32>
    %401 = tpu.matmul %396, %400, %cst_130 {dimension_numbers = #tpu.dot_dimension_numbers<[1], [0], [0], [1], [0, 0, 1, 1], [], []>} : vector<8x32xf32>, vector<32x128xf32>, vector<8x128xf32> -> vector<8x128xf32>
    %402 = arith.addf %399, %401 : vector<8x128xf32>
    %c0_131 = arith.constant 0 : index
    %c0_132 = arith.constant 0 : index
    %403 = vector.load %arg10[%c0_131, %c0_132] : memref<1x128xf32, #tpu.memory_space<vmem>>, vector<1x128xf32>
    %404 = vector.broadcast %403 : vector<1x128xf32> to vector<8x128xf32>
    %405 = arith.addf %402, %404 : vector<8x128xf32>
    %c0_133 = arith.constant 0 : index
    %c0_134 = arith.constant 0 : index
    %406 = vector.load %arg11[%c0_133, %c0_134] : memref<8x128xf32, #tpu.memory_space<vmem>>, vector<8x128xf32>
    tpu.vector_store %arg11[%c0_133, %c0_134], %405 {strides = array<i32>} : memref<8x128xf32, #tpu.memory_space<vmem>>, vector<8x128xf32>,
    return
  }
}

module attributes {stable_mosaic.version = 11 : i64} {
  func.func @_bilstm_layer_kernel(%arg0: memref<64x768xf32, #tpu.memory_space<vmem>>, %arg1: memref<768x256xbf16, #tpu.memory_space<vmem>>, %arg2: memref<1x256xf32, #tpu.memory_space<vmem>>, %arg3: memref<32x128xf32, #tpu.memory_space<vmem>>, %arg4: memref<32x128xf32, #tpu.memory_space<vmem>>, %arg5: memref<2x8x32xf32, #tpu.memory_space<vmem>>, %arg6: memref<2x8x32xf32, #tpu.memory_space<vmem>>, %arg7: memref<64x32xf32, #tpu.memory_space<vmem>>, %arg8: memref<64x32xf32, #tpu.memory_space<vmem>>, %arg9: memref<64x256xf32, #tpu.memory_space<vmem>>) attributes {dimension_semantics = [], scalar_prefetch = 0 : i64, scratch_operands = 1 : i64, tpu.core_type = #tpu.core_type<tc>} {
    %c0 = arith.constant 0 : index
    %c0_0 = arith.constant 0 : index
    %0 = vector.load %arg0[%c0, %c0_0] : memref<64x768xf32, #tpu.memory_space<vmem>>, vector<64x768xf32>
    %1 = arith.truncf %0 : vector<64x768xf32> to vector<64x768xbf16>
    %c0_1 = arith.constant 0 : index
    %c0_2 = arith.constant 0 : index
    %2 = vector.load %arg1[%c0_1, %c0_2] : memref<768x256xbf16, #tpu.memory_space<vmem>>, vector<768x256xbf16>
    %cst = arith.constant dense<0.000000e+00> : vector<64x256xf32>
    %3 = tpu.matmul %1, %2, %cst {dimension_numbers = #tpu.dot_dimension_numbers<[1], [0], [0], [1], [0, 0, 1, 1], [], []>} : vector<64x768xbf16>, vector<768x256xbf16>, vector<64x256xf32> -> vector<64x256xf32>
    %c0_3 = arith.constant 0 : index
    %c0_4 = arith.constant 0 : index
    %4 = vector.load %arg2[%c0_3, %c0_4] : memref<1x256xf32, #tpu.memory_space<vmem>>, vector<1x256xf32>
    %5 = vector.broadcast %4 : vector<1x256xf32> to vector<64x256xf32>
    %6 = arith.addf %3, %5 : vector<64x256xf32>
    %c0_5 = arith.constant 0 : index
    %c0_6 = arith.constant 0 : index
    %7 = vector.load %arg9[%c0_5, %c0_6] : memref<64x256xf32, #tpu.memory_space<vmem>>, vector<64x256xf32>
    tpu.vector_store %arg9[%c0_5, %c0_6], %6 {strides = array<i32>} : memref<64x256xf32, #tpu.memory_space<vmem>>, vector<64x256xf32>,
    %c0_7 = arith.constant 0 : index
    %c0_8 = arith.constant 0 : index
    %c0_9 = arith.constant 0 : index
    %8 = vector.load %arg5[%c0_7, %c0_8, %c0_9] : memref<2x8x32xf32, #tpu.memory_space<vmem>>, vector<1x8x32xf32>
    %9 = vector.shape_cast %8 : vector<1x8x32xf32> to vector<8x32xf32>
    %c0_10 = arith.constant 0 : index
    %c0_11 = arith.constant 0 : index
    %c0_12 = arith.constant 0 : index
    %10 = vector.load %arg6[%c0_10, %c0_11, %c0_12] : memref<2x8x32xf32, #tpu.memory_space<vmem>>, vector<1x8x32xf32>
    %11 = vector.shape_cast %10 : vector<1x8x32xf32> to vector<8x32xf32>
    %c1 = arith.constant 1 : index
    %c0_13 = arith.constant 0 : index
    %c0_14 = arith.constant 0 : index
    %12 = vector.load %arg5[%c1, %c0_13, %c0_14] : memref<2x8x32xf32, #tpu.memory_space<vmem>>, vector<1x8x32xf32>
    %13 = vector.shape_cast %12 : vector<1x8x32xf32> to vector<8x32xf32>
    %c1_15 = arith.constant 1 : index
    %c0_16 = arith.constant 0 : index
    %c0_17 = arith.constant 0 : index
    %14 = vector.load %arg6[%c1_15, %c0_16, %c0_17] : memref<2x8x32xf32, #tpu.memory_space<vmem>>, vector<1x8x32xf32>
    %15 = vector.shape_cast %14 : vector<1x8x32xf32> to vector<8x32xf32>
    %c0_i32 = arith.constant 0 : i32
    %c7_i32 = arith.constant 7 : i32
    %16 = arith.subi %c7_i32, %c0_i32 : i32
    %c8_i32 = arith.constant 8 : i32
    %17 = arith.muli %c0_i32, %c8_i32 : i32
    %18 = tpu.assume_multiple %17, 8 : i32
    %c8_i32_18 = arith.constant 8 : i32
    %19 = arith.muli %16, %c8_i32_18 : i32
    %20 = tpu.assume_multiple %19, 8 : i32
    %21 = arith.index_cast %18 : i32 to index
    %c0_19 = arith.constant 0 : index
    %22 = vector.load %arg9[%21, %c0_19] : memref<64x256xf32, #tpu.memory_space<vmem>>, vector<8x256xf32>
    %23 = arith.index_cast %20 : i32 to index
    %c0_20 = arith.constant 0 : index
    %24 = vector.load %arg9[%23, %c0_20] : memref<64x256xf32, #tpu.memory_space<vmem>>, vector<8x256xf32>
    %25 = vector.extract_strided_slice %22 {offsets = [0, 0], sizes = [8, 128], strides = [1, 1]} : vector<8x256xf32> to vector<8x128xf32>
    %c0_21 = arith.constant 0 : index
    %c0_22 = arith.constant 0 : index
    %26 = vector.load %arg3[%c0_21, %c0_22] : memref<32x128xf32, #tpu.memory_space<vmem>>, vector<32x128xf32>
    %cst_23 = arith.constant dense<0.000000e+00> : vector<8x128xf32>
    %27 = tpu.matmul %9, %26, %cst_23 {dimension_numbers = #tpu.dot_dimension_numbers<[1], [0], [0], [1], [0, 0, 1, 1], [], []>} : vector<8x32xf32>, vector<32x128xf32>, vector<8x128xf32> -> vector<8x128xf32>
    %28 = arith.addf %25, %27 : vector<8x128xf32>
    %29 = vector.extract_strided_slice %24 {offsets = [0, 128], sizes = [8, 128], strides = [1, 1]} : vector<8x256xf32> to vector<8x128xf32>
    %c0_24 = arith.constant 0 : index
    %c0_25 = arith.constant 0 : index
    %30 = vector.load %arg4[%c0_24, %c0_25] : memref<32x128xf32, #tpu.memory_space<vmem>>, vector<32x128xf32>
    %cst_26 = arith.constant dense<0.000000e+00> : vector<8x128xf32>
    %31 = tpu.matmul %13, %30, %cst_26 {dimension_numbers = #tpu.dot_dimension_numbers<[1], [0], [0], [1], [0, 0, 1, 1], [], []>} : vector<8x32xf32>, vector<32x128xf32>, vector<8x128xf32> -> vector<8x128xf32>
    %32 = arith.addf %29, %31 : vector<8x128xf32>
    %33 = arith.negf %28 : vector<8x128xf32>
    %34 = math.exp %33 : vector<8x128xf32>
    %cst_27 = arith.constant 1.000000e+00 : f32
    %35 = vector.broadcast %cst_27 : f32 to vector<8x128xf32>
    %36 = arith.addf %35, %34 : vector<8x128xf32>
    %37 = arith.divf %35, %36 : vector<8x128xf32>
    %38 = math.tanh %28 : vector<8x128xf32>
    %39 = vector.extract_strided_slice %37 {offsets = [0, 0], sizes = [8, 32], strides = [1, 1]} : vector<8x128xf32> to vector<8x32xf32>
    %40 = vector.extract_strided_slice %37 {offsets = [0, 32], sizes = [8, 32], strides = [1, 1]} : vector<8x128xf32> to vector<8x32xf32>
    %41 = vector.extract_strided_slice %38 {offsets = [0, 64], sizes = [8, 32], strides = [1, 1]} : vector<8x128xf32> to vector<8x32xf32>
    %42 = vector.extract_strided_slice %37 {offsets = [0, 96], sizes = [8, 32], strides = [1, 1]} : vector<8x128xf32> to vector<8x32xf32>
    %43 = arith.mulf %40, %11 : vector<8x32xf32>
    %44 = arith.mulf %39, %41 : vector<8x32xf32>
    %45 = arith.addf %43, %44 : vector<8x32xf32>
    %46 = math.tanh %45 : vector<8x32xf32>
    %47 = arith.mulf %42, %46 : vector<8x32xf32>
    %48 = arith.negf %32 : vector<8x128xf32>
    %49 = math.exp %48 : vector<8x128xf32>
    %cst_28 = arith.constant 1.000000e+00 : f32
    %50 = vector.broadcast %cst_28 : f32 to vector<8x128xf32>
    %51 = arith.addf %50, %49 : vector<8x128xf32>
    %52 = arith.divf %50, %51 : vector<8x128xf32>
    %53 = math.tanh %32 : vector<8x128xf32>
    %54 = vector.extract_strided_slice %52 {offsets = [0, 0], sizes = [8, 32], strides = [1, 1]} : vector<8x128xf32> to vector<8x32xf32>
    %55 = vector.extract_strided_slice %52 {offsets = [0, 32], sizes = [8, 32], strides = [1, 1]} : vector<8x128xf32> to vector<8x32xf32>
    %56 = vector.extract_strided_slice %53 {offsets = [0, 64], sizes = [8, 32], strides = [1, 1]} : vector<8x128xf32> to vector<8x32xf32>
    %57 = vector.extract_strided_slice %52 {offsets = [0, 96], sizes = [8, 32], strides = [1, 1]} : vector<8x128xf32> to vector<8x32xf32>
    %58 = arith.mulf %55, %15 : vector<8x32xf32>
    %59 = arith.mulf %54, %56 : vector<8x32xf32>
    %60 = arith.addf %58, %59 : vector<8x32xf32>
    %61 = math.tanh %60 : vector<8x32xf32>
    %62 = arith.mulf %57, %61 : vector<8x32xf32>
    %63 = arith.index_cast %18 : i32 to index
    %c0_29 = arith.constant 0 : index
    %64 = vector.load %arg7[%63, %c0_29] : memref<64x32xf32, #tpu.memory_space<vmem>>, vector<8x32xf32>
    tpu.vector_store %arg7[%63, %c0_29], %47 {strides = array<i32>} : memref<64x32xf32, #tpu.memory_space<vmem>>, vector<8x32xf32>,
    %65 = arith.index_cast %20 : i32 to index
    %c0_30 = arith.constant 0 : index
    %66 = vector.load %arg8[%65, %c0_30] : memref<64x32xf32, #tpu.memory_space<vmem>>, vector<8x32xf32>
    tpu.vector_store %arg8[%65, %c0_30], %62 {strides = array<i32>} : memref<64x32xf32, #tpu.memory_space<vmem>>, vector<8x32xf32>,
    %c1_i32 = arith.constant 1 : i32
    %c7_i32_31 = arith.constant 7 : i32
    %67 = arith.subi %c7_i32_31, %c1_i32 : i32
    %c8_i32_32 = arith.constant 8 : i32
    %68 = arith.muli %c1_i32, %c8_i32_32 : i32
    %69 = tpu.assume_multiple %68, 8 : i32
    %c8_i32_33 = arith.constant 8 : i32
    %70 = arith.muli %67, %c8_i32_33 : i32
    %71 = tpu.assume_multiple %70, 8 : i32
    %72 = arith.index_cast %69 : i32 to index
    %c0_34 = arith.constant 0 : index
    %73 = vector.load %arg9[%72, %c0_34] : memref<64x256xf32, #tpu.memory_space<vmem>>, vector<8x256xf32>
    %74 = arith.index_cast %71 : i32 to index
    %c0_35 = arith.constant 0 : index
    %75 = vector.load %arg9[%74, %c0_35] : memref<64x256xf32, #tpu.memory_space<vmem>>, vector<8x256xf32>
    %76 = vector.extract_strided_slice %73 {offsets = [0, 0], sizes = [8, 128], strides = [1, 1]} : vector<8x256xf32> to vector<8x128xf32>
    %c0_36 = arith.constant 0 : index
    %c0_37 = arith.constant 0 : index
    %77 = vector.load %arg3[%c0_36, %c0_37] : memref<32x128xf32, #tpu.memory_space<vmem>>, vector<32x128xf32>
    %cst_38 = arith.constant dense<0.000000e+00> : vector<8x128xf32>
    %78 = tpu.matmul %47, %77, %cst_38 {dimension_numbers = #tpu.dot_dimension_numbers<[1], [0], [0], [1], [0, 0, 1, 1], [], []>} : vector<8x32xf32>, vector<32x128xf32>, vector<8x128xf32> -> vector<8x128xf32>
    %79 = arith.addf %76, %78 : vector<8x128xf32>
    %80 = vector.extract_strided_slice %75 {offsets = [0, 128], sizes = [8, 128], strides = [1, 1]} : vector<8x256xf32> to vector<8x128xf32>
    %c0_39 = arith.constant 0 : index
    %c0_40 = arith.constant 0 : index
    %81 = vector.load %arg4[%c0_39, %c0_40] : memref<32x128xf32, #tpu.memory_space<vmem>>, vector<32x128xf32>
    %cst_41 = arith.constant dense<0.000000e+00> : vector<8x128xf32>
    %82 = tpu.matmul %62, %81, %cst_41 {dimension_numbers = #tpu.dot_dimension_numbers<[1], [0], [0], [1], [0, 0, 1, 1], [], []>} : vector<8x32xf32>, vector<32x128xf32>, vector<8x128xf32> -> vector<8x128xf32>
    %83 = arith.addf %80, %82 : vector<8x128xf32>
    %84 = arith.negf %79 : vector<8x128xf32>
    %85 = math.exp %84 : vector<8x128xf32>
    %cst_42 = arith.constant 1.000000e+00 : f32
    %86 = vector.broadcast %cst_42 : f32 to vector<8x128xf32>
    %87 = arith.addf %86, %85 : vector<8x128xf32>
    %88 = arith.divf %86, %87 : vector<8x128xf32>
    %89 = math.tanh %79 : vector<8x128xf32>
    %90 = vector.extract_strided_slice %88 {offsets = [0, 0], sizes = [8, 32], strides = [1, 1]} : vector<8x128xf32> to vector<8x32xf32>
    %91 = vector.extract_strided_slice %88 {offsets = [0, 32], sizes = [8, 32], strides = [1, 1]} : vector<8x128xf32> to vector<8x32xf32>
    %92 = vector.extract_strided_slice %89 {offsets = [0, 64], sizes = [8, 32], strides = [1, 1]} : vector<8x128xf32> to vector<8x32xf32>
    %93 = vector.extract_strided_slice %88 {offsets = [0, 96], sizes = [8, 32], strides = [1, 1]} : vector<8x128xf32> to vector<8x32xf32>
    %94 = arith.mulf %91, %45 : vector<8x32xf32>
    %95 = arith.mulf %90, %92 : vector<8x32xf32>
    %96 = arith.addf %94, %95 : vector<8x32xf32>
    %97 = math.tanh %96 : vector<8x32xf32>
    %98 = arith.mulf %93, %97 : vector<8x32xf32>
    %99 = arith.negf %83 : vector<8x128xf32>
    %100 = math.exp %99 : vector<8x128xf32>
    %cst_43 = arith.constant 1.000000e+00 : f32
    %101 = vector.broadcast %cst_43 : f32 to vector<8x128xf32>
    %102 = arith.addf %101, %100 : vector<8x128xf32>
    %103 = arith.divf %101, %102 : vector<8x128xf32>
    %104 = math.tanh %83 : vector<8x128xf32>
    %105 = vector.extract_strided_slice %103 {offsets = [0, 0], sizes = [8, 32], strides = [1, 1]} : vector<8x128xf32> to vector<8x32xf32>
    %106 = vector.extract_strided_slice %103 {offsets = [0, 32], sizes = [8, 32], strides = [1, 1]} : vector<8x128xf32> to vector<8x32xf32>
    %107 = vector.extract_strided_slice %104 {offsets = [0, 64], sizes = [8, 32], strides = [1, 1]} : vector<8x128xf32> to vector<8x32xf32>
    %108 = vector.extract_strided_slice %103 {offsets = [0, 96], sizes = [8, 32], strides = [1, 1]} : vector<8x128xf32> to vector<8x32xf32>
    %109 = arith.mulf %106, %60 : vector<8x32xf32>
    %110 = arith.mulf %105, %107 : vector<8x32xf32>
    %111 = arith.addf %109, %110 : vector<8x32xf32>
    %112 = math.tanh %111 : vector<8x32xf32>
    %113 = arith.mulf %108, %112 : vector<8x32xf32>
    %114 = arith.index_cast %69 : i32 to index
    %c0_44 = arith.constant 0 : index
    %115 = vector.load %arg7[%114, %c0_44] : memref<64x32xf32, #tpu.memory_space<vmem>>, vector<8x32xf32>
    tpu.vector_store %arg7[%114, %c0_44], %98 {strides = array<i32>} : memref<64x32xf32, #tpu.memory_space<vmem>>, vector<8x32xf32>,
    %116 = arith.index_cast %71 : i32 to index
    %c0_45 = arith.constant 0 : index
    %117 = vector.load %arg8[%116, %c0_45] : memref<64x32xf32, #tpu.memory_space<vmem>>, vector<8x32xf32>
    tpu.vector_store %arg8[%116, %c0_45], %113 {strides = array<i32>} : memref<64x32xf32, #tpu.memory_space<vmem>>, vector<8x32xf32>,
    %c2_i32 = arith.constant 2 : i32
    %c7_i32_46 = arith.constant 7 : i32
    %118 = arith.subi %c7_i32_46, %c2_i32 : i32
    %c8_i32_47 = arith.constant 8 : i32
    %119 = arith.muli %c2_i32, %c8_i32_47 : i32
    %120 = tpu.assume_multiple %119, 8 : i32
    %c8_i32_48 = arith.constant 8 : i32
    %121 = arith.muli %118, %c8_i32_48 : i32
    %122 = tpu.assume_multiple %121, 8 : i32
    %123 = arith.index_cast %120 : i32 to index
    %c0_49 = arith.constant 0 : index
    %124 = vector.load %arg9[%123, %c0_49] : memref<64x256xf32, #tpu.memory_space<vmem>>, vector<8x256xf32>
    %125 = arith.index_cast %122 : i32 to index
    %c0_50 = arith.constant 0 : index
    %126 = vector.load %arg9[%125, %c0_50] : memref<64x256xf32, #tpu.memory_space<vmem>>, vector<8x256xf32>
    %127 = vector.extract_strided_slice %124 {offsets = [0, 0], sizes = [8, 128], strides = [1, 1]} : vector<8x256xf32> to vector<8x128xf32>
    %c0_51 = arith.constant 0 : index
    %c0_52 = arith.constant 0 : index
    %128 = vector.load %arg3[%c0_51, %c0_52] : memref<32x128xf32, #tpu.memory_space<vmem>>, vector<32x128xf32>
    %cst_53 = arith.constant dense<0.000000e+00> : vector<8x128xf32>
    %129 = tpu.matmul %98, %128, %cst_53 {dimension_numbers = #tpu.dot_dimension_numbers<[1], [0], [0], [1], [0, 0, 1, 1], [], []>} : vector<8x32xf32>, vector<32x128xf32>, vector<8x128xf32> -> vector<8x128xf32>
    %130 = arith.addf %127, %129 : vector<8x128xf32>
    %131 = vector.extract_strided_slice %126 {offsets = [0, 128], sizes = [8, 128], strides = [1, 1]} : vector<8x256xf32> to vector<8x128xf32>
    %c0_54 = arith.constant 0 : index
    %c0_55 = arith.constant 0 : index
    %132 = vector.load %arg4[%c0_54, %c0_55] : memref<32x128xf32, #tpu.memory_space<vmem>>, vector<32x128xf32>
    %cst_56 = arith.constant dense<0.000000e+00> : vector<8x128xf32>
    %133 = tpu.matmul %113, %132, %cst_56 {dimension_numbers = #tpu.dot_dimension_numbers<[1], [0], [0], [1], [0, 0, 1, 1], [], []>} : vector<8x32xf32>, vector<32x128xf32>, vector<8x128xf32> -> vector<8x128xf32>
    %134 = arith.addf %131, %133 : vector<8x128xf32>
    %135 = arith.negf %130 : vector<8x128xf32>
    %136 = math.exp %135 : vector<8x128xf32>
    %cst_57 = arith.constant 1.000000e+00 : f32
    %137 = vector.broadcast %cst_57 : f32 to vector<8x128xf32>
    %138 = arith.addf %137, %136 : vector<8x128xf32>
    %139 = arith.divf %137, %138 : vector<8x128xf32>
    %140 = math.tanh %130 : vector<8x128xf32>
    %141 = vector.extract_strided_slice %139 {offsets = [0, 0], sizes = [8, 32], strides = [1, 1]} : vector<8x128xf32> to vector<8x32xf32>
    %142 = vector.extract_strided_slice %139 {offsets = [0, 32], sizes = [8, 32], strides = [1, 1]} : vector<8x128xf32> to vector<8x32xf32>
    %143 = vector.extract_strided_slice %140 {offsets = [0, 64], sizes = [8, 32], strides = [1, 1]} : vector<8x128xf32> to vector<8x32xf32>
    %144 = vector.extract_strided_slice %139 {offsets = [0, 96], sizes = [8, 32], strides = [1, 1]} : vector<8x128xf32> to vector<8x32xf32>
    %145 = arith.mulf %142, %96 : vector<8x32xf32>
    %146 = arith.mulf %141, %143 : vector<8x32xf32>
    %147 = arith.addf %145, %146 : vector<8x32xf32>
    %148 = math.tanh %147 : vector<8x32xf32>
    %149 = arith.mulf %144, %148 : vector<8x32xf32>
    %150 = arith.negf %134 : vector<8x128xf32>
    %151 = math.exp %150 : vector<8x128xf32>
    %cst_58 = arith.constant 1.000000e+00 : f32
    %152 = vector.broadcast %cst_58 : f32 to vector<8x128xf32>
    %153 = arith.addf %152, %151 : vector<8x128xf32>
    %154 = arith.divf %152, %153 : vector<8x128xf32>
    %155 = math.tanh %134 : vector<8x128xf32>
    %156 = vector.extract_strided_slice %154 {offsets = [0, 0], sizes = [8, 32], strides = [1, 1]} : vector<8x128xf32> to vector<8x32xf32>
    %157 = vector.extract_strided_slice %154 {offsets = [0, 32], sizes = [8, 32], strides = [1, 1]} : vector<8x128xf32> to vector<8x32xf32>
    %158 = vector.extract_strided_slice %155 {offsets = [0, 64], sizes = [8, 32], strides = [1, 1]} : vector<8x128xf32> to vector<8x32xf32>
    %159 = vector.extract_strided_slice %154 {offsets = [0, 96], sizes = [8, 32], strides = [1, 1]} : vector<8x128xf32> to vector<8x32xf32>
    %160 = arith.mulf %157, %111 : vector<8x32xf32>
    %161 = arith.mulf %156, %158 : vector<8x32xf32>
    %162 = arith.addf %160, %161 : vector<8x32xf32>
    %163 = math.tanh %162 : vector<8x32xf32>
    %164 = arith.mulf %159, %163 : vector<8x32xf32>
    %165 = arith.index_cast %120 : i32 to index
    %c0_59 = arith.constant 0 : index
    %166 = vector.load %arg7[%165, %c0_59] : memref<64x32xf32, #tpu.memory_space<vmem>>, vector<8x32xf32>
    tpu.vector_store %arg7[%165, %c0_59], %149 {strides = array<i32>} : memref<64x32xf32, #tpu.memory_space<vmem>>, vector<8x32xf32>,
    %167 = arith.index_cast %122 : i32 to index
    %c0_60 = arith.constant 0 : index
    %168 = vector.load %arg8[%167, %c0_60] : memref<64x32xf32, #tpu.memory_space<vmem>>, vector<8x32xf32>
    tpu.vector_store %arg8[%167, %c0_60], %164 {strides = array<i32>} : memref<64x32xf32, #tpu.memory_space<vmem>>, vector<8x32xf32>,
    %c3_i32 = arith.constant 3 : i32
    %c7_i32_61 = arith.constant 7 : i32
    %169 = arith.subi %c7_i32_61, %c3_i32 : i32
    %c8_i32_62 = arith.constant 8 : i32
    %170 = arith.muli %c3_i32, %c8_i32_62 : i32
    %171 = tpu.assume_multiple %170, 8 : i32
    %c8_i32_63 = arith.constant 8 : i32
    %172 = arith.muli %169, %c8_i32_63 : i32
    %173 = tpu.assume_multiple %172, 8 : i32
    %174 = arith.index_cast %171 : i32 to index
    %c0_64 = arith.constant 0 : index
    %175 = vector.load %arg9[%174, %c0_64] : memref<64x256xf32, #tpu.memory_space<vmem>>, vector<8x256xf32>
    %176 = arith.index_cast %173 : i32 to index
    %c0_65 = arith.constant 0 : index
    %177 = vector.load %arg9[%176, %c0_65] : memref<64x256xf32, #tpu.memory_space<vmem>>, vector<8x256xf32>
    %178 = vector.extract_strided_slice %175 {offsets = [0, 0], sizes = [8, 128], strides = [1, 1]} : vector<8x256xf32> to vector<8x128xf32>
    %c0_66 = arith.constant 0 : index
    %c0_67 = arith.constant 0 : index
    %179 = vector.load %arg3[%c0_66, %c0_67] : memref<32x128xf32, #tpu.memory_space<vmem>>, vector<32x128xf32>
    %cst_68 = arith.constant dense<0.000000e+00> : vector<8x128xf32>
    %180 = tpu.matmul %149, %179, %cst_68 {dimension_numbers = #tpu.dot_dimension_numbers<[1], [0], [0], [1], [0, 0, 1, 1], [], []>} : vector<8x32xf32>, vector<32x128xf32>, vector<8x128xf32> -> vector<8x128xf32>
    %181 = arith.addf %178, %180 : vector<8x128xf32>
    %182 = vector.extract_strided_slice %177 {offsets = [0, 128], sizes = [8, 128], strides = [1, 1]} : vector<8x256xf32> to vector<8x128xf32>
    %c0_69 = arith.constant 0 : index
    %c0_70 = arith.constant 0 : index
    %183 = vector.load %arg4[%c0_69, %c0_70] : memref<32x128xf32, #tpu.memory_space<vmem>>, vector<32x128xf32>
    %cst_71 = arith.constant dense<0.000000e+00> : vector<8x128xf32>
    %184 = tpu.matmul %164, %183, %cst_71 {dimension_numbers = #tpu.dot_dimension_numbers<[1], [0], [0], [1], [0, 0, 1, 1], [], []>} : vector<8x32xf32>, vector<32x128xf32>, vector<8x128xf32> -> vector<8x128xf32>
    %185 = arith.addf %182, %184 : vector<8x128xf32>
    %186 = arith.negf %181 : vector<8x128xf32>
    %187 = math.exp %186 : vector<8x128xf32>
    %cst_72 = arith.constant 1.000000e+00 : f32
    %188 = vector.broadcast %cst_72 : f32 to vector<8x128xf32>
    %189 = arith.addf %188, %187 : vector<8x128xf32>
    %190 = arith.divf %188, %189 : vector<8x128xf32>
    %191 = math.tanh %181 : vector<8x128xf32>
    %192 = vector.extract_strided_slice %190 {offsets = [0, 0], sizes = [8, 32], strides = [1, 1]} : vector<8x128xf32> to vector<8x32xf32>
    %193 = vector.extract_strided_slice %190 {offsets = [0, 32], sizes = [8, 32], strides = [1, 1]} : vector<8x128xf32> to vector<8x32xf32>
    %194 = vector.extract_strided_slice %191 {offsets = [0, 64], sizes = [8, 32], strides = [1, 1]} : vector<8x128xf32> to vector<8x32xf32>
    %195 = vector.extract_strided_slice %190 {offsets = [0, 96], sizes = [8, 32], strides = [1, 1]} : vector<8x128xf32> to vector<8x32xf32>
    %196 = arith.mulf %193, %147 : vector<8x32xf32>
    %197 = arith.mulf %192, %194 : vector<8x32xf32>
    %198 = arith.addf %196, %197 : vector<8x32xf32>
    %199 = math.tanh %198 : vector<8x32xf32>
    %200 = arith.mulf %195, %199 : vector<8x32xf32>
    %201 = arith.negf %185 : vector<8x128xf32>
    %202 = math.exp %201 : vector<8x128xf32>
    %cst_73 = arith.constant 1.000000e+00 : f32
    %203 = vector.broadcast %cst_73 : f32 to vector<8x128xf32>
    %204 = arith.addf %203, %202 : vector<8x128xf32>
    %205 = arith.divf %203, %204 : vector<8x128xf32>
    %206 = math.tanh %185 : vector<8x128xf32>
    %207 = vector.extract_strided_slice %205 {offsets = [0, 0], sizes = [8, 32], strides = [1, 1]} : vector<8x128xf32> to vector<8x32xf32>
    %208 = vector.extract_strided_slice %205 {offsets = [0, 32], sizes = [8, 32], strides = [1, 1]} : vector<8x128xf32> to vector<8x32xf32>
    %209 = vector.extract_strided_slice %206 {offsets = [0, 64], sizes = [8, 32], strides = [1, 1]} : vector<8x128xf32> to vector<8x32xf32>
    %210 = vector.extract_strided_slice %205 {offsets = [0, 96], sizes = [8, 32], strides = [1, 1]} : vector<8x128xf32> to vector<8x32xf32>
    %211 = arith.mulf %208, %162 : vector<8x32xf32>
    %212 = arith.mulf %207, %209 : vector<8x32xf32>
    %213 = arith.addf %211, %212 : vector<8x32xf32>
    %214 = math.tanh %213 : vector<8x32xf32>
    %215 = arith.mulf %210, %214 : vector<8x32xf32>
    %216 = arith.index_cast %171 : i32 to index
    %c0_74 = arith.constant 0 : index
    %217 = vector.load %arg7[%216, %c0_74] : memref<64x32xf32, #tpu.memory_space<vmem>>, vector<8x32xf32>
    tpu.vector_store %arg7[%216, %c0_74], %200 {strides = array<i32>} : memref<64x32xf32, #tpu.memory_space<vmem>>, vector<8x32xf32>,
    %218 = arith.index_cast %173 : i32 to index
    %c0_75 = arith.constant 0 : index
    %219 = vector.load %arg8[%218, %c0_75] : memref<64x32xf32, #tpu.memory_space<vmem>>, vector<8x32xf32>
    tpu.vector_store %arg8[%218, %c0_75], %215 {strides = array<i32>} : memref<64x32xf32, #tpu.memory_space<vmem>>, vector<8x32xf32>,
    %c4_i32 = arith.constant 4 : i32
    %c7_i32_76 = arith.constant 7 : i32
    %220 = arith.subi %c7_i32_76, %c4_i32 : i32
    %c8_i32_77 = arith.constant 8 : i32
    %221 = arith.muli %c4_i32, %c8_i32_77 : i32
    %222 = tpu.assume_multiple %221, 8 : i32
    %c8_i32_78 = arith.constant 8 : i32
    %223 = arith.muli %220, %c8_i32_78 : i32
    %224 = tpu.assume_multiple %223, 8 : i32
    %225 = arith.index_cast %222 : i32 to index
    %c0_79 = arith.constant 0 : index
    %226 = vector.load %arg9[%225, %c0_79] : memref<64x256xf32, #tpu.memory_space<vmem>>, vector<8x256xf32>
    %227 = arith.index_cast %224 : i32 to index
    %c0_80 = arith.constant 0 : index
    %228 = vector.load %arg9[%227, %c0_80] : memref<64x256xf32, #tpu.memory_space<vmem>>, vector<8x256xf32>
    %229 = vector.extract_strided_slice %226 {offsets = [0, 0], sizes = [8, 128], strides = [1, 1]} : vector<8x256xf32> to vector<8x128xf32>
    %c0_81 = arith.constant 0 : index
    %c0_82 = arith.constant 0 : index
    %230 = vector.load %arg3[%c0_81, %c0_82] : memref<32x128xf32, #tpu.memory_space<vmem>>, vector<32x128xf32>
    %cst_83 = arith.constant dense<0.000000e+00> : vector<8x128xf32>
    %231 = tpu.matmul %200, %230, %cst_83 {dimension_numbers = #tpu.dot_dimension_numbers<[1], [0], [0], [1], [0, 0, 1, 1], [], []>} : vector<8x32xf32>, vector<32x128xf32>, vector<8x128xf32> -> vector<8x128xf32>
    %232 = arith.addf %229, %231 : vector<8x128xf32>
    %233 = vector.extract_strided_slice %228 {offsets = [0, 128], sizes = [8, 128], strides = [1, 1]} : vector<8x256xf32> to vector<8x128xf32>
    %c0_84 = arith.constant 0 : index
    %c0_85 = arith.constant 0 : index
    %234 = vector.load %arg4[%c0_84, %c0_85] : memref<32x128xf32, #tpu.memory_space<vmem>>, vector<32x128xf32>
    %cst_86 = arith.constant dense<0.000000e+00> : vector<8x128xf32>
    %235 = tpu.matmul %215, %234, %cst_86 {dimension_numbers = #tpu.dot_dimension_numbers<[1], [0], [0], [1], [0, 0, 1, 1], [], []>} : vector<8x32xf32>, vector<32x128xf32>, vector<8x128xf32> -> vector<8x128xf32>
    %236 = arith.addf %233, %235 : vector<8x128xf32>
    %237 = arith.negf %232 : vector<8x128xf32>
    %238 = math.exp %237 : vector<8x128xf32>
    %cst_87 = arith.constant 1.000000e+00 : f32
    %239 = vector.broadcast %cst_87 : f32 to vector<8x128xf32>
    %240 = arith.addf %239, %238 : vector<8x128xf32>
    %241 = arith.divf %239, %240 : vector<8x128xf32>
    %242 = math.tanh %232 : vector<8x128xf32>
    %243 = vector.extract_strided_slice %241 {offsets = [0, 0], sizes = [8, 32], strides = [1, 1]} : vector<8x128xf32> to vector<8x32xf32>
    %244 = vector.extract_strided_slice %241 {offsets = [0, 32], sizes = [8, 32], strides = [1, 1]} : vector<8x128xf32> to vector<8x32xf32>
    %245 = vector.extract_strided_slice %242 {offsets = [0, 64], sizes = [8, 32], strides = [1, 1]} : vector<8x128xf32> to vector<8x32xf32>
    %246 = vector.extract_strided_slice %241 {offsets = [0, 96], sizes = [8, 32], strides = [1, 1]} : vector<8x128xf32> to vector<8x32xf32>
    %247 = arith.mulf %244, %198 : vector<8x32xf32>
    %248 = arith.mulf %243, %245 : vector<8x32xf32>
    %249 = arith.addf %247, %248 : vector<8x32xf32>
    %250 = math.tanh %249 : vector<8x32xf32>
    %251 = arith.mulf %246, %250 : vector<8x32xf32>
    %252 = arith.negf %236 : vector<8x128xf32>
    %253 = math.exp %252 : vector<8x128xf32>
    %cst_88 = arith.constant 1.000000e+00 : f32
    %254 = vector.broadcast %cst_88 : f32 to vector<8x128xf32>
    %255 = arith.addf %254, %253 : vector<8x128xf32>
    %256 = arith.divf %254, %255 : vector<8x128xf32>
    %257 = math.tanh %236 : vector<8x128xf32>
    %258 = vector.extract_strided_slice %256 {offsets = [0, 0], sizes = [8, 32], strides = [1, 1]} : vector<8x128xf32> to vector<8x32xf32>
    %259 = vector.extract_strided_slice %256 {offsets = [0, 32], sizes = [8, 32], strides = [1, 1]} : vector<8x128xf32> to vector<8x32xf32>
    %260 = vector.extract_strided_slice %257 {offsets = [0, 64], sizes = [8, 32], strides = [1, 1]} : vector<8x128xf32> to vector<8x32xf32>
    %261 = vector.extract_strided_slice %256 {offsets = [0, 96], sizes = [8, 32], strides = [1, 1]} : vector<8x128xf32> to vector<8x32xf32>
    %262 = arith.mulf %259, %213 : vector<8x32xf32>
    %263 = arith.mulf %258, %260 : vector<8x32xf32>
    %264 = arith.addf %262, %263 : vector<8x32xf32>
    %265 = math.tanh %264 : vector<8x32xf32>
    %266 = arith.mulf %261, %265 : vector<8x32xf32>
    %267 = arith.index_cast %222 : i32 to index
    %c0_89 = arith.constant 0 : index
    %268 = vector.load %arg7[%267, %c0_89] : memref<64x32xf32, #tpu.memory_space<vmem>>, vector<8x32xf32>
    tpu.vector_store %arg7[%267, %c0_89], %251 {strides = array<i32>} : memref<64x32xf32, #tpu.memory_space<vmem>>, vector<8x32xf32>,
    %269 = arith.index_cast %224 : i32 to index
    %c0_90 = arith.constant 0 : index
    %270 = vector.load %arg8[%269, %c0_90] : memref<64x32xf32, #tpu.memory_space<vmem>>, vector<8x32xf32>
    tpu.vector_store %arg8[%269, %c0_90], %266 {strides = array<i32>} : memref<64x32xf32, #tpu.memory_space<vmem>>, vector<8x32xf32>,
    %c5_i32 = arith.constant 5 : i32
    %c7_i32_91 = arith.constant 7 : i32
    %271 = arith.subi %c7_i32_91, %c5_i32 : i32
    %c8_i32_92 = arith.constant 8 : i32
    %272 = arith.muli %c5_i32, %c8_i32_92 : i32
    %273 = tpu.assume_multiple %272, 8 : i32
    %c8_i32_93 = arith.constant 8 : i32
    %274 = arith.muli %271, %c8_i32_93 : i32
    %275 = tpu.assume_multiple %274, 8 : i32
    %276 = arith.index_cast %273 : i32 to index
    %c0_94 = arith.constant 0 : index
    %277 = vector.load %arg9[%276, %c0_94] : memref<64x256xf32, #tpu.memory_space<vmem>>, vector<8x256xf32>
    %278 = arith.index_cast %275 : i32 to index
    %c0_95 = arith.constant 0 : index
    %279 = vector.load %arg9[%278, %c0_95] : memref<64x256xf32, #tpu.memory_space<vmem>>, vector<8x256xf32>
    %280 = vector.extract_strided_slice %277 {offsets = [0, 0], sizes = [8, 128], strides = [1, 1]} : vector<8x256xf32> to vector<8x128xf32>
    %c0_96 = arith.constant 0 : index
    %c0_97 = arith.constant 0 : index
    %281 = vector.load %arg3[%c0_96, %c0_97] : memref<32x128xf32, #tpu.memory_space<vmem>>, vector<32x128xf32>
    %cst_98 = arith.constant dense<0.000000e+00> : vector<8x128xf32>
    %282 = tpu.matmul %251, %281, %cst_98 {dimension_numbers = #tpu.dot_dimension_numbers<[1], [0], [0], [1], [0, 0, 1, 1], [], []>} : vector<8x32xf32>, vector<32x128xf32>, vector<8x128xf32> -> vector<8x128xf32>
    %283 = arith.addf %280, %282 : vector<8x128xf32>
    %284 = vector.extract_strided_slice %279 {offsets = [0, 128], sizes = [8, 128], strides = [1, 1]} : vector<8x256xf32> to vector<8x128xf32>
    %c0_99 = arith.constant 0 : index
    %c0_100 = arith.constant 0 : index
    %285 = vector.load %arg4[%c0_99, %c0_100] : memref<32x128xf32, #tpu.memory_space<vmem>>, vector<32x128xf32>
    %cst_101 = arith.constant dense<0.000000e+00> : vector<8x128xf32>
    %286 = tpu.matmul %266, %285, %cst_101 {dimension_numbers = #tpu.dot_dimension_numbers<[1], [0], [0], [1], [0, 0, 1, 1], [], []>} : vector<8x32xf32>, vector<32x128xf32>, vector<8x128xf32> -> vector<8x128xf32>
    %287 = arith.addf %284, %286 : vector<8x128xf32>
    %288 = arith.negf %283 : vector<8x128xf32>
    %289 = math.exp %288 : vector<8x128xf32>
    %cst_102 = arith.constant 1.000000e+00 : f32
    %290 = vector.broadcast %cst_102 : f32 to vector<8x128xf32>
    %291 = arith.addf %290, %289 : vector<8x128xf32>
    %292 = arith.divf %290, %291 : vector<8x128xf32>
    %293 = math.tanh %283 : vector<8x128xf32>
    %294 = vector.extract_strided_slice %292 {offsets = [0, 0], sizes = [8, 32], strides = [1, 1]} : vector<8x128xf32> to vector<8x32xf32>
    %295 = vector.extract_strided_slice %292 {offsets = [0, 32], sizes = [8, 32], strides = [1, 1]} : vector<8x128xf32> to vector<8x32xf32>
    %296 = vector.extract_strided_slice %293 {offsets = [0, 64], sizes = [8, 32], strides = [1, 1]} : vector<8x128xf32> to vector<8x32xf32>
    %297 = vector.extract_strided_slice %292 {offsets = [0, 96], sizes = [8, 32], strides = [1, 1]} : vector<8x128xf32> to vector<8x32xf32>
    %298 = arith.mulf %295, %249 : vector<8x32xf32>
    %299 = arith.mulf %294, %296 : vector<8x32xf32>
    %300 = arith.addf %298, %299 : vector<8x32xf32>
    %301 = math.tanh %300 : vector<8x32xf32>
    %302 = arith.mulf %297, %301 : vector<8x32xf32>
    %303 = arith.negf %287 : vector<8x128xf32>
    %304 = math.exp %303 : vector<8x128xf32>
    %cst_103 = arith.constant 1.000000e+00 : f32
    %305 = vector.broadcast %cst_103 : f32 to vector<8x128xf32>
    %306 = arith.addf %305, %304 : vector<8x128xf32>
    %307 = arith.divf %305, %306 : vector<8x128xf32>
    %308 = math.tanh %287 : vector<8x128xf32>
    %309 = vector.extract_strided_slice %307 {offsets = [0, 0], sizes = [8, 32], strides = [1, 1]} : vector<8x128xf32> to vector<8x32xf32>
    %310 = vector.extract_strided_slice %307 {offsets = [0, 32], sizes = [8, 32], strides = [1, 1]} : vector<8x128xf32> to vector<8x32xf32>
    %311 = vector.extract_strided_slice %308 {offsets = [0, 64], sizes = [8, 32], strides = [1, 1]} : vector<8x128xf32> to vector<8x32xf32>
    %312 = vector.extract_strided_slice %307 {offsets = [0, 96], sizes = [8, 32], strides = [1, 1]} : vector<8x128xf32> to vector<8x32xf32>
    %313 = arith.mulf %310, %264 : vector<8x32xf32>
    %314 = arith.mulf %309, %311 : vector<8x32xf32>
    %315 = arith.addf %313, %314 : vector<8x32xf32>
    %316 = math.tanh %315 : vector<8x32xf32>
    %317 = arith.mulf %312, %316 : vector<8x32xf32>
    %318 = arith.index_cast %273 : i32 to index
    %c0_104 = arith.constant 0 : index
    %319 = vector.load %arg7[%318, %c0_104] : memref<64x32xf32, #tpu.memory_space<vmem>>, vector<8x32xf32>
    tpu.vector_store %arg7[%318, %c0_104], %302 {strides = array<i32>} : memref<64x32xf32, #tpu.memory_space<vmem>>, vector<8x32xf32>,
    %320 = arith.index_cast %275 : i32 to index
    %c0_105 = arith.constant 0 : index
    %321 = vector.load %arg8[%320, %c0_105] : memref<64x32xf32, #tpu.memory_space<vmem>>, vector<8x32xf32>
    tpu.vector_store %arg8[%320, %c0_105], %317 {strides = array<i32>} : memref<64x32xf32, #tpu.memory_space<vmem>>, vector<8x32xf32>,
    %c6_i32 = arith.constant 6 : i32
    %c7_i32_106 = arith.constant 7 : i32
    %322 = arith.subi %c7_i32_106, %c6_i32 : i32
    %c8_i32_107 = arith.constant 8 : i32
    %323 = arith.muli %c6_i32, %c8_i32_107 : i32
    %324 = tpu.assume_multiple %323, 8 : i32
    %c8_i32_108 = arith.constant 8 : i32
    %325 = arith.muli %322, %c8_i32_108 : i32
    %326 = tpu.assume_multiple %325, 8 : i32
    %327 = arith.index_cast %324 : i32 to index
    %c0_109 = arith.constant 0 : index
    %328 = vector.load %arg9[%327, %c0_109] : memref<64x256xf32, #tpu.memory_space<vmem>>, vector<8x256xf32>
    %329 = arith.index_cast %326 : i32 to index
    %c0_110 = arith.constant 0 : index
    %330 = vector.load %arg9[%329, %c0_110] : memref<64x256xf32, #tpu.memory_space<vmem>>, vector<8x256xf32>
    %331 = vector.extract_strided_slice %328 {offsets = [0, 0], sizes = [8, 128], strides = [1, 1]} : vector<8x256xf32> to vector<8x128xf32>
    %c0_111 = arith.constant 0 : index
    %c0_112 = arith.constant 0 : index
    %332 = vector.load %arg3[%c0_111, %c0_112] : memref<32x128xf32, #tpu.memory_space<vmem>>, vector<32x128xf32>
    %cst_113 = arith.constant dense<0.000000e+00> : vector<8x128xf32>
    %333 = tpu.matmul %302, %332, %cst_113 {dimension_numbers = #tpu.dot_dimension_numbers<[1], [0], [0], [1], [0, 0, 1, 1], [], []>} : vector<8x32xf32>, vector<32x128xf32>, vector<8x128xf32> -> vector<8x128xf32>
    %334 = arith.addf %331, %333 : vector<8x128xf32>
    %335 = vector.extract_strided_slice %330 {offsets = [0, 128], sizes = [8, 128], strides = [1, 1]} : vector<8x256xf32> to vector<8x128xf32>
    %c0_114 = arith.constant 0 : index
    %c0_115 = arith.constant 0 : index
    %336 = vector.load %arg4[%c0_114, %c0_115] : memref<32x128xf32, #tpu.memory_space<vmem>>, vector<32x128xf32>
    %cst_116 = arith.constant dense<0.000000e+00> : vector<8x128xf32>
    %337 = tpu.matmul %317, %336, %cst_116 {dimension_numbers = #tpu.dot_dimension_numbers<[1], [0], [0], [1], [0, 0, 1, 1], [], []>} : vector<8x32xf32>, vector<32x128xf32>, vector<8x128xf32> -> vector<8x128xf32>
    %338 = arith.addf %335, %337 : vector<8x128xf32>
    %339 = arith.negf %334 : vector<8x128xf32>
    %340 = math.exp %339 : vector<8x128xf32>
    %cst_117 = arith.constant 1.000000e+00 : f32
    %341 = vector.broadcast %cst_117 : f32 to vector<8x128xf32>
    %342 = arith.addf %341, %340 : vector<8x128xf32>
    %343 = arith.divf %341, %342 : vector<8x128xf32>
    %344 = math.tanh %334 : vector<8x128xf32>
    %345 = vector.extract_strided_slice %343 {offsets = [0, 0], sizes = [8, 32], strides = [1, 1]} : vector<8x128xf32> to vector<8x32xf32>
    %346 = vector.extract_strided_slice %343 {offsets = [0, 32], sizes = [8, 32], strides = [1, 1]} : vector<8x128xf32> to vector<8x32xf32>
    %347 = vector.extract_strided_slice %344 {offsets = [0, 64], sizes = [8, 32], strides = [1, 1]} : vector<8x128xf32> to vector<8x32xf32>
    %348 = vector.extract_strided_slice %343 {offsets = [0, 96], sizes = [8, 32], strides = [1, 1]} : vector<8x128xf32> to vector<8x32xf32>
    %349 = arith.mulf %346, %300 : vector<8x32xf32>
    %350 = arith.mulf %345, %347 : vector<8x32xf32>
    %351 = arith.addf %349, %350 : vector<8x32xf32>
    %352 = math.tanh %351 : vector<8x32xf32>
    %353 = arith.mulf %348, %352 : vector<8x32xf32>
    %354 = arith.negf %338 : vector<8x128xf32>
    %355 = math.exp %354 : vector<8x128xf32>
    %cst_118 = arith.constant 1.000000e+00 : f32
    %356 = vector.broadcast %cst_118 : f32 to vector<8x128xf32>
    %357 = arith.addf %356, %355 : vector<8x128xf32>
    %358 = arith.divf %356, %357 : vector<8x128xf32>
    %359 = math.tanh %338 : vector<8x128xf32>
    %360 = vector.extract_strided_slice %358 {offsets = [0, 0], sizes = [8, 32], strides = [1, 1]} : vector<8x128xf32> to vector<8x32xf32>
    %361 = vector.extract_strided_slice %358 {offsets = [0, 32], sizes = [8, 32], strides = [1, 1]} : vector<8x128xf32> to vector<8x32xf32>
    %362 = vector.extract_strided_slice %359 {offsets = [0, 64], sizes = [8, 32], strides = [1, 1]} : vector<8x128xf32> to vector<8x32xf32>
    %363 = vector.extract_strided_slice %358 {offsets = [0, 96], sizes = [8, 32], strides = [1, 1]} : vector<8x128xf32> to vector<8x32xf32>
    %364 = arith.mulf %361, %315 : vector<8x32xf32>
    %365 = arith.mulf %360, %362 : vector<8x32xf32>
    %366 = arith.addf %364, %365 : vector<8x32xf32>
    %367 = math.tanh %366 : vector<8x32xf32>
    %368 = arith.mulf %363, %367 : vector<8x32xf32>
    %369 = arith.index_cast %324 : i32 to index
    %c0_119 = arith.constant 0 : index
    %370 = vector.load %arg7[%369, %c0_119] : memref<64x32xf32, #tpu.memory_space<vmem>>, vector<8x32xf32>
    tpu.vector_store %arg7[%369, %c0_119], %353 {strides = array<i32>} : memref<64x32xf32, #tpu.memory_space<vmem>>, vector<8x32xf32>,
    %371 = arith.index_cast %326 : i32 to index
    %c0_120 = arith.constant 0 : index
    %372 = vector.load %arg8[%371, %c0_120] : memref<64x32xf32, #tpu.memory_space<vmem>>, vector<8x32xf32>
    tpu.vector_store %arg8[%371, %c0_120], %368 {strides = array<i32>} : memref<64x32xf32, #tpu.memory_space<vmem>>, vector<8x32xf32>,
    %c7_i32_121 = arith.constant 7 : i32
    %c7_i32_122 = arith.constant 7 : i32
    %373 = arith.subi %c7_i32_122, %c7_i32_121 : i32
    %c8_i32_123 = arith.constant 8 : i32
    %374 = arith.muli %c7_i32_121, %c8_i32_123 : i32
    %375 = tpu.assume_multiple %374, 8 : i32
    %c8_i32_124 = arith.constant 8 : i32
    %376 = arith.muli %373, %c8_i32_124 : i32
    %377 = tpu.assume_multiple %376, 8 : i32
    %378 = arith.index_cast %375 : i32 to index
    %c0_125 = arith.constant 0 : index
    %379 = vector.load %arg9[%378, %c0_125] : memref<64x256xf32, #tpu.memory_space<vmem>>, vector<8x256xf32>
    %380 = arith.index_cast %377 : i32 to index
    %c0_126 = arith.constant 0 : index
    %381 = vector.load %arg9[%380, %c0_126] : memref<64x256xf32, #tpu.memory_space<vmem>>, vector<8x256xf32>
    %382 = vector.extract_strided_slice %379 {offsets = [0, 0], sizes = [8, 128], strides = [1, 1]} : vector<8x256xf32> to vector<8x128xf32>
    %c0_127 = arith.constant 0 : index
    %c0_128 = arith.constant 0 : index
    %383 = vector.load %arg3[%c0_127, %c0_128] : memref<32x128xf32, #tpu.memory_space<vmem>>, vector<32x128xf32>
    %cst_129 = arith.constant dense<0.000000e+00> : vector<8x128xf32>
    %384 = tpu.matmul %353, %383, %cst_129 {dimension_numbers = #tpu.dot_dimension_numbers<[1], [0], [0], [1], [0, 0, 1, 1], [], []>} : vector<8x32xf32>, vector<32x128xf32>, vector<8x128xf32> -> vector<8x128xf32>
    %385 = arith.addf %382, %384 : vector<8x128xf32>
    %386 = vector.extract_strided_slice %381 {offsets = [0, 128], sizes = [8, 128], strides = [1, 1]} : vector<8x256xf32> to vector<8x128xf32>
    %c0_130 = arith.constant 0 : index
    %c0_131 = arith.constant 0 : index
    %387 = vector.load %arg4[%c0_130, %c0_131] : memref<32x128xf32, #tpu.memory_space<vmem>>, vector<32x128xf32>
    %cst_132 = arith.constant dense<0.000000e+00> : vector<8x128xf32>
    %388 = tpu.matmul %368, %387, %cst_132 {dimension_numbers = #tpu.dot_dimension_numbers<[1], [0], [0], [1], [0, 0, 1, 1], [], []>} : vector<8x32xf32>, vector<32x128xf32>, vector<8x128xf32> -> vector<8x128xf32>
    %389 = arith.addf %386, %388 : vector<8x128xf32>
    %390 = arith.negf %385 : vector<8x128xf32>
    %391 = math.exp %390 : vector<8x128xf32>
    %cst_133 = arith.constant 1.000000e+00 : f32
    %392 = vector.broadcast %cst_133 : f32 to vector<8x128xf32>
    %393 = arith.addf %392, %391 : vector<8x128xf32>
    %394 = arith.divf %392, %393 : vector<8x128xf32>
    %395 = math.tanh %385 : vector<8x128xf32>
    %396 = vector.extract_strided_slice %394 {offsets = [0, 0], sizes = [8, 32], strides = [1, 1]} : vector<8x128xf32> to vector<8x32xf32>
    %397 = vector.extract_strided_slice %394 {offsets = [0, 32], sizes = [8, 32], strides = [1, 1]} : vector<8x128xf32> to vector<8x32xf32>
    %398 = vector.extract_strided_slice %395 {offsets = [0, 64], sizes = [8, 32], strides = [1, 1]} : vector<8x128xf32> to vector<8x32xf32>
    %399 = vector.extract_strided_slice %394 {offsets = [0, 96], sizes = [8, 32], strides = [1, 1]} : vector<8x128xf32> to vector<8x32xf32>
    %400 = arith.mulf %397, %351 : vector<8x32xf32>
    %401 = arith.mulf %396, %398 : vector<8x32xf32>
    %402 = arith.addf %400, %401 : vector<8x32xf32>
    %403 = math.tanh %402 : vector<8x32xf32>
    %404 = arith.mulf %399, %403 : vector<8x32xf32>
    %405 = arith.negf %389 : vector<8x128xf32>
    %406 = math.exp %405 : vector<8x128xf32>
    %cst_134 = arith.constant 1.000000e+00 : f32
    %407 = vector.broadcast %cst_134 : f32 to vector<8x128xf32>
    %408 = arith.addf %407, %406 : vector<8x128xf32>
    %409 = arith.divf %407, %408 : vector<8x128xf32>
    %410 = math.tanh %389 : vector<8x128xf32>
    %411 = vector.extract_strided_slice %409 {offsets = [0, 0], sizes = [8, 32], strides = [1, 1]} : vector<8x128xf32> to vector<8x32xf32>
    %412 = vector.extract_strided_slice %409 {offsets = [0, 32], sizes = [8, 32], strides = [1, 1]} : vector<8x128xf32> to vector<8x32xf32>
    %413 = vector.extract_strided_slice %410 {offsets = [0, 64], sizes = [8, 32], strides = [1, 1]} : vector<8x128xf32> to vector<8x32xf32>
    %414 = vector.extract_strided_slice %409 {offsets = [0, 96], sizes = [8, 32], strides = [1, 1]} : vector<8x128xf32> to vector<8x32xf32>
    %415 = arith.mulf %412, %366 : vector<8x32xf32>
    %416 = arith.mulf %411, %413 : vector<8x32xf32>
    %417 = arith.addf %415, %416 : vector<8x32xf32>
    %418 = math.tanh %417 : vector<8x32xf32>
    %419 = arith.mulf %414, %418 : vector<8x32xf32>
    %420 = arith.index_cast %375 : i32 to index
    %c0_135 = arith.constant 0 : index
    %421 = vector.load %arg7[%420, %c0_135] : memref<64x32xf32, #tpu.memory_space<vmem>>, vector<8x32xf32>
    tpu.vector_store %arg7[%420, %c0_135], %404 {strides = array<i32>} : memref<64x32xf32, #tpu.memory_space<vmem>>, vector<8x32xf32>,
    %422 = arith.index_cast %377 : i32 to index
    %c0_136 = arith.constant 0 : index
    %423 = vector.load %arg8[%422, %c0_136] : memref<64x32xf32, #tpu.memory_space<vmem>>, vector<8x32xf32>
    tpu.vector_store %arg8[%422, %c0_136], %419 {strides = array<i32>} : memref<64x32xf32, #tpu.memory_space<vmem>>, vector<8x32xf32>,
    %c8_i32_137 = arith.constant 8 : i32
    return
  }
}

</mosaic_0001>

<bundles_post_ra>
// kernel: bert_lstm_forward.3
= control target key start
LH: loop header
LB: loop body
LE: loop exit
PB: predicated region body
PF: predicated region fallthrough
CT: control target
= control target key end

     0   :  { %vm91_vm0 = vcmask 261120   ;;  %s1654_s28 = smov 32   ;;  %s2169_s3 = inlined_call_operand.vmem [shape: bf16[32,256], index: 3, kind: input, shape index: {}]   ;;  %s2170_s2 = inlined_call_operand.vmem [shape: bf16[32,256], index: 2, kind: input, shape index: {}]   ;;  %s2171_s1 = inlined_call_operand.vmem [shape: f32[64,32], index: 1, kind: input, shape index: {}]   ;;  %s2172_s0 = inlined_call_operand.vmem [shape: f32[64,32], index: 0, kind: input, shape index: {}]   ;;  %s2173_s5 = inlined_call_operand.vmem [shape: f32[32,128], index: 5, kind: input, shape index: {}]   ;;  %s2174_s6 = inlined_call_operand.vmem [shape: f32[32,128], index: 6, kind: input, shape index: {}]   ;;  %s2175_s8 = inlined_call_operand.vmem [shape: f32[2,8,32], index: 8, kind: input, shape index: {}]   ;;  %s2176_s7 = inlined_call_operand.vmem [shape: f32[2,8,32], index: 7, kind: input, shape index: {}]   ;;  %s2177_s4 = inlined_call_operand.vmem [shape: f32[1,256], index: 4, kind: input, shape index: {}]   ;;  %s2178_s9 = inlined_call_operand.vmem [shape: f32[64,128], index: 9, kind: input, shape index: {}]   ;;  %s2179_s10 = inlined_call_operand.vmem [shape: f32[1,128], index: 10, kind: input, shape index: {}]   ;;  %s2180_s11 = inlined_call_operand.vmem [shape: f32[8,128], index: 11, kind: output, shape index: {}]  }
   0x1   :  { %v1441_v0 = vld [vmem:[%s2169_s3 + $0x10] sm:$0xf]  ;;  %v1522_v1 = vld [vmem:[%s2169_s3 + $0x14] sm:$0xf0]  ;;  %v1521_v2 = vld [vmem:[%s2169_s3 + $0x14] sm:$0xf] }
   0x2   :  { %v1442_v3 = vor.u32 %v1522_v1, %v1441_v0  ;;  %v1443_v4 = vld [vmem:[%s2169_s3 + $0x18] sm:$0xf0]  ;;  %v1465_v5 = vld [vmem:[%s2170_s2 + $0x10] sm:$0xf]  ;;  %v1518_v6 = vld [vmem:[%s2170_s2 + $0x14] sm:$0xf0] }
   0x3   :  { %v1446_v7 = vor.u32 %v1521_v2, %v1443_v4  ;;  %v1466_v8 = vor.u32 %v1518_v6, %v1465_v5  ;;  %v1517_v9 = vld [vmem:[%s2170_s2 + $0x14] sm:$0xf]  ;;  %v1467_v10 = vld [vmem:[%s2170_s2 + $0x18] sm:$0xf0]  ;;  %v1433_v11 = vld [vmem:[%s2169_s3] sm:$0xf] }
   0x4   :  { %110 = vmatpush.bf16.msra.mxu0 %v1442_v3  ;;  %v1470_v12 = vor.u32 %v1517_v9, %v1467_v10  ;;  %v1520_v13 = vld [vmem:[%s2169_s3 + $0x4] sm:$0xf0]  ;;  %v1519_v14 = vld [vmem:[%s2169_s3 + $0x4] sm:$0xf]  ;;  %v1435_v15 = vld [vmem:[%s2169_s3 + $0x8] sm:$0xf0] }
   0x5   :  { %139 = vmatpush.bf16.msra.mxu1 %v1446_v7  ;;  %200 = vmatpush.bf16.msra.mxu2 %v1466_v8  ;;  %v1434_v16 = vor.u32 %v1520_v13, %v1433_v11  ;;  %v1438_v17 = vor.u32 %v1519_v14, %v1435_v15  ;;  %v1457_v18 = vld [vmem:[%s2170_s2] sm:$0xf]  ;;  %v1516_v19 = vld [vmem:[%s2170_s2 + $0x4] sm:$0xf0]  ;;  %v1515_v20 = vld [vmem:[%s2170_s2 + $0x4] sm:$0xf] }
   0x6   :  { %229 = vmatpush.bf16.msra.mxu3 %v1470_v12  ;;  %v1458_v21 = vor.u32 %v1516_v19, %v1457_v18  ;;  %v1459_v22 = vld [vmem:[%s2170_s2 + $0x8] sm:$0xf0]  ;;  %v55_v23 = vld [vmem:[%s2171_s1] sm:$0xff]  ;;  %v1779_v29 = vld [vmem:[%s2173_s5 + $0x18] sm:$0xff] }
   0x7   :  { %v56_v24 = vld [vmem:[%s2171_s1 + $0x8] sm:$0xff]  ;;  %v1462_v25 = vor.u32 %v1515_v20, %v1459_v22  ;;  %v39_v27 = vld [vmem:[%s2172_s0] sm:$0xff]  ;;  %v1784_v31 = vld [vmem:[%s2174_s6 + $0x18] sm:$0xff] }
   0x8   :  { %v63_v26 = vpack.c.bf16 %v56_v24, %v55_v23  ;;  %v40_v28 = vld [vmem:[%s2172_s0 + $0x8] sm:$0xff]  ;;  %111 = vmatpush.bf16.msra.mxu0 %v1434_v16  ;;  %v1790_v32 = vld [vmem:[%s2173_s5 + $0x10] sm:$0xff]  ;;  %v58_v37 = vld [vmem:[%s2171_s1 + $0x18] sm:$0xff] }
   0x9   :  { %v47_v30 = vpack.c.bf16 %v40_v28, %v39_v27  ;;  %140 = vmatpush.bf16.msra.mxu1 %v1438_v17  ;;  %201 = vmatpush.bf16.msra.mxu2 %v1458_v21  ;;  %v1797_v33 = vld [vmem:[%s2174_s6 + $0x10] sm:$0xff]  ;;  %v1806_v34 = vld [vmem:[%s2173_s5 + $0x8] sm:$0xff]  ;;  %v42_v39 = vld [vmem:[%s2172_s0 + $0x18] sm:$0xff] }
   0xa   :  { %230 = vmatpush.bf16.msra.mxu3 %v1462_v25  ;;  %v1811_v35 = vld [vmem:[%s2174_s6 + $0x8] sm:$0xff]  ;;  %v57_v36 = vld [vmem:[%s2171_s1 + $0x10] sm:$0xff]  ;;  %v1841_v42 = vld [vmem:[%s2173_s5] sm:$0xff] }
   0xb   :  { %1447 = vmatmul.msk.bf16.vlgmr.msra.gmra.mxu0 %vm91_vm0, %v63_v26  ;;  %v41_v38 = vld [vmem:[%s2172_s0 + $0x10] sm:$0xff]  ;;  %v64_v40 = vpack.c.bf16 %v58_v37, %v57_v36  ;;  %v1846_v43 = vld [vmem:[%s2174_s6] sm:$0xff]  ;;  %v60_v45 = vld [vmem:[%s2171_s1 + $0x28] sm:$0xff] }
   0xc   :  { %325 = vmatpush.msrb.mxu0 %v1779_v29  ;;  %1451 = vmatmul.msk.bf16.vlgmr.msra.gmra.mxu1 %vm91_vm0, %v63_v26  ;;  %v48_v41 = vpack.c.bf16 %v42_v39, %v41_v38  ;;  %v59_v44 = vld [vmem:[%s2171_s1 + $0x20] sm:$0xff]  ;;  %v44_v47 = vld [vmem:[%s2172_s0 + $0x28] sm:$0xff]  ;;  %v61_v52 = vld [vmem:[%s2171_s1 + $0x30] sm:$0xff] }
   0xd   :  { %353 = vmatpush.msrb.mxu1 %v1784_v31  ;;  %1471 = vmatmul.msk.bf16.vlgmr.msra.gmra.mxu2 %vm91_vm0, %v47_v30  ;;  %v43_v46 = vld [vmem:[%s2172_s0 + $0x20] sm:$0xff]  ;;  %v65_v48 = vpack.c.bf16 %v60_v45, %v59_v44  ;;  %v1480_v51 = vld [vmem:[%s2175_s8 + $0x8] sm:$0xff]  ;;  %v62_v53 = vld [vmem:[%s2171_s1 + $0x38] sm:$0xff] }
   0xe   :  { %1475 = vmatmul.msk.bf16.vlgmr.msra.gmra.mxu3 %vm91_vm0, %v47_v30  ;;  %326 = vmatpush.msrb.mxu0 %v1790_v32  ;;  %v49_v49 = vpack.c.bf16 %v44_v47, %v43_v46  ;;  %v291_v50 = vld [vmem:[%s2175_s8] sm:$0xff]  ;;  %v45_v54 = vld [vmem:[%s2172_s0 + $0x30] sm:$0xff]  ;;  %v46_v55 = vld [vmem:[%s2172_s0 + $0x38] sm:$0xff]  ;;  %v66_v56 = vpack.c.bf16 %v62_v53, %v61_v52 }
   0xf   :  { %354 = vmatpush.msrb.mxu1 %v1797_v33  ;;  %497 = vmatpush.msrb.mxu3 %v1784_v31  ;;  %v50_v57 = vpack.c.bf16 %v46_v55, %v45_v54  ;;  %v290_v58 = vld [vmem:[%s2176_s7] sm:$0xff]  ;;  %v1479_v59 = vld [vmem:[%s2176_s7 + $0x8] sm:$0xff] }
  0x10   :  { %327 = vmatpush.msrb.mxu0 %v1806_v34  ;;  %471 = vmatpush.msrb.mxu2 %v1779_v29  ;;  %v252_v62 = vld [vmem:[%s2177_s4] sm:$0x3]  ;;  %s1655_s4 = smov 64  }
  0x11   :  { %355 = vmatpush.msrb.mxu1 %v1811_v35  ;;  %498 = vmatpush.msrb.mxu3 %v1797_v33  ;;  %v1927_v0 = vperm.slane %v252_v62, 1  ;;  %v254_v10 = vperm.slane %v252_v62, 0 }
  0x12   :  { %472 = vmatpush.msrb.mxu2 %v1790_v32  ;;  %328 = vmatpush.msrb.mxu0 %v1841_v42 }
  0x13   :  { %499 = vmatpush.msrb.mxu3 %v1811_v35  ;;  %356 = vmatpush.msrb.mxu1 %v1846_v43 }
  0x14   :  { %473 = vmatpush.msrb.mxu2 %v1806_v34  ;;  %607 = vmatpush.msra.mxu0 %v1779_v29 }
  0x15   :  { %500 = vmatpush.msrb.mxu3 %v1846_v43  ;;  %633 = vmatpush.msra.mxu1 %v1784_v31 }
  0x16   :  { %474 = vmatpush.msrb.mxu2 %v1841_v42  ;;  %608 = vmatpush.msra.mxu0 %v1790_v32 }
  0x17   :  { %769 = vmatpush.msra.mxu3 %v1784_v31  ;;  %634 = vmatpush.msra.mxu1 %v1797_v33 }
  0x18   :  { %743 = vmatpush.msra.mxu2 %v1779_v29  ;;  %609 = vmatpush.msra.mxu0 %v1806_v34 }
  0x19   :  { %770 = vmatpush.msra.mxu3 %v1797_v33  ;;  %635 = vmatpush.msra.mxu1 %v1811_v35 }
  0x1a   :  { %744 = vmatpush.msra.mxu2 %v1790_v32  ;;  %610 = vmatpush.msra.mxu0 %v1841_v42 }
  0x1b   :  { %1448 = vmatmul.msk.bf16.gmra.mxu0 %vm91_vm0, %v64_v40  ;;  %771 = vmatpush.msra.mxu3 %v1811_v35 }
  0x1c   :  { %1452 = vmatmul.msk.bf16.gmra.mxu1 %vm91_vm0, %v64_v40  ;;  %745 = vmatpush.msra.mxu2 %v1806_v34 }
  0x1d   :  { %1472 = vmatmul.msk.bf16.gmra.mxu2 %vm91_vm0, %v48_v41  ;;  %636 = vmatpush.msra.mxu1 %v1846_v43 }
  0x1e   :  { %1476 = vmatmul.msk.bf16.gmra.mxu3 %vm91_vm0, %v48_v41  ;;  %746 = vmatpush.msra.mxu2 %v1841_v42 }
  0x1f   :  { %772 = vmatpush.msra.mxu3 %v1846_v43  ;;  %383 = vrot.lane.b32.xlu1 %v291_v50, %s1654_s28 }
  0x27   :  { %424 = vrot.lane.b32.xlu1 %v1480_v51, %s1654_s28 }
  0x2b   :  { %1449 = vmatmul.msk.bf16.gmra.mxu0 %vm91_vm0, %v65_v48 }
  0x2c   :  { %1453 = vmatmul.msk.bf16.gmra.mxu1 %vm91_vm0, %v65_v48 }
  0x2d   :  { %1473 = vmatmul.msk.bf16.gmra.mxu2 %vm91_vm0, %v49_v49 }
  0x2e   :  { %1477 = vmatmul.msk.bf16.gmra.mxu3 %vm91_vm0, %v49_v49 }
  0x3b   :  { %1450 = vmatmul.msk.bf16.gmra.mxu0 %vm91_vm0, %v66_v56 }
  0x3c   :  { %1454 = vmatmul.msk.bf16.gmra.mxu1 %vm91_vm0, %v66_v56 }
  0x3d   :  { %1474 = vmatmul.msk.bf16.gmra.mxu2 %vm91_vm0, %v50_v57 }
  0x3e   :  { %1478 = vmatmul.msk.bf16.gmra.mxu3 %vm91_vm0, %v50_v57 }
  0x4b   :  { %1481 = vmatmul.msk.f32.vlgmr.msrb.gmra.mxu0 %vm91_vm0, %v290_v58 }
  0x4c   :  { %1482 = vmatmul.msk.f32.vlgmr.msrb.gmra.mxu1 %vm91_vm0, %v1479_v59  ;;  %869 = vmatpush.msrb.mxu0 %v1779_v29 }
  0x4d   :  { %895 = vmatpush.msrb.mxu1 %v1784_v31 }
  0x4e   :  { %870 = vmatpush.msrb.mxu0 %v1790_v32 }
  0x4f   :  { %896 = vmatpush.msrb.mxu1 %v1797_v33 }
  0x50   :  { %871 = vmatpush.msrb.mxu0 %v1806_v34 }
  0x51   :  { %897 = vmatpush.msrb.mxu1 %v1811_v35 }
  0x52   :  { %872 = vmatpush.msrb.mxu0 %v1841_v42 }
  0x53   :  { %898 = vmatpush.msrb.mxu1 %v1846_v43 }
  0x88   :  { %v113_v60 = vpop.f32.mrf.mxu0 }
  0x89   :  { %v142_v61 = vpop.f32.mrf.mxu1 }
  0x90   :  { %v203_v63 = vpop.f32.mrf.mxu2  ;;  %v115_v2 = vpop.f32.mrf.mxu0 }
  0x91   :  { %v232_v1 = vpop.f32.mrf.mxu3  ;;  %v144_v4 = vpop.f32.mrf.mxu1  ;;  %v204_v62 = vadd.f32 %v203_v63, %v113_v60 }
  0x92   :  { %v233_v3 = vadd.f32 %v232_v1, %v142_v61 }
  0x94   :  { %v1930_v5 = vadd.f32 %v1927_v0, %v233_v3 }
  0x98   :  { %v205_v6 = vpop.f32.mrf.mxu2  ;;  %v118_v9 = vpop.f32.mrf.mxu0 }
  0x99   :  { %v206_v7 = vadd.f32 %v205_v6, %v115_v2  ;;  %v234_v8 = vpop.f32.mrf.mxu3  ;;  %v147_v12 = vpop.f32.mrf.mxu1 }
  0x9a   :  { %v235_v11 = vadd.f32 %v234_v8, %v144_v4  ;;  %v258_v4 = vadd.f32 %v254_v10, %v204_v62 }
  0x9b   :  { %v1932_v13 = vadd.f32 %v254_v10, %v206_v7 }
  0x9c   :  { %v1935_v14 = vadd.f32 %v1927_v0, %v235_v11 }
  0xa0   :  { %v208_v15 = vpop.f32.mrf.mxu2  ;;  %v120_v18 = vpop.f32.mrf.mxu0 }
  0xa1   :  { %v209_v16 = vadd.f32 %v208_v15, %v118_v9  ;;  %v237_v17 = vpop.f32.mrf.mxu3  ;;  %v149_v20 = vpop.f32.mrf.mxu1 }
  0xa2   :  { %v238_v19 = vadd.f32 %v237_v17, %v147_v12 }
  0xa3   :  { %v1937_v21 = vadd.f32 %v254_v10, %v209_v16 }
  0xa4   :  { %v1940_v22 = vadd.f32 %v1927_v0, %v238_v19 }
  0xa8   :  { %v210_v23 = vpop.f32.mrf.mxu2  ;;  %v123_v26 = vpop.f32.mrf.mxu0 }
  0xa9   :  { %v211_v24 = vadd.f32 %v210_v23, %v120_v18  ;;  %v239_v25 = vpop.f32.mrf.mxu3  ;;  %v152_v28 = vpop.f32.mrf.mxu1 }
  0xaa   :  { %v240_v27 = vadd.f32 %v239_v25, %v149_v20 }
  0xab   :  { %v1942_v30 = vadd.f32 %v254_v10, %v211_v24 }
  0xac   :  { %v1945_v36 = vadd.f32 %v1927_v0, %v240_v27 }
  0xb0   :  { %v213_v37 = vpop.f32.mrf.mxu2  ;;  %v125_v40 = vpop.f32.mrf.mxu0 }
  0xb1   :  { %v214_v38 = vadd.f32 %v213_v37, %v123_v26  ;;  %v242_v39 = vpop.f32.mrf.mxu3  ;;  %v154_v44 = vpop.f32.mrf.mxu1 }
  0xb2   :  { %v243_v41 = vadd.f32 %v242_v39, %v152_v28 }
  0xb3   :  { %v1947_v45 = vadd.f32 %v254_v10, %v214_v38 }
  0xb4   :  { %v1950_v46 = vadd.f32 %v1927_v0, %v243_v41 }
  0xb8   :  { %v215_v47 = vpop.f32.mrf.mxu2  ;;  %v128_v50 = vpop.f32.mrf.mxu0 }
  0xb9   :  { %v216_v48 = vadd.f32 %v215_v47, %v125_v40  ;;  %v244_v49 = vpop.f32.mrf.mxu3  ;;  %v157_v52 = vpop.f32.mrf.mxu1 }
  0xba   :  { %v245_v51 = vadd.f32 %v244_v49, %v154_v44 }
  0xbb   :  { %v1952_v53 = vadd.f32 %v254_v10, %v216_v48 }
  0xbc   :  { %v1955_v54 = vadd.f32 %v1927_v0, %v245_v51 }
  0xc0   :  { %v218_v55 = vpop.f32.mrf.mxu2  ;;  %v130_v58 = vpop.f32.mrf.mxu0 }
  0xc1   :  { %v219_v56 = vadd.f32 %v218_v55, %v128_v50  ;;  %v247_v57 = vpop.f32.mrf.mxu3  ;;  %v159_v2 = vpop.f32.mrf.mxu1 }
  0xc2   :  { %v248_v59 = vadd.f32 %v247_v57, %v157_v52 }
  0xc3   :  { %v1957_v61 = vadd.f32 %v254_v10, %v219_v56 }
  0xc4   :  { %v1960_v1 = vadd.f32 %v1927_v0, %v248_v59 }
  0xc8   :  { %v220_v3 = vpop.f32.mrf.mxu2  ;;  %v330_v8 = vpop.f32.mrf.mxu0 }
  0xc9   :  { %v221_v6 = vadd.f32 %v220_v3, %v130_v58  ;;  %v249_v7 = vpop.f32.mrf.mxu3  ;;  %v333_v11 = vadd.f32 %v330_v8, %v258_v4  ;;  %v358_v16 = vpop.f32.mrf.mxu1 }
  0xca   :  { %v250_v9 = vadd.f32 %v249_v7, %v159_v2  ;;  %v384_v3 = vpop.permute.xlu1 %383 }
  0xcb   :  { %v1962_v12 = vadd.f32 %v254_v10, %v221_v6  ;;  %1526 = vtanh.f32 %v333_v11  ;;  %v1483_v63 = vmul.f32 -1.442695, %v333_v11 }
  0xcc   :  { %v273_v15 = vadd.f32 %v1927_v0, %v250_v9 }
  0xce   :  { %v361_v17 = vadd.f32 %v358_v16, %v273_v15 }
  0xd0   :  { %1528 = vtanh.f32 %v361_v17  ;;  %v1484_v19 = vmul.f32 -1.442695, %v361_v17 }
  0xd1   :  { %v1527_v18 = vpop.eup %1526  ;;  %1530 = vpow2.f32 %v1483_v63 }
  0xd2   :  { %388 = vrot.lane.b32.xlu0 %v1527_v18, %s1655_s4  ;;  %1532 = vpow2.f32 %v1484_v19  ;;  %v425_v8 = vpop.permute.xlu1 %424 }
  0xd6   :  { %v1529_v60 = vpop.eup %1528 }
  0xd7   :  { %v1531_v20 = vpop.eup %1530 }
  0xd8   :  { %v365_v10 = vadd.f32 1.0, %v1531_v20  ;;  %v1533_v23 = vpop.eup %1532 }
  0xd9   :  { %v406_v24 = vadd.f32 1.0, %v1533_v23 }
  0xda   :  { %429 = vrot.lane.b32.xlu0 %v1529_v60, %s1655_s4  ;;  %1534 = vrcp.f32 %v365_v10  ;;  %v377_v40 = vand.u32 2147483648, %v365_v10  ;;  %vm371_vm2 = vweird.f32 %v365_v10  ;;  %v375_v41 = vand.u32 2147483647, %v365_v10 }
  0xdb   :  { %1536 = vrcp.f32 %v406_v24  ;;  %v418_v55 = vand.u32 2147483648, %v406_v24  ;;  %vm412_vm6 = vweird.f32 %v406_v24  ;;  %v416_v56 = vand.u32 2147483647, %v406_v24 }
  0xdc   :  { %v378_v48 = vor.u32 1.1754944e-38, %v377_v40  ;;  %vm376_vm4 = vcmp.eq.f32.partialorder %v375_v41, 8.507059e+37 }
  0xdd   :  { %v419_v58 = vor.u32 1.1754944e-38, %v418_v55  ;;  %vm417_vm8 = vcmp.eq.f32.partialorder %v416_v56, 8.507059e+37 }
  0xe0   :  { %v1535_v0 = vpop.eup %1534 }
  0xe1   :  { %v367_v25 = vmul.f32 %v1535_v0, %v365_v10  ;;  %v1537_v27 = vpop.eup %1536  ;;  %vm372_vm1 = vweird.f32 %v1535_v0 }
  0xe2   :  { %v408_v37 = vmul.f32 %v1537_v27, %v406_v24  ;;  %vm373_vm3 = vmor %vm371_vm2, %vm372_vm1  ;;  %vm413_vm5 = vweird.f32 %v1537_v27 }
  0xe3   :  { %v368_v26 = vsub.f32 1.0, %v367_v25  ;;  %vm414_vm7 = vmor %vm412_vm6, %vm413_vm5 }
  0xe4   :  { %v409_v39 = vsub.f32 1.0, %v408_v37 }
  0xe5   :  { %v369_v28 = vmul.f32 %v1535_v0, %v368_v26 }
  0xe6   :  { %v410_v47 = vmul.f32 %v1537_v27, %v409_v39 }
  0xe7   :  { %v370_v38 = vadd.f32 %v1535_v0, %v369_v28 }
  0xe8   :  { %v411_v51 = vadd.f32 %v1537_v27, %v410_v47 }
  0xe9   :  { %v374_v44 = vsel %vm373_vm3, %v1535_v0, %v370_v38 }
  0xea   :  { %v379_v49 = vsel %vm376_vm4, %v378_v48, %v374_v44  ;;  %v415_v57 = vsel %vm414_vm7, %v1537_v27, %v411_v51 }
  0xeb   :  { %v420_v59 = vsel %vm417_vm8, %v419_v58, %v415_v57  ;;  %v386_v4 = vmul.f32 %v384_v3, %v379_v49 }
  0xec   :  { %v427_v9 = vmul.f32 %v425_v8, %v420_v59 }
 0x144   :  { %v389_v50 = vpop.permute.xlu0 %388 }
 0x145   :  { %v391_v52 = vmul.f32 %v389_v50, %v379_v49 }
 0x147   :  { %393 = vrot.lane.b32.xlu2 %v391_v52, %s1654_s28 }
 0x14c   :  { %v430_v62 = vpop.permute.xlu0 %429 }
 0x14d   :  { %v432_v2 = vmul.f32 %v430_v62, %v420_v59 }
 0x14f   :  { %434 = vrot.lane.b32.xlu2 %v432_v2, %s1654_s28 }
 0x1a1   :  { %v394_v6 = vpop.permute.xlu2 %393 }
 0x1a2   :  { %v1969_v7 = vadd.f32 %v394_v6, %v386_v4 }
 0x1a4   :  { %1538 = vtanh.f32 %v1969_v7 }
 0x1a9   :  { %v435_v11 = vpop.permute.xlu2 %434 }
 0x1aa   :  { %v1539_v15 = vpop.eup %1538  ;;  %v1972_v16 = vadd.f32 %v435_v11, %v427_v9 }
 0x1ab   :  { %399 = vrot.lane.b32.xlu0 %v1539_v15, %s1655_s4 }
 0x1ac   :  { %1540 = vtanh.f32 %v1972_v16 }
 0x1b2   :  { %v1541_v17 = vpop.eup %1540 }
 0x1b3   :  { %440 = vrot.lane.b32.xlu1 %v1541_v17, %s1655_s4 }
 0x21d   :  { %v400_v18 = vpop.permute.xlu0 %399 }
 0x21e   :  { %v402_v60 = vmul.f32 %v400_v18, %v379_v49 }
 0x220   :  { %455 = vrot.lane.b32.xlu2 %v402_v60, %s1654_s28 }
 0x225   :  { %v441_v63 = vpop.permute.xlu1 %440 }
 0x226   :  { %v443_v19 = vmul.f32 %v441_v63, %v420_v59 }
 0x228   :  { %481 = vrot.lane.b32.xlu0 %v443_v19, %s1654_s28 }
 0x27a   :  { %v456_v20 = vpop.permute.xlu2 %455 }
 0x27b   :  { %1485 = vmatmul.msk.f32.vlgmr.msrb.gmra.mxu2 %vm91_vm0, %v456_v20 }
 0x27c   :  { %995 = vmatpush.msrb.mxu2 %v1779_v29 }
 0x27e   :  { %996 = vmatpush.msrb.mxu2 %v1790_v32 }
 0x280   :  { %997 = vmatpush.msrb.mxu2 %v1806_v34 }
 0x282   :  { %998 = vmatpush.msrb.mxu2 %v1841_v42 }
 0x29a   :  { %v482_v10 = vpop.permute.xlu0 %481 }
 0x29b   :  { %1486 = vmatmul.msk.f32.vlgmr.msrb.gmra.mxu3 %vm91_vm0, %v482_v10 }
 0x29c   :  { %1021 = vmatpush.msrb.mxu3 %v1784_v31 }
 0x29e   :  { %1022 = vmatpush.msrb.mxu3 %v1797_v33 }
 0x2a0   :  { %1023 = vmatpush.msrb.mxu3 %v1811_v35 }
 0x2a2   :  { %1024 = vmatpush.msrb.mxu3 %v1846_v43 }
 0x2fe   :  { %v476_v23 = vpop.f32.mrf.mxu2 }
 0x2ff   :  { %v479_v24 = vadd.f32 %v476_v23, %v1932_v13 }
 0x301   :  { %1542 = vtanh.f32 %v479_v24  ;;  %v1487_v28 = vmul.f32 -1.442695, %v479_v24 }
 0x307   :  { %v1543_v0 = vpop.eup %1542 }
 0x308   :  { %528 = vrot.lane.b32.xlu1 %v1543_v0, %s1655_s4 }
 0x31e   :  { %v502_v25 = vpop.f32.mrf.mxu3 }
 0x31f   :  { %v505_v26 = vadd.f32 %v502_v25, %v1960_v1 }
 0x321   :  { %1544 = vtanh.f32 %v505_v26  ;;  %v1488_v37 = vmul.f32 -1.442695, %v505_v26 }
 0x322   :  { %1546 = vpow2.f32 %v1487_v28 }
 0x323   :  { %1548 = vpow2.f32 %v1488_v37 }
 0x327   :  { %v1545_v27 = vpop.eup %1544 }
 0x328   :  { %565 = vrot.lane.b32.xlu2 %v1545_v27, %s1655_s4  ;;  %v1547_v38 = vpop.eup %1546 }
 0x329   :  { %v509_v39 = vadd.f32 1.0, %v1547_v38  ;;  %v1549_v40 = vpop.eup %1548 }
 0x32a   :  { %v546_v13 = vadd.f32 1.0, %v1549_v40 }
 0x32b   :  { %1550 = vrcp.f32 %v509_v39  ;;  %v521_v52 = vand.u32 2147483648, %v509_v39  ;;  %vm515_vm10 = vweird.f32 %v509_v39  ;;  %v519_v55 = vand.u32 2147483647, %v509_v39 }
 0x32c   :  { %1552 = vrcp.f32 %v546_v13  ;;  %v558_v4 = vand.u32 2147483648, %v546_v13  ;;  %vm552_vm14 = vweird.f32 %v546_v13  ;;  %v556_v6 = vand.u32 2147483647, %v546_v13 }
 0x32d   :  { %v522_v58 = vor.u32 1.1754944e-38, %v521_v52  ;;  %vm520_vm12 = vcmp.eq.f32.partialorder %v519_v55, 8.507059e+37 }
 0x32e   :  { %v559_v9 = vor.u32 1.1754944e-38, %v558_v4  ;;  %vm557_vm1 = vcmp.eq.f32.partialorder %v556_v6, 8.507059e+37 }
 0x331   :  { %v1551_v41 = vpop.eup %1550 }
 0x332   :  { %v511_v44 = vmul.f32 %v1551_v41, %v509_v39  ;;  %v1553_v48 = vpop.eup %1552  ;;  %vm516_vm9 = vweird.f32 %v1551_v41 }
 0x333   :  { %v548_v1 = vmul.f32 %v1553_v48, %v546_v13  ;;  %vm517_vm11 = vmor %vm515_vm10, %vm516_vm9  ;;  %vm553_vm13 = vweird.f32 %v1553_v48 }
 0x334   :  { %v512_v47 = vsub.f32 1.0, %v511_v44  ;;  %vm554_vm15 = vmor %vm552_vm14, %vm553_vm13 }
 0x335   :  { %v549_v51 = vsub.f32 1.0, %v548_v1 }
 0x336   :  { %v513_v49 = vmul.f32 %v1551_v41, %v512_v47 }
 0x337   :  { %v550_v57 = vmul.f32 %v1553_v48, %v549_v51 }
 0x338   :  { %v514_v50 = vadd.f32 %v1551_v41, %v513_v49 }
 0x339   :  { %v551_v3 = vadd.f32 %v1553_v48, %v550_v57 }
 0x33a   :  { %v518_v56 = vsel %vm517_vm11, %v1551_v41, %v514_v50 }
 0x33b   :  { %v523_v62 = vsel %vm520_vm12, %v522_v58, %v518_v56  ;;  %v555_v8 = vsel %vm554_vm15, %v1553_v48, %v551_v3 }
 0x33c   :  { %v560_v15 = vsel %vm557_vm1, %v559_v9, %v555_v8  ;;  %v526_v18 = vmul.f32 %v523_v62, %v1969_v7 }
 0x33d   :  { %v563_v19 = vmul.f32 %v560_v15, %v1972_v16 }
 0x37a   :  { %v529_v59 = vpop.permute.xlu1 %528 }
 0x37b   :  { %v531_v2 = vmul.f32 %v529_v59, %v523_v62 }
 0x37d   :  { %533 = vrot.lane.b32.xlu0 %v531_v2, %s1654_s28 }
 0x382   :  { %v566_v11 = vpop.permute.xlu2 %565 }
 0x383   :  { %v568_v17 = vmul.f32 %v566_v11, %v560_v15 }
 0x385   :  { %570 = vrot.lane.b32.xlu1 %v568_v17, %s1654_s28 }
 0x3ef   :  { %v534_v60 = vpop.permute.xlu0 %533 }
 0x3f0   :  { %v1996_v63 = vadd.f32 %v534_v60, %v526_v18 }
 0x3f2   :  { %1554 = vtanh.f32 %v1996_v63 }
 0x3f7   :  { %v571_v20 = vpop.permute.xlu1 %570 }
 0x3f8   :  { %v1555_v10 = vpop.eup %1554  ;;  %v2000_v23 = vadd.f32 %v571_v20, %v563_v19 }
 0x3f9   :  { %539 = vrot.lane.b32.xlu2 %v1555_v10, %s1655_s4 }
 0x3fa   :  { %1556 = vtanh.f32 %v2000_v23 }
 0x400   :  { %v1557_v24 = vpop.eup %1556 }
 0x401   :  { %576 = vrot.lane.b32.xlu0 %v1557_v24, %s1655_s4 }
 0x453   :  { %v540_v0 = vpop.permute.xlu2 %539 }
 0x454   :  { %v542_v7 = vmul.f32 %v540_v0, %v523_v62 }
 0x456   :  { %591 = vrot.lane.b32.xlu1 %v542_v7, %s1654_s28 }
 0x473   :  { %v577_v25 = vpop.permute.xlu0 %576 }
 0x474   :  { %v579_v26 = vmul.f32 %v577_v25, %v560_v15 }
 0x476   :  { %617 = vrot.lane.b32.xlu2 %v579_v26, %s1654_s28 }
 0x4c8   :  { %v592_v16 = vpop.permute.xlu1 %591 }
 0x4c9   :  { %1489 = vmatmul.msk.f32.vlgmr.msra.gmra.mxu0 %vm91_vm0, %v592_v16 }
 0x4ca   :  { %1121 = vmatpush.msra.mxu0 %v1779_v29 }
 0x4cc   :  { %1122 = vmatpush.msra.mxu0 %v1790_v32 }
 0x4ce   :  { %1123 = vmatpush.msra.mxu0 %v1806_v34 }
 0x4d0   :  { %v618_v27 = vpop.permute.xlu2 %617  ;;  %1124 = vmatpush.msra.mxu0 %v1841_v42 }
 0x4d1   :  { %1490 = vmatmul.msk.f32.vlgmr.msra.gmra.mxu1 %vm91_vm0, %v618_v27 }
 0x4d2   :  { %1147 = vmatpush.msra.mxu1 %v1784_v31 }
 0x4d4   :  { %1148 = vmatpush.msra.mxu1 %v1797_v33 }
 0x4d6   :  { %1149 = vmatpush.msra.mxu1 %v1811_v35 }
 0x4d8   :  { %1150 = vmatpush.msra.mxu1 %v1846_v43 }
 0x546   :  { %v612_v28 = vpop.f32.mrf.mxu0 }
 0x547   :  { %v615_v37 = vadd.f32 %v612_v28, %v1937_v21 }
 0x549   :  { %1558 = vtanh.f32 %v615_v37  ;;  %v1491_v41 = vmul.f32 -1.442695, %v615_v37 }
 0x54e   :  { %v638_v38 = vpop.f32.mrf.mxu1 }
 0x54f   :  { %v1559_v39 = vpop.eup %1558  ;;  %v641_v40 = vadd.f32 %v638_v38, %v1955_v54 }
 0x550   :  { %664 = vrot.lane.b32.xlu0 %v1559_v39, %s1655_s4 }
 0x551   :  { %1560 = vtanh.f32 %v641_v40  ;;  %v1492_v44 = vmul.f32 -1.442695, %v641_v40 }
 0x552   :  { %1562 = vpow2.f32 %v1491_v41 }
 0x553   :  { %1564 = vpow2.f32 %v1492_v44 }
 0x557   :  { %v1561_v13 = vpop.eup %1560 }
 0x558   :  { %701 = vrot.lane.b32.xlu1 %v1561_v13, %s1655_s4  ;;  %v1563_v47 = vpop.eup %1562 }
 0x559   :  { %v645_v48 = vadd.f32 1.0, %v1563_v47  ;;  %v1565_v49 = vpop.eup %1564 }
 0x55a   :  { %v682_v21 = vadd.f32 1.0, %v1565_v49 }
 0x55b   :  { %1566 = vrcp.f32 %v645_v48  ;;  %v657_v58 = vand.u32 2147483648, %v645_v48  ;;  %vm651_vm3 = vweird.f32 %v645_v48  ;;  %v655_v59 = vand.u32 2147483647, %v645_v48 }
 0x55c   :  { %1568 = vrcp.f32 %v682_v21  ;;  %v694_v11 = vand.u32 2147483648, %v682_v21  ;;  %vm688_vm7 = vweird.f32 %v682_v21  ;;  %v692_v15 = vand.u32 2147483647, %v682_v21 }
 0x55d   :  { %v658_v3 = vor.u32 1.1754944e-38, %v657_v58  ;;  %vm656_vm5 = vcmp.eq.f32.partialorder %v655_v59, 8.507059e+37 }
 0x55e   :  { %v695_v18 = vor.u32 1.1754944e-38, %v694_v11  ;;  %vm693_vm9 = vcmp.eq.f32.partialorder %v692_v15, 8.507059e+37 }
 0x561   :  { %v1567_v1 = vpop.eup %1566 }
 0x562   :  { %v647_v50 = vmul.f32 %v1567_v1, %v645_v48  ;;  %v1569_v54 = vpop.eup %1568  ;;  %vm652_vm2 = vweird.f32 %v1567_v1 }
 0x563   :  { %v684_v55 = vmul.f32 %v1569_v54, %v682_v21  ;;  %vm653_vm4 = vmor %vm651_vm3, %vm652_vm2  ;;  %vm689_vm6 = vweird.f32 %v1569_v54 }
 0x564   :  { %v648_v51 = vsub.f32 1.0, %v647_v50  ;;  %vm690_vm8 = vmor %vm688_vm7, %vm689_vm6 }
 0x565   :  { %v685_v57 = vsub.f32 1.0, %v684_v55 }
 0x566   :  { %v649_v52 = vmul.f32 %v1567_v1, %v648_v51 }
 0x567   :  { %v686_v2 = vmul.f32 %v1569_v54, %v685_v57 }
 0x568   :  { %v650_v56 = vadd.f32 %v1567_v1, %v649_v52 }
 0x569   :  { %v687_v9 = vadd.f32 %v1569_v54, %v686_v2 }
 0x56a   :  { %v654_v62 = vsel %vm653_vm4, %v1567_v1, %v650_v56 }
 0x56b   :  { %v659_v4 = vsel %vm656_vm5, %v658_v3, %v654_v62  ;;  %v691_v17 = vsel %vm690_vm8, %v1569_v54, %v687_v9 }
 0x56c   :  { %v696_v19 = vsel %vm693_vm9, %v695_v18, %v691_v17  ;;  %v662_v10 = vmul.f32 %v659_v4, %v1996_v63 }
 0x56d   :  { %v699_v25 = vmul.f32 %v696_v19, %v2000_v23 }
 0x5c2   :  { %v665_v6 = vpop.permute.xlu0 %664 }
 0x5c3   :  { %v667_v8 = vmul.f32 %v665_v6, %v659_v4 }
 0x5c5   :  { %669 = vrot.lane.b32.xlu2 %v667_v8, %s1654_s28 }
 0x5ca   :  { %v702_v60 = vpop.permute.xlu1 %701 }
 0x5cb   :  { %v704_v20 = vmul.f32 %v702_v60, %v696_v19 }
 0x5cd   :  { %706 = vrot.lane.b32.xlu0 %v704_v20, %s1654_s28 }
 0x61f   :  { %v670_v24 = vpop.permute.xlu2 %669 }
 0x620   :  { %v2024_v0 = vadd.f32 %v670_v24, %v662_v10 }
 0x622   :  { %1570 = vtanh.f32 %v2024_v0 }
 0x628   :  { %v1571_v7 = vpop.eup %1570 }
 0x629   :  { %675 = vrot.lane.b32.xlu1 %v1571_v7, %s1655_s4 }
 0x63f   :  { %v707_v26 = vpop.permute.xlu0 %706 }
 0x640   :  { %v2029_v16 = vadd.f32 %v707_v26, %v699_v25 }
 0x642   :  { %1572 = vtanh.f32 %v2029_v16 }
 0x648   :  { %v1573_v27 = vpop.eup %1572 }
 0x649   :  { %712 = vrot.lane.b32.xlu2 %v1573_v27, %s1655_s4 }
 0x69b   :  { %v676_v28 = vpop.permute.xlu1 %675 }
 0x69c   :  { %v678_v63 = vmul.f32 %v676_v28, %v659_v4 }
 0x69e   :  { %727 = vrot.lane.b32.xlu0 %v678_v63, %s1654_s28 }
 0x6a3   :  { %v713_v37 = vpop.permute.xlu2 %712 }
 0x6a4   :  { %v715_v38 = vmul.f32 %v713_v37, %v696_v19 }
 0x6a6   :  { %753 = vrot.lane.b32.xlu1 %v715_v38, %s1654_s28 }
 0x710   :  { %v728_v39 = vpop.permute.xlu0 %727 }
 0x711   :  { %1493 = vmatmul.msk.f32.vlgmr.msra.gmra.mxu2 %vm91_vm0, %v728_v39 }
 0x712   :  { %1247 = vmatpush.msra.mxu2 %v1779_v29 }
 0x714   :  { %1248 = vmatpush.msra.mxu2 %v1790_v32 }
 0x716   :  { %1249 = vmatpush.msra.mxu2 %v1806_v34 }
 0x718   :  { %v754_v23 = vpop.permute.xlu1 %753  ;;  %1250 = vmatpush.msra.mxu2 %v1841_v42 }
 0x719   :  { %1494 = vmatmul.msk.f32.vlgmr.msra.gmra.mxu3 %vm91_vm0, %v754_v23 }
 0x71a   :  { %1273 = vmatpush.msra.mxu3 %v1784_v31 }
 0x71c   :  { %1274 = vmatpush.msra.mxu3 %v1797_v33 }
 0x71e   :  { %1275 = vmatpush.msra.mxu3 %v1811_v35 }
 0x720   :  { %1276 = vmatpush.msra.mxu3 %v1846_v43 }
 0x794   :  { %v748_v40 = vpop.f32.mrf.mxu2 }
 0x795   :  { %v751_v29 = vadd.f32 %v748_v40, %v1942_v30 }
 0x797   :  { %1574 = vtanh.f32 %v751_v29  ;;  %v1495_v31 = vmul.f32 -1.442695, %v751_v29 }
 0x79c   :  { %v774_v32 = vpop.f32.mrf.mxu3 }
 0x79d   :  { %v1575_v13 = vpop.eup %1574  ;;  %v777_v34 = vadd.f32 %v774_v32, %v1950_v46 }
 0x79e   :  { %800 = vrot.lane.b32.xlu2 %v1575_v13, %s1655_s4 }
 0x79f   :  { %1576 = vtanh.f32 %v777_v34  ;;  %v1496_v30 = vmul.f32 -1.442695, %v777_v34 }
 0x7a0   :  { %1578 = vpow2.f32 %v1495_v31 }
 0x7a5   :  { %v1577_v42 = vpop.eup %1576 }
 0x7a6   :  { %837 = vrot.lane.b32.xlu0 %v1577_v42, %s1655_s4  ;;  %v1579_v33 = vpop.eup %1578 }
 0x7a7   :  { %v781_v35 = vadd.f32 1.0, %v1579_v33 }
 0x7a9   :  { %1580 = vrcp.f32 %v781_v35  ;;  %v793_v46 = vand.u32 2147483648, %v781_v35  ;;  %vm787_vm11 = vweird.f32 %v781_v35  ;;  %v791_v49 = vand.u32 2147483647, %v781_v35 }
 0x7aa   :  { %1582 = vpow2.f32 %v1496_v30 }
 0x7ab   :  { %v794_v50 = vor.u32 1.1754944e-38, %v793_v46  ;;  %vm792_vm13 = vcmp.eq.f32.partialorder %v791_v49, 8.507059e+37 }
 0x7af   :  { %v1581_v43 = vpop.eup %1580 }
 0x7b0   :  { %v783_v41 = vmul.f32 %v1581_v43, %v781_v35  ;;  %vm788_vm10 = vweird.f32 %v1581_v43  ;;  %v1583_v21 = vpop.eup %1582 }
 0x7b1   :  { %vm789_vm12 = vmor %vm787_vm11, %vm788_vm10  ;;  %v818_v51 = vadd.f32 1.0, %v1583_v21 }
 0x7b2   :  { %v784_v44 = vsub.f32 1.0, %v783_v41 }
 0x7b3   :  { %1584 = vrcp.f32 %v818_v51  ;;  %v830_v2 = vand.u32 2147483648, %v818_v51  ;;  %vm824_vm15 = vweird.f32 %v818_v51  ;;  %v828_v3 = vand.u32 2147483647, %v818_v51 }
 0x7b4   :  { %v785_v47 = vmul.f32 %v1581_v43, %v784_v44 }
 0x7b5   :  { %v831_v6 = vor.u32 1.1754944e-38, %v830_v2  ;;  %vm829_vm2 = vcmp.eq.f32.partialorder %v828_v3, 8.507059e+37 }
 0x7b6   :  { %v786_v48 = vadd.f32 %v1581_v43, %v785_v47 }
 0x7b8   :  { %v790_v1 = vsel %vm789_vm12, %v1581_v43, %v786_v48 }
 0x7b9   :  { %v795_v52 = vsel %vm792_vm13, %v794_v50, %v790_v1  ;;  %v1585_v56 = vpop.eup %1584 }
 0x7ba   :  { %v820_v57 = vmul.f32 %v1585_v56, %v818_v51  ;;  %vm825_vm14 = vweird.f32 %v1585_v56  ;;  %v798_v15 = vmul.f32 %v795_v52, %v2024_v0 }
 0x7bb   :  { %vm826_vm1 = vmor %vm824_vm15, %vm825_vm14 }
 0x7bc   :  { %v821_v58 = vsub.f32 1.0, %v820_v57 }
 0x7be   :  { %v822_v59 = vmul.f32 %v1585_v56, %v821_v58 }
 0x7c0   :  { %v823_v62 = vadd.f32 %v1585_v56, %v822_v59 }
 0x7c2   :  { %v827_v4 = vsel %vm826_vm1, %v1585_v56, %v823_v62 }
 0x7c3   :  { %v832_v8 = vsel %vm829_vm2, %v831_v6, %v827_v4 }
 0x7c4   :  { %v835_v60 = vmul.f32 %v832_v8, %v2029_v16 }
 0x7f8   :  { %v801_v54 = vpop.permute.xlu2 %800 }
 0x7f9   :  { %v803_v55 = vmul.f32 %v801_v54, %v795_v52 }
 0x7fb   :  { %805 = vrot.lane.b32.xlu1 %v803_v55, %s1654_s28 }
 0x818   :  { %v838_v9 = vpop.permute.xlu0 %837 }
 0x819   :  { %v840_v11 = vmul.f32 %v838_v9, %v832_v8 }
 0x81b   :  { %842 = vrot.lane.b32.xlu2 %v840_v11, %s1654_s28 }
 0x86d   :  { %v806_v17 = vpop.permute.xlu1 %805 }
 0x86e   :  { %v2052_v18 = vadd.f32 %v806_v17, %v798_v15 }
 0x870   :  { %1586 = vtanh.f32 %v2052_v18 }
 0x875   :  { %v843_v19 = vpop.permute.xlu2 %842 }
 0x876   :  { %v1587_v20 = vpop.eup %1586  ;;  %v2056_v10 = vadd.f32 %v843_v19, %v835_v60 }
 0x877   :  { %811 = vrot.lane.b32.xlu0 %v1587_v20, %s1655_s4 }
 0x878   :  { %1588 = vtanh.f32 %v2056_v10 }
 0x87e   :  { %v1589_v24 = vpop.eup %1588 }
 0x87f   :  { %848 = vrot.lane.b32.xlu1 %v1589_v24, %s1655_s4 }
 0x8e9   :  { %v812_v7 = vpop.permute.xlu0 %811 }
 0x8ea   :  { %v814_v0 = vmul.f32 %v812_v7, %v795_v52 }
 0x8ec   :  { %853 = vrot.lane.b32.xlu2 %v814_v0, %s1654_s28 }
 0x8f1   :  { %v849_v25 = vpop.permute.xlu1 %848 }
 0x8f2   :  { %v851_v26 = vmul.f32 %v849_v25, %v832_v8 }
 0x8f4   :  { %879 = vrot.lane.b32.xlu0 %v851_v26, %s1654_s28 }
 0x946   :  { %v854_v16 = vpop.permute.xlu2 %853 }
 0x947   :  { %1497 = vmatmul.msk.f32.vlgmr.msrb.gmra.mxu0 %vm91_vm0, %v854_v16 }
 0x966   :  { %v880_v27 = vpop.permute.xlu0 %879 }
 0x967   :  { %1498 = vmatmul.msk.f32.vlgmr.msrb.gmra.mxu1 %vm91_vm0, %v880_v27 }
 0x9c4   :  { %v874_v28 = vpop.f32.mrf.mxu0 }
 0x9c5   :  { %v877_v63 = vadd.f32 %v874_v28, %v1947_v45 }
 0x9c7   :  { %1590 = vtanh.f32 %v877_v63  ;;  %v1499_v40 = vmul.f32 -1.442695, %v877_v63 }
 0x9cd   :  { %v1591_v37 = vpop.eup %1590 }
 0x9ce   :  { %926 = vrot.lane.b32.xlu1 %v1591_v37, %s1655_s4 }
 0x9e4   :  { %v900_v38 = vpop.f32.mrf.mxu1 }
 0x9e5   :  { %v903_v39 = vadd.f32 %v900_v38, %v1945_v36 }
 0x9e7   :  { %1592 = vtanh.f32 %v903_v39  ;;  %v1500_v29 = vmul.f32 -1.442695, %v903_v39 }
 0x9e8   :  { %1594 = vpow2.f32 %v1499_v40 }
 0x9e9   :  { %1596 = vpow2.f32 %v1500_v29 }
 0x9ed   :  { %v1593_v23 = vpop.eup %1592 }
 0x9ee   :  { %963 = vrot.lane.b32.xlu2 %v1593_v23, %s1655_s4  ;;  %v1595_v32 = vpop.eup %1594 }
 0x9ef   :  { %v907_v13 = vadd.f32 1.0, %v1595_v32  ;;  %v1597_v34 = vpop.eup %1596 }
 0x9f0   :  { %v944_v45 = vadd.f32 1.0, %v1597_v34 }
 0x9f1   :  { %1598 = vrcp.f32 %v907_v13  ;;  %v919_v30 = vand.u32 2147483648, %v907_v13  ;;  %vm913_vm4 = vweird.f32 %v907_v13  ;;  %v917_v47 = vand.u32 2147483647, %v907_v13 }
 0x9f2   :  { %1600 = vrcp.f32 %v944_v45  ;;  %v956_v54 = vand.u32 2147483648, %v944_v45  ;;  %vm950_vm8 = vweird.f32 %v944_v45  ;;  %v954_v52 = vand.u32 2147483647, %v944_v45 }
 0x9f3   :  { %v920_v49 = vor.u32 1.1754944e-38, %v919_v30  ;;  %vm918_vm6 = vcmp.eq.f32.partialorder %v917_v47, 8.507059e+37 }
 0x9f4   :  { %v957_v56 = vor.u32 1.1754944e-38, %v956_v54  ;;  %vm955_vm10 = vcmp.eq.f32.partialorder %v954_v52, 8.507059e+37 }
 0x9f7   :  { %v1599_v42 = vpop.eup %1598 }
 0x9f8   :  { %v909_v31 = vmul.f32 %v1599_v42, %v907_v13  ;;  %v1601_v35 = vpop.eup %1600  ;;  %vm914_vm3 = vweird.f32 %v1599_v42 }
 0x9f9   :  { %v946_v36 = vmul.f32 %v1601_v35, %v944_v45  ;;  %vm915_vm5 = vmor %vm913_vm4, %vm914_vm3  ;;  %vm951_vm7 = vweird.f32 %v1601_v35 }
 0x9fa   :  { %v910_v33 = vsub.f32 1.0, %v909_v31  ;;  %vm952_vm9 = vmor %vm950_vm8, %vm951_vm7 }
 0x9fb   :  { %v947_v44 = vsub.f32 1.0, %v946_v36 }
 0x9fc   :  { %v911_v43 = vmul.f32 %v1599_v42, %v910_v33 }
 0x9fd   :  { %v948_v46 = vmul.f32 %v1601_v35, %v947_v44 }
 0x9fe   :  { %v912_v41 = vadd.f32 %v1599_v42, %v911_v43 }
 0x9ff   :  { %v949_v51 = vadd.f32 %v1601_v35, %v948_v46 }
 0xa00   :  { %v916_v48 = vsel %vm915_vm5, %v1599_v42, %v912_v41 }
 0xa01   :  { %v921_v1 = vsel %vm918_vm6, %v920_v49, %v916_v48  ;;  %v953_v55 = vsel %vm952_vm9, %v1601_v35, %v949_v51 }
 0xa02   :  { %v958_v58 = vsel %vm955_vm10, %v957_v56, %v953_v55  ;;  %v924_v62 = vmul.f32 %v921_v1, %v2052_v18 }
 0xa03   :  { %v961_v4 = vmul.f32 %v958_v58, %v2056_v10 }
 0xa40   :  { %v927_v21 = vpop.permute.xlu1 %926 }
 0xa41   :  { %v929_v50 = vmul.f32 %v927_v21, %v921_v1 }
 0xa43   :  { %931 = vrot.lane.b32.xlu0 %v929_v50, %s1654_s28 }
 0xa48   :  { %v964_v57 = vpop.permute.xlu2 %963 }
 0xa49   :  { %v966_v59 = vmul.f32 %v964_v57, %v958_v58 }
 0xa4b   :  { %968 = vrot.lane.b32.xlu1 %v966_v59, %s1654_s28 }
 0xab5   :  { %v932_v2 = vpop.permute.xlu0 %931 }
 0xab6   :  { %v2072_v3 = vadd.f32 %v932_v2, %v924_v62 }
 0xab8   :  { %1602 = vtanh.f32 %v2072_v3 }
 0xabd   :  { %v969_v6 = vpop.permute.xlu1 %968 }
 0xabe   :  { %v1603_v8 = vpop.eup %1602  ;;  %v2076_v9 = vadd.f32 %v969_v6, %v961_v4 }
 0xabf   :  { %937 = vrot.lane.b32.xlu2 %v1603_v8, %s1655_s4 }
 0xac0   :  { %1604 = vtanh.f32 %v2076_v9 }
 0xac6   :  { %v1605_v11 = vpop.eup %1604 }
 0xac7   :  { %974 = vrot.lane.b32.xlu0 %v1605_v11, %s1655_s4 }
 0xb19   :  { %v938_v15 = vpop.permute.xlu2 %937 }
 0xb1a   :  { %v940_v17 = vmul.f32 %v938_v15, %v921_v1 }
 0xb1c   :  { %979 = vrot.lane.b32.xlu1 %v940_v17, %s1654_s28 }
 0xb39   :  { %v975_v18 = vpop.permute.xlu0 %974 }
 0xb3a   :  { %v977_v60 = vmul.f32 %v975_v18, %v958_v58 }
 0xb3c   :  { %1005 = vrot.lane.b32.xlu2 %v977_v60, %s1654_s28 }
 0xb8e   :  { %v980_v19 = vpop.permute.xlu1 %979 }
 0xb8f   :  { %1501 = vmatmul.msk.f32.vlgmr.msrb.gmra.mxu2 %vm91_vm0, %v980_v19 }
 0xb96   :  { %v1006_v20 = vpop.permute.xlu2 %1005 }
 0xb97   :  { %1502 = vmatmul.msk.f32.vlgmr.msrb.gmra.mxu3 %vm91_vm0, %v1006_v20 }
 0xc12   :  { %v1000_v10 = vpop.f32.mrf.mxu2 }
 0xc13   :  { %v1003_v24 = vadd.f32 %v1000_v10, %v1952_v53 }
 0xc15   :  { %1606 = vtanh.f32 %v1003_v24  ;;  %v1503_v16 = vmul.f32 -1.442695, %v1003_v24 }
 0xc1a   :  { %v1026_v7 = vpop.f32.mrf.mxu3 }
 0xc1b   :  { %v1607_v0 = vpop.eup %1606  ;;  %v1029_v25 = vadd.f32 %v1026_v7, %v1940_v22 }
 0xc1c   :  { %1052 = vrot.lane.b32.xlu0 %v1607_v0, %s1655_s4 }
 0xc1d   :  { %1608 = vtanh.f32 %v1029_v25  ;;  %v1504_v27 = vmul.f32 -1.442695, %v1029_v25 }
 0xc1e   :  { %1610 = vpow2.f32 %v1503_v16 }
 0xc1f   :  { %1612 = vpow2.f32 %v1504_v27 }
 0xc23   :  { %v1609_v26 = vpop.eup %1608 }
 0xc24   :  { %1089 = vrot.lane.b32.xlu1 %v1609_v26, %s1655_s4  ;;  %v1611_v28 = vpop.eup %1610 }
 0xc25   :  { %v1033_v63 = vadd.f32 1.0, %v1611_v28  ;;  %v1613_v37 = vpop.eup %1612 }
 0xc26   :  { %v1070_v53 = vadd.f32 1.0, %v1613_v37 }
 0xc27   :  { %1614 = vrcp.f32 %v1033_v63  ;;  %v1045_v34 = vand.u32 2147483648, %v1033_v63  ;;  %vm1039_vm12 = vweird.f32 %v1033_v63  ;;  %v1043_v45 = vand.u32 2147483647, %v1033_v63 }
 0xc28   :  { %1616 = vrcp.f32 %v1070_v53  ;;  %v1082_v44 = vand.u32 2147483648, %v1070_v53  ;;  %vm1076_vm1 = vweird.f32 %v1070_v53  ;;  %v1080_v30 = vand.u32 2147483647, %v1070_v53 }
 0xc29   :  { %v1046_v33 = vor.u32 1.1754944e-38, %v1045_v34  ;;  %vm1044_vm14 = vcmp.eq.f32.partialorder %v1043_v45, 8.507059e+37 }
 0xc2a   :  { %v1083_v48 = vor.u32 1.1754944e-38, %v1082_v44  ;;  %vm1081_vm3 = vcmp.eq.f32.partialorder %v1080_v30, 8.507059e+37 }
 0xc2d   :  { %v1615_v38 = vpop.eup %1614 }
 0xc2e   :  { %v1035_v39 = vmul.f32 %v1615_v38, %v1033_v63  ;;  %v1617_v22 = vpop.eup %1616  ;;  %vm1040_vm11 = vweird.f32 %v1615_v38 }
 0xc2f   :  { %v1072_v29 = vmul.f32 %v1617_v22, %v1070_v53  ;;  %vm1041_vm13 = vmor %vm1039_vm12, %vm1040_vm11  ;;  %vm1077_vm15 = vweird.f32 %v1617_v22 }
 0xc30   :  { %v1036_v23 = vsub.f32 1.0, %v1035_v39  ;;  %vm1078_vm2 = vmor %vm1076_vm1, %vm1077_vm15 }
 0xc31   :  { %v1073_v13 = vsub.f32 1.0, %v1072_v29 }
 0xc32   :  { %v1037_v40 = vmul.f32 %v1615_v38, %v1036_v23 }
 0xc33   :  { %v1074_v31 = vmul.f32 %v1617_v22, %v1073_v13 }
 0xc34   :  { %v1038_v32 = vadd.f32 %v1615_v38, %v1037_v40 }
 0xc35   :  { %v1075_v41 = vadd.f32 %v1617_v22, %v1074_v31 }
 0xc36   :  { %v1042_v42 = vsel %vm1041_vm13, %v1615_v38, %v1038_v32 }
 0xc37   :  { %v1047_v35 = vsel %vm1044_vm14, %v1046_v33, %v1042_v42  ;;  %v1079_v47 = vsel %vm1078_vm2, %v1617_v22, %v1075_v41 }
 0xc38   :  { %v1084_v49 = vsel %vm1081_vm3, %v1083_v48, %v1079_v47  ;;  %v1050_v1 = vmul.f32 %v1047_v35, %v2072_v3 }
 0xc39   :  { %v1087_v52 = vmul.f32 %v1084_v49, %v2076_v9 }
 0xc8e   :  { %v1053_v43 = vpop.permute.xlu0 %1052 }
 0xc8f   :  { %v1055_v36 = vmul.f32 %v1053_v43, %v1047_v35 }
 0xc91   :  { %1057 = vrot.lane.b32.xlu2 %v1055_v36, %s1654_s28 }
 0xc96   :  { %v1090_v46 = vpop.permute.xlu1 %1089 }
 0xc97   :  { %v1092_v21 = vmul.f32 %v1090_v46, %v1084_v49 }
 0xc99   :  { %1094 = vrot.lane.b32.xlu0 %v1092_v21, %s1654_s28 }
 0xceb   :  { %v1058_v50 = vpop.permute.xlu2 %1057 }
 0xcec   :  { %v2092_v51 = vadd.f32 %v1058_v50, %v1050_v1 }
 0xcee   :  { %1618 = vtanh.f32 %v2092_v51 }
 0xcf4   :  { %v1619_v54 = vpop.eup %1618 }
 0xcf5   :  { %1063 = vrot.lane.b32.xlu1 %v1619_v54, %s1655_s4 }
 0xd0b   :  { %v1095_v55 = vpop.permute.xlu0 %1094 }
 0xd0c   :  { %v2097_v56 = vadd.f32 %v1095_v55, %v1087_v52 }
 0xd0e   :  { %1620 = vtanh.f32 %v2097_v56 }
 0xd14   :  { %v1621_v57 = vpop.eup %1620 }
 0xd15   :  { %1100 = vrot.lane.b32.xlu2 %v1621_v57, %s1655_s4 }
 0xd67   :  { %v1064_v58 = vpop.permute.xlu1 %1063 }
 0xd68   :  { %v1066_v59 = vmul.f32 %v1064_v58, %v1047_v35 }
 0xd6a   :  { %1105 = vrot.lane.b32.xlu0 %v1066_v59, %s1654_s28 }
 0xd6f   :  { %v1101_v62 = vpop.permute.xlu2 %1100 }
 0xd70   :  { %v1103_v2 = vmul.f32 %v1101_v62, %v1084_v49 }
 0xd72   :  { %1131 = vrot.lane.b32.xlu1 %v1103_v2, %s1654_s28 }
 0xddc   :  { %v1106_v3 = vpop.permute.xlu0 %1105 }
 0xddd   :  { %1505 = vmatmul.msk.f32.vlgmr.msra.gmra.mxu0 %vm91_vm0, %v1106_v3 }
 0xde4   :  { %v1132_v4 = vpop.permute.xlu1 %1131 }
 0xde5   :  { %1506 = vmatmul.msk.f32.vlgmr.msra.gmra.mxu1 %vm91_vm0, %v1132_v4 }
 0xe5a   :  { %v1126_v6 = vpop.f32.mrf.mxu0 }
 0xe5b   :  { %v1129_v8 = vadd.f32 %v1126_v6, %v1957_v61 }
 0xe5d   :  { %1622 = vtanh.f32 %v1129_v8  ;;  %v1507_v18 = vmul.f32 -1.442695, %v1129_v8 }
 0xe62   :  { %v1152_v9 = vpop.f32.mrf.mxu1 }
 0xe63   :  { %v1623_v11 = vpop.eup %1622  ;;  %v1155_v15 = vadd.f32 %v1152_v9, %v1935_v14 }
 0xe64   :  { %1178 = vrot.lane.b32.xlu2 %v1623_v11, %s1655_s4 }
 0xe65   :  { %1624 = vtanh.f32 %v1155_v15  ;;  %v1508_v61 = vmul.f32 -1.442695, %v1155_v15 }
 0xe66   :  { %1626 = vpow2.f32 %v1507_v18 }
 0xe6b   :  { %v1625_v17 = vpop.eup %1624 }
 0xe6c   :  { %1215 = vrot.lane.b32.xlu0 %v1625_v17, %s1655_s4  ;;  %v1627_v60 = vpop.eup %1626 }
 0xe6d   :  { %v1159_v19 = vadd.f32 1.0, %v1627_v60 }
 0xe6f   :  { %1628 = vrcp.f32 %v1159_v19  ;;  %v1171_v14 = vand.u32 2147483648, %v1159_v19  ;;  %vm1165_vm5 = vweird.f32 %v1159_v19  ;;  %v1169_v25 = vand.u32 2147483647, %v1159_v19 }
 0xe70   :  { %1630 = vpow2.f32 %v1508_v61 }
 0xe71   :  { %v1172_v27 = vor.u32 1.1754944e-38, %v1171_v14  ;;  %vm1170_vm7 = vcmp.eq.f32.partialorder %v1169_v25, 8.507059e+37 }
 0xe75   :  { %v1629_v20 = vpop.eup %1628 }
 0xe76   :  { %v1161_v10 = vmul.f32 %v1629_v20, %v1159_v19  ;;  %vm1166_vm4 = vweird.f32 %v1629_v20  ;;  %v1631_v26 = vpop.eup %1630 }
 0xe77   :  { %vm1167_vm6 = vmor %vm1165_vm5, %vm1166_vm4  ;;  %v1196_v28 = vadd.f32 1.0, %v1631_v26 }
 0xe78   :  { %v1162_v24 = vsub.f32 1.0, %v1161_v10 }
 0xe79   :  { %1632 = vrcp.f32 %v1196_v28  ;;  %v1208_v29 = vand.u32 2147483648, %v1196_v28  ;;  %vm1202_vm9 = vweird.f32 %v1196_v28  ;;  %v1206_v32 = vand.u32 2147483647, %v1196_v28 }
 0xe7a   :  { %v1163_v7 = vmul.f32 %v1629_v20, %v1162_v24 }
 0xe7b   :  { %v1209_v34 = vor.u32 1.1754944e-38, %v1208_v29  ;;  %vm1207_vm11 = vcmp.eq.f32.partialorder %v1206_v32, 8.507059e+37 }
 0xe7c   :  { %v1164_v0 = vadd.f32 %v1629_v20, %v1163_v7 }
 0xe7e   :  { %v1168_v16 = vsel %vm1167_vm6, %v1629_v20, %v1164_v0 }
 0xe7f   :  { %v1173_v37 = vsel %vm1170_vm7, %v1172_v27, %v1168_v16  ;;  %v1633_v38 = vpop.eup %1632 }
 0xe80   :  { %v1198_v39 = vmul.f32 %v1633_v38, %v1196_v28  ;;  %vm1203_vm8 = vweird.f32 %v1633_v38  ;;  %v1176_v33 = vmul.f32 %v1173_v37, %v2092_v51 }
 0xe81   :  { %vm1204_vm10 = vmor %vm1202_vm9, %vm1203_vm8 }
 0xe82   :  { %v1199_v23 = vsub.f32 1.0, %v1198_v39 }
 0xe84   :  { %v1200_v22 = vmul.f32 %v1633_v38, %v1199_v23 }
 0xe86   :  { %v1201_v40 = vadd.f32 %v1633_v38, %v1200_v22 }
 0xe88   :  { %v1205_v13 = vsel %vm1204_vm10, %v1633_v38, %v1201_v40 }
 0xe89   :  { %v1210_v45 = vsel %vm1207_vm11, %v1209_v34, %v1205_v13  ;;  %v1359_v34 = vld [vmem:[%s2178_s9 + $0x18] sm:$0xff] }
 0xe8a   :  { %v1213_v36 = vmul.f32 %v1210_v45, %v2097_v56  ;;  %1406 = vmatpush.msrb.mxu1 %v1359_v34 }
 0xebe   :  { %v1179_v63 = vpop.permute.xlu2 %1178 }
 0xebf   :  { %v1181_v53 = vmul.f32 %v1179_v63, %v1173_v37 }
 0xec1   :  { %1183 = vrot.lane.b32.xlu1 %v1181_v53, %s1654_s28 }
 0xede   :  { %v1216_v42 = vpop.permute.xlu0 %1215 }
 0xedf   :  { %v1218_v31 = vmul.f32 %v1216_v42, %v1210_v45  ;;  %v1357_v42 = vld [vmem:[%s2178_s9 + $0x8] sm:$0xff] }
 0xee1   :  { %1220 = vrot.lane.b32.xlu2 %v1218_v31, %s1654_s28  ;;  %v1356_v31 = vld [vmem:[%s2178_s9] sm:$0xff] }
 0xf33   :  { %v1184_v35 = vpop.permute.xlu1 %1183 }
 0xf34   :  { %v2112_v43 = vadd.f32 %v1184_v35, %v1176_v33 }
 0xf36   :  { %1634 = vtanh.f32 %v2112_v43 }
 0xf3b   :  { %v1221_v41 = vpop.permute.xlu2 %1220 }
 0xf3c   :  { %v1635_v44 = vpop.eup %1634  ;;  %v2116_v30 = vadd.f32 %v1221_v41, %v1213_v36  ;;  %v1362_v36 = vld [vmem:[%s2178_s9 + $0x30] sm:$0xff]  ;;  %v1361_v41 = vld [vmem:[%s2178_s9 + $0x28] sm:$0xff] }
 0xf3d   :  { %1189 = vrot.lane.b32.xlu0 %v1635_v44, %s1655_s4  ;;  %v1360_v44 = vld [vmem:[%s2178_s9 + $0x20] sm:$0xff] }
 0xf3e   :  { %1636 = vtanh.f32 %v2116_v30 }
 0xf44   :  { %v1637_v47 = vpop.eup %1636 }
 0xf45   :  { %1226 = vrot.lane.b32.xlu1 %v1637_v47, %s1655_s4 }
 0xfaf   :  { %v1190_v48 = vpop.permute.xlu0 %1189 }
 0xfb0   :  { %v1192_v46 = vmul.f32 %v1190_v48, %v1173_v37  ;;  %v1525_v48 = vld [vmem:[%s2179_s10] ss:$0 sm:$0xff] }
 0xfb2   :  { %1231 = vrot.lane.b32.xlu2 %v1192_v46, %s1654_s28 }
 0xfb7   :  { %v1227_v49 = vpop.permute.xlu1 %1226 }
 0xfb8   :  { %v1229_v21 = vmul.f32 %v1227_v49, %v1210_v45  ;;  %v1358_v45 = vld [vmem:[%s2178_s9 + $0x10] sm:$0xff] }
 0xfb9   :  { %1407 = vmatpush.msrb.mxu1 %v1358_v45 }
 0xfba   :  { %1257 = vrot.lane.b32.xlu0 %v1229_v21, %s1654_s28 }
 0xfbb   :  { %1408 = vmatpush.msrb.mxu1 %v1357_v42 }
 0xfbd   :  { %1409 = vmatpush.msrb.mxu1 %v1356_v31 }
0x100c   :  { %v1232_v1 = vpop.permute.xlu2 %1231 }
0x100d   :  { %1509 = vmatmul.msk.f32.vlgmr.msra.gmra.mxu2 %vm91_vm0, %v1232_v1 }
0x102c   :  { %v1258_v50 = vpop.permute.xlu0 %1257 }
0x102d   :  { %1510 = vmatmul.msk.f32.vlgmr.msra.gmra.mxu3 %vm91_vm0, %v1258_v50 }
0x1090   :  { %v1252_v51 = vpop.f32.mrf.mxu2 }
0x1091   :  { %v1255_v54 = vadd.f32 %v1252_v51, %v1962_v12 }
0x1093   :  { %1638 = vtanh.f32 %v1255_v54  ;;  %v1511_v58 = vmul.f32 -1.442695, %v1255_v54 }
0x1099   :  { %v1639_v52 = vpop.eup %1638 }
0x109a   :  { %1304 = vrot.lane.b32.xlu1 %v1639_v52, %s1655_s4 }
0x10b0   :  { %v1278_v55 = vpop.f32.mrf.mxu3 }
0x10b1   :  { %v1281_v56 = vadd.f32 %v1278_v55, %v1930_v5 }
0x10b3   :  { %1640 = vtanh.f32 %v1281_v56  ;;  %v1512_v59 = vmul.f32 -1.442695, %v1281_v56 }
0x10b4   :  { %1642 = vpow2.f32 %v1511_v58 }
0x10b5   :  { %1644 = vpow2.f32 %v1512_v59 }
0x10b9   :  { %v1641_v57 = vpop.eup %1640 }
0x10ba   :  { %1341 = vrot.lane.b32.xlu2 %v1641_v57, %s1655_s4  ;;  %v1643_v62 = vpop.eup %1642 }
0x10bb   :  { %v1285_v2 = vadd.f32 1.0, %v1643_v62  ;;  %v1645_v3 = vpop.eup %1644 }
0x10bc   :  { %v1322_v12 = vadd.f32 1.0, %v1645_v3 }
0x10bd   :  { %1646 = vrcp.f32 %v1285_v2  ;;  %v1297_v18 = vand.u32 2147483648, %v1285_v2  ;;  %vm1291_vm13 = vweird.f32 %v1285_v2  ;;  %v1295_v60 = vand.u32 2147483647, %v1285_v2 }
0x10be   :  { %1648 = vrcp.f32 %v1322_v12  ;;  %v1334_v14 = vand.u32 2147483648, %v1322_v12  ;;  %vm1328_vm2 = vweird.f32 %v1322_v12  ;;  %v1332_v25 = vand.u32 2147483647, %v1322_v12 }
0x10bf   :  { %v1298_v10 = vor.u32 1.1754944e-38, %v1297_v18  ;;  %vm1296_vm15 = vcmp.eq.f32.partialorder %v1295_v60, 8.507059e+37 }
0x10c0   :  { %v1335_v16 = vor.u32 1.1754944e-38, %v1334_v14  ;;  %vm1333_vm4 = vcmp.eq.f32.partialorder %v1332_v25, 8.507059e+37 }
0x10c3   :  { %v1647_v4 = vpop.eup %1646 }
0x10c4   :  { %v1287_v6 = vmul.f32 %v1647_v4, %v1285_v2  ;;  %v1649_v9 = vpop.eup %1648  ;;  %vm1292_vm12 = vweird.f32 %v1647_v4 }
0x10c5   :  { %v1324_v5 = vmul.f32 %v1649_v9, %v1322_v12  ;;  %vm1293_vm14 = vmor %vm1291_vm13, %vm1292_vm12  ;;  %vm1329_vm1 = vweird.f32 %v1649_v9 }
0x10c6   :  { %v1288_v8 = vsub.f32 1.0, %v1287_v6  ;;  %vm1330_vm3 = vmor %vm1328_vm2, %vm1329_vm1 }
0x10c7   :  { %v1325_v17 = vsub.f32 1.0, %v1324_v5 }
0x10c8   :  { %v1289_v11 = vmul.f32 %v1647_v4, %v1288_v8 }
0x10c9   :  { %v1326_v20 = vmul.f32 %v1649_v9, %v1325_v17 }
0x10ca   :  { %v1290_v15 = vadd.f32 %v1647_v4, %v1289_v11 }
0x10cb   :  { %v1327_v0 = vadd.f32 %v1649_v9, %v1326_v20 }
0x10cc   :  { %v1294_v19 = vsel %vm1293_vm14, %v1647_v4, %v1290_v15 }
0x10cd   :  { %v1299_v61 = vsel %vm1296_vm15, %v1298_v10, %v1294_v19  ;;  %v1331_v26 = vsel %vm1330_vm3, %v1649_v9, %v1327_v0 }
0x10ce   :  { %v1336_v28 = vsel %vm1333_vm4, %v1335_v16, %v1331_v26  ;;  %v1302_v37 = vmul.f32 %v1299_v61, %v2112_v43  ;;  %v1363_v43 = vld [vmem:[%s2178_s9 + $0x38] sm:$0xff] }
0x10cf   :  { %v1339_v39 = vmul.f32 %v1336_v28, %v2116_v30  ;;  %1381 = vmatpush.msrb.mxu0 %v1363_v43 }
0x10d1   :  { %1382 = vmatpush.msrb.mxu0 %v1362_v36 }
0x10d3   :  { %1383 = vmatpush.msrb.mxu0 %v1361_v41 }
0x10d5   :  { %1384 = vmatpush.msrb.mxu0 %v1360_v44 }
0x110c   :  { %v1305_v24 = vpop.permute.xlu1 %1304 }
0x110d   :  { %v1307_v7 = vmul.f32 %v1305_v24, %v1299_v61 }
0x110f   :  { %1309 = vrot.lane.b32.xlu0 %v1307_v7, %s1654_s28 }
0x1114   :  { %v1342_v27 = vpop.permute.xlu2 %1341 }
0x1115   :  { %v1344_v63 = vmul.f32 %v1342_v27, %v1336_v28 }
0x1117   :  { %1346 = vrot.lane.b32.xlu1 %v1344_v63, %s1654_s28 }
0x1181   :  { %v1310_v53 = vpop.permute.xlu0 %1309 }
0x1182   :  { %v1312_v38 = vadd.f32 %v1310_v53, %v1302_v37 }
0x1184   :  { %1650 = vtanh.f32 %v1312_v38 }
0x1189   :  { %v1347_v23 = vpop.permute.xlu1 %1346 }
0x118a   :  { %v1651_v22 = vpop.eup %1650  ;;  %v1349_v40 = vadd.f32 %v1347_v23, %v1339_v39 }
0x118b   :  { %1315 = vrot.lane.b32.xlu2 %v1651_v22, %s1655_s4 }
0x118c   :  { %1652 = vtanh.f32 %v1349_v40 }
0x1192   :  { %v1653_v29 = vpop.eup %1652 }
0x1193   :  { %1352 = vrot.lane.b32.xlu0 %v1653_v29, %s1655_s4 }
0x11e5   :  { %v1316_v32 = vpop.permute.xlu2 %1315 }
0x11e6   :  { %v1318_v13 = vmul.f32 %v1316_v32, %v1299_v61 }
0x11e8   :  { %1390 = vrot.lane.b32.xlu2 %v1318_v13, %s1654_s28 }
0x1205   :  { %v1353_v33 = vpop.permute.xlu0 %1352 }
0x1206   :  { %v1355_v35 = vmul.f32 %v1353_v33, %v1336_v28 }
0x1208   :  { %1365 = vrot.lane.b32.xlu1 %v1355_v35, %s1654_s28 }
0x1242   :  { %v1391_v30 = vpop.permute.xlu2 %1390 }
0x1243   :  { %1514 = vmatmul.msk.f32.vlgmr.msrb.gmra.mxu1 %vm91_vm0, %v1391_v30 }
0x127a   :  { %v1366_v47 = vpop.permute.xlu1 %1365 }
0x127b   :  { %1513 = vmatmul.msk.f32.vlgmr.msrb.gmra.mxu0 %vm91_vm0, %v1366_v47 }
0x12c0   :  { %v1411_v46 = vpop.f32.mrf.mxu1 }
0x12f8   :  { %v1386_v49 = vpop.f32.mrf.mxu0 }
0x12f9   :  { %v1412_v21 = vadd.f32 %v1411_v46, %v1386_v49 }
0x12fb   :  { %v1418_v1 = vadd.f32 %v1525_v48, %v1412_v21 }
0x12fd   :  { %1419 = vst [vmem:[%s2180_s11] sm:$0xff] %v1418_v1 }

// kernel: bert_lstm_forward.2
= control target key start
LH: loop header
LB: loop body
LE: loop exit
PB: predicated region body
PF: predicated region fallthrough
CT: control target
= control target key end

     0   :  { %vm1064_vm0 = vcmask 261120   ;;  %s2897_s21 = smov 32   ;;  %s4199_s1 = inlined_call_operand.vmem [shape: bf16[768,256], index: 1, kind: input, shape index: {}]   ;;  %s4200_s0 = inlined_call_operand.vmem [shape: f32[64,768], index: 0, kind: input, shape index: {}]   ;;  %s4201_s3 = inlined_call_operand.vmem [shape: f32[32,128], index: 3, kind: input, shape index: {}]   ;;  %s4202_s4 = inlined_call_operand.vmem [shape: f32[32,128], index: 4, kind: input, shape index: {}]   ;;  %s4203_s2 = inlined_call_operand.vmem [shape: f32[1,256], index: 2, kind: input, shape index: {}]   ;;  %s4204_s5 = inlined_call_operand.vmem [shape: f32[2,8,32], index: 5, kind: input, shape index: {}]   ;;  %s4205_s6 = inlined_call_operand.vmem [shape: f32[2,8,32], index: 6, kind: input, shape index: {}]   ;;  %s4206_s7 = inlined_call_operand.vmem [shape: f32[64,32], index: 7, kind: output, shape index: {0}]   ;;  %s4207_s8 = inlined_call_operand.vmem [shape: f32[64,32], index: 8, kind: output, shape index: {1}]  }
   0x1   :  { %v2294_v0 = vld [vmem:[%s4199_s1 + $0x70] sm:$0xf]  ;;  %v2683_v1 = vld [vmem:[%s4199_s1 + $0x74] sm:$0xf0]  ;;  %v2286_v11 = vld [vmem:[%s4199_s1 + $0x60] sm:$0xf] }
   0x2   :  { %v2358_v2 = vld [vmem:[%s4199_s1 + $0xf0] sm:$0xf]  ;;  %v2295_v3 = vor.u32 %v2683_v1, %v2294_v0  ;;  %v2699_v4 = vld [vmem:[%s4199_s1 + $0xf4] sm:$0xf0]  ;;  %v2681_v13 = vld [vmem:[%s4199_s1 + $0x64] sm:$0xf0] }
   0x3   :  { %v2422_v5 = vld [vmem:[%s4199_s1 + $0x170] sm:$0xf]  ;;  %v2715_v6 = vld [vmem:[%s4199_s1 + $0x174] sm:$0xf0]  ;;  %v2359_v7 = vor.u32 %v2699_v4, %v2358_v2  ;;  %v2350_v14 = vld [vmem:[%s4199_s1 + $0xe0] sm:$0xf]  ;;  %v2287_v16 = vor.u32 %v2681_v13, %v2286_v11 }
   0x4   :  { %v2423_v8 = vor.u32 %v2715_v6, %v2422_v5  ;;  %v2486_v9 = vld [vmem:[%s4199_s1 + $0x1f0] sm:$0xf]  ;;  %v2731_v10 = vld [vmem:[%s4199_s1 + $0x1f4] sm:$0xf0]  ;;  %682 = vmatpush.bf16.msra.mxu0 %v2295_v3  ;;  %v2697_v15 = vld [vmem:[%s4199_s1 + $0xe4] sm:$0xf0] }
   0x5   :  { %v2487_v12 = vor.u32 %v2731_v10, %v2486_v9  ;;  %711 = vmatpush.bf16.msra.mxu1 %v2359_v7  ;;  %v2351_v17 = vor.u32 %v2697_v15, %v2350_v14  ;;  %v2414_v18 = vld [vmem:[%s4199_s1 + $0x160] sm:$0xf]  ;;  %v2713_v19 = vld [vmem:[%s4199_s1 + $0x164] sm:$0xf0]  ;;  %v2278_v23 = vld [vmem:[%s4199_s1 + $0x50] sm:$0xf] }
   0x6   :  { %740 = vmatpush.bf16.msra.mxu2 %v2423_v8  ;;  %v2478_v20 = vld [vmem:[%s4199_s1 + $0x1e0] sm:$0xf]  ;;  %v2415_v21 = vor.u32 %v2713_v19, %v2414_v18  ;;  %v2729_v22 = vld [vmem:[%s4199_s1 + $0x1e4] sm:$0xf0]  ;;  %v2679_v24 = vld [vmem:[%s4199_s1 + $0x54] sm:$0xf0] }
   0x7   :  { %769 = vmatpush.bf16.msra.mxu3 %v2487_v12  ;;  %v2479_v25 = vor.u32 %v2729_v22, %v2478_v20  ;;  %v2342_v26 = vld [vmem:[%s4199_s1 + $0xd0] sm:$0xf]  ;;  %v2695_v27 = vld [vmem:[%s4199_s1 + $0xd4] sm:$0xf0]  ;;  %v2279_v29 = vor.u32 %v2679_v24, %v2278_v23  ;;  %v2270_v35 = vld [vmem:[%s4199_s1 + $0x40] sm:$0xf] }
   0x8   :  { %v2406_v28 = vld [vmem:[%s4199_s1 + $0x150] sm:$0xf]  ;;  %683 = vmatpush.bf16.msra.mxu0 %v2287_v16  ;;  %v2711_v30 = vld [vmem:[%s4199_s1 + $0x154] sm:$0xf0]  ;;  %v2343_v33 = vor.u32 %v2695_v27, %v2342_v26  ;;  %v2677_v36 = vld [vmem:[%s4199_s1 + $0x44] sm:$0xf0] }
   0x9   :  { %v2470_v31 = vld [vmem:[%s4199_s1 + $0x1d0] sm:$0xf]  ;;  %v2727_v32 = vld [vmem:[%s4199_s1 + $0x1d4] sm:$0xf0]  ;;  %712 = vmatpush.bf16.msra.mxu1 %v2351_v17  ;;  %v2407_v34 = vor.u32 %v2711_v30, %v2406_v28  ;;  %v2334_v37 = vld [vmem:[%s4199_s1 + $0xc0] sm:$0xf]  ;;  %v2271_v44 = vor.u32 %v2677_v36, %v2270_v35 }
   0xa   :  { %741 = vmatpush.bf16.msra.mxu2 %v2415_v21  ;;  %v2471_v38 = vor.u32 %v2727_v32, %v2470_v31  ;;  %v2693_v39 = vld [vmem:[%s4199_s1 + $0xc4] sm:$0xf0]  ;;  %v2398_v40 = vld [vmem:[%s4199_s1 + $0x140] sm:$0xf]  ;;  %v2262_v47 = vld [vmem:[%s4199_s1 + $0x30] sm:$0xf] }
   0xb   :  { %770 = vmatpush.bf16.msra.mxu3 %v2479_v25  ;;  %v2709_v41 = vld [vmem:[%s4199_s1 + $0x144] sm:$0xf0]  ;;  %v2462_v42 = vld [vmem:[%s4199_s1 + $0x1c0] sm:$0xf]  ;;  %v2335_v45 = vor.u32 %v2693_v39, %v2334_v37  ;;  %v2675_v48 = vld [vmem:[%s4199_s1 + $0x34] sm:$0xf0] }
   0xc   :  { %v2725_v43 = vld [vmem:[%s4199_s1 + $0x1c4] sm:$0xf0]  ;;  %684 = vmatpush.bf16.msra.mxu0 %v2279_v29  ;;  %v2399_v46 = vor.u32 %v2709_v41, %v2398_v40  ;;  %v2326_v49 = vld [vmem:[%s4199_s1 + $0xb0] sm:$0xf]  ;;  %v2691_v51 = vld [vmem:[%s4199_s1 + $0xb4] sm:$0xf0]  ;;  %v2263_v56 = vor.u32 %v2675_v48, %v2262_v47 }
   0xd   :  { %713 = vmatpush.bf16.msra.mxu1 %v2343_v33  ;;  %v2463_v50 = vor.u32 %v2725_v43, %v2462_v42  ;;  %v2390_v52 = vld [vmem:[%s4199_s1 + $0x130] sm:$0xf]  ;;  %v2707_v53 = vld [vmem:[%s4199_s1 + $0x134] sm:$0xf0]  ;;  %v2327_v57 = vor.u32 %v2691_v51, %v2326_v49  ;;  %v2254_v59 = vld [vmem:[%s4199_s1 + $0x20] sm:$0xf] }
   0xe   :  { %742 = vmatpush.bf16.msra.mxu2 %v2407_v34  ;;  %v2454_v54 = vld [vmem:[%s4199_s1 + $0x1b0] sm:$0xf]  ;;  %v2723_v55 = vld [vmem:[%s4199_s1 + $0x1b4] sm:$0xf0]  ;;  %v2391_v58 = vor.u32 %v2707_v53, %v2390_v52  ;;  %v2673_v60 = vld [vmem:[%s4199_s1 + $0x24] sm:$0xf0] }
   0xf   :  { %771 = vmatpush.bf16.msra.mxu3 %v2471_v38  ;;  %v2318_v61 = vld [vmem:[%s4199_s1 + $0xa0] sm:$0xf]  ;;  %v2455_v62 = vor.u32 %v2723_v55, %v2454_v54  ;;  %v2689_v63 = vld [vmem:[%s4199_s1 + $0xa4] sm:$0xf0]  ;;  %v2255_v4 = vor.u32 %v2673_v60, %v2254_v59  ;;  %v2246_v7 = vld [vmem:[%s4199_s1 + $0x10] sm:$0xf] }
  0x10   :  { %685 = vmatpush.bf16.msra.mxu0 %v2271_v44  ;;  %v2382_v0 = vld [vmem:[%s4199_s1 + $0x120] sm:$0xf]  ;;  %v2705_v1 = vld [vmem:[%s4199_s1 + $0x124] sm:$0xf0]  ;;  %v2319_v5 = vor.u32 %v2689_v63, %v2318_v61  ;;  %v2671_v8 = vld [vmem:[%s4199_s1 + $0x14] sm:$0xf0] }
  0x11   :  { %714 = vmatpush.bf16.msra.mxu1 %v2335_v45  ;;  %v2446_v2 = vld [vmem:[%s4199_s1 + $0x1a0] sm:$0xf]  ;;  %v2721_v3 = vld [vmem:[%s4199_s1 + $0x1a4] sm:$0xf0]  ;;  %v2383_v6 = vor.u32 %v2705_v1, %v2382_v0  ;;  %v2310_v9 = vld [vmem:[%s4199_s1 + $0x90] sm:$0xf]  ;;  %v2247_v17 = vor.u32 %v2671_v8, %v2246_v7 }
  0x12   :  { %743 = vmatpush.bf16.msra.mxu2 %v2399_v46  ;;  %v2447_v10 = vor.u32 %v2721_v3, %v2446_v2  ;;  %v2687_v11 = vld [vmem:[%s4199_s1 + $0x94] sm:$0xf0]  ;;  %v2374_v12 = vld [vmem:[%s4199_s1 + $0x110] sm:$0xf]  ;;  %v2238_v16 = vld [vmem:[%s4199_s1] sm:$0xf] }
  0x13   :  { %772 = vmatpush.bf16.msra.mxu3 %v2463_v50  ;;  %v2703_v13 = vld [vmem:[%s4199_s1 + $0x114] sm:$0xf0]  ;;  %v2438_v14 = vld [vmem:[%s4199_s1 + $0x190] sm:$0xf]  ;;  %v2669_v18 = vld [vmem:[%s4199_s1 + $0x4] sm:$0xf0]  ;;  %v2311_v21 = vor.u32 %v2687_v11, %v2310_v9 }
  0x14   :  { %686 = vmatpush.bf16.msra.mxu0 %v2263_v56  ;;  %v2719_v15 = vld [vmem:[%s4199_s1 + $0x194] sm:$0xf0]  ;;  %v2302_v19 = vld [vmem:[%s4199_s1 + $0x80] sm:$0xf]  ;;  %v2685_v20 = vld [vmem:[%s4199_s1 + $0x84] sm:$0xf0]  ;;  %v2375_v22 = vor.u32 %v2703_v13, %v2374_v12  ;;  %v2239_v34 = vor.u32 %v2669_v18, %v2238_v16 }
  0x15   :  { %715 = vmatpush.bf16.msra.mxu1 %v2327_v57  ;;  %v2366_v23 = vld [vmem:[%s4199_s1 + $0x100] sm:$0xf]  ;;  %v2701_v24 = vld [vmem:[%s4199_s1 + $0x104] sm:$0xf0]  ;;  %v2439_v26 = vor.u32 %v2719_v15, %v2438_v14  ;;  %v34_v29 = vld [vmem:[%s4200_s0 + $0x30] sm:$0xff]  ;;  %v2303_v38 = vor.u32 %v2685_v20, %v2302_v19 }
  0x16   :  { %744 = vmatpush.bf16.msra.mxu2 %v2391_v58  ;;  %v2430_v25 = vld [vmem:[%s4199_s1 + $0x180] sm:$0xf]  ;;  %v2717_v27 = vld [vmem:[%s4199_s1 + $0x184] sm:$0xf0]  ;;  %v35_v31 = vld [vmem:[%s4200_s0 + $0x38] sm:$0xff]  ;;  %v2367_v39 = vor.u32 %v2701_v24, %v2366_v23 }
  0x17   :  { %773 = vmatpush.bf16.msra.mxu3 %v2455_v62  ;;  %v28_v28 = vld [vmem:[%s4200_s0] sm:$0xff]  ;;  %v29_v30 = vld [vmem:[%s4200_s0 + $0x8] sm:$0xff]  ;;  %v2550_v32 = vld [vmem:[%s4199_s1 + $0x270] sm:$0xf]  ;;  %v2431_v43 = vor.u32 %v2717_v27, %v2430_v25 }
  0x18   :  { %687 = vmatpush.bf16.msra.mxu0 %v2255_v4  ;;  %v2747_v33 = vld [vmem:[%s4199_s1 + $0x274] sm:$0xf0]  ;;  %v30_v35 = vld [vmem:[%s4200_s0 + $0x10] sm:$0xff]  ;;  %v2296_v37 = vld [vmem:[%s4199_s1 + $0x78] sm:$0xf0]  ;;  %v3181_v48 = vpack.c.bf16 %v34_v29, %v28_v28  ;;  %v3192_v53 = vpack.c.bf16 %v35_v31, %v29_v30 }
  0x19   :  { %716 = vmatpush.bf16.msra.mxu1 %v2319_v5  ;;  %v2682_v36 = vld [vmem:[%s4199_s1 + $0x74] sm:$0xf]  ;;  %v36_v40 = vld [vmem:[%s4200_s0 + $0x40] sm:$0xff]  ;;  %v31_v41 = vld [vmem:[%s4200_s0 + $0x18] sm:$0xff]  ;;  %v2551_v44 = vor.u32 %v2747_v33, %v2550_v32 }
  0x1a   :  { %745 = vmatpush.bf16.msra.mxu2 %v2383_v6  ;;  %v37_v42 = vld [vmem:[%s4200_s0 + $0x48] sm:$0xff]  ;;  %v2542_v45 = vld [vmem:[%s4199_s1 + $0x260] sm:$0xf]  ;;  %v2614_v46 = vld [vmem:[%s4199_s1 + $0x2f0] sm:$0xf]  ;;  %v2299_v49 = vor.u32 %v2682_v36, %v2296_v37  ;;  %v3194_v54 = vpack.c.bf16 %v36_v40, %v30_v35 }
  0x1b   :  { %774 = vmatpush.bf16.msra.mxu3 %v2447_v10  ;;  %v2763_v47 = vld [vmem:[%s4199_s1 + $0x2f4] sm:$0xf0]  ;;  %v2745_v50 = vld [vmem:[%s4199_s1 + $0x264] sm:$0xf0]  ;;  %v2698_v51 = vld [vmem:[%s4199_s1 + $0xf4] sm:$0xf]  ;;  %v3202_v57 = vpack.c.bf16 %v37_v42, %v31_v41 }
  0x1c   :  { %688 = vmatpush.bf16.msra.mxu0 %v2247_v17  ;;  %v2360_v52 = vld [vmem:[%s4199_s1 + $0xf8] sm:$0xf0]  ;;  %v2680_v55 = vld [vmem:[%s4199_s1 + $0x64] sm:$0xf]  ;;  %v2288_v56 = vld [vmem:[%s4199_s1 + $0x68] sm:$0xf0]  ;;  %v2615_v58 = vor.u32 %v2763_v47, %v2614_v46  ;;  %v2543_v59 = vor.u32 %v2745_v50, %v2542_v45 }
  0x1d   :  { %717 = vmatpush.bf16.msra.mxu1 %v2311_v21  ;;  %v2363_v60 = vor.u32 %v2698_v51, %v2360_v52  ;;  %v2534_v61 = vld [vmem:[%s4199_s1 + $0x250] sm:$0xf]  ;;  %v2606_v62 = vld [vmem:[%s4199_s1 + $0x2e0] sm:$0xf]  ;;  %v2761_v63 = vld [vmem:[%s4199_s1 + $0x2e4] sm:$0xf0]  ;;  %v2291_v0 = vor.u32 %v2680_v55, %v2288_v56 }
  0x1e   :  { %746 = vmatpush.bf16.msra.mxu2 %v2375_v22  ;;  %v2743_v1 = vld [vmem:[%s4199_s1 + $0x254] sm:$0xf0]  ;;  %v2696_v2 = vld [vmem:[%s4199_s1 + $0xe4] sm:$0xf]  ;;  %v2352_v3 = vld [vmem:[%s4199_s1 + $0xe8] sm:$0xf0]  ;;  %v2607_v6 = vor.u32 %v2761_v63, %v2606_v62 }
  0x1f   :  { %775 = vmatpush.bf16.msra.mxu3 %v2439_v26  ;;  %v2678_v4 = vld [vmem:[%s4199_s1 + $0x54] sm:$0xf]  ;;  %v2280_v5 = vld [vmem:[%s4199_s1 + $0x58] sm:$0xf0]  ;;  %v2535_v7 = vor.u32 %v2743_v1, %v2534_v61  ;;  %v2355_v8 = vor.u32 %v2696_v2, %v2352_v3  ;;  %v2526_v9 = vld [vmem:[%s4199_s1 + $0x240] sm:$0xf] }
  0x20   :  { %689 = vmatpush.bf16.msra.mxu0 %v2239_v34  ;;  %v2598_v10 = vld [vmem:[%s4199_s1 + $0x2d0] sm:$0xf]  ;;  %v2759_v11 = vld [vmem:[%s4199_s1 + $0x2d4] sm:$0xf0]  ;;  %v2283_v12 = vor.u32 %v2678_v4, %v2280_v5  ;;  %v2741_v13 = vld [vmem:[%s4199_s1 + $0x244] sm:$0xf0] }
  0x21   :  { %718 = vmatpush.bf16.msra.mxu1 %v2303_v38  ;;  %v2694_v14 = vld [vmem:[%s4199_s1 + $0xd4] sm:$0xf]  ;;  %v2344_v15 = vld [vmem:[%s4199_s1 + $0xd8] sm:$0xf0]  ;;  %v2676_v16 = vld [vmem:[%s4199_s1 + $0x44] sm:$0xf]  ;;  %v2599_v18 = vor.u32 %v2759_v11, %v2598_v10  ;;  %v2527_v21 = vor.u32 %v2741_v13, %v2526_v9 }
  0x22   :  { %747 = vmatpush.bf16.msra.mxu2 %v2367_v39  ;;  %v2272_v17 = vld [vmem:[%s4199_s1 + $0x48] sm:$0xf0]  ;;  %v40_v19 = vld [vmem:[%s4200_s0 + $0x60] sm:$0xff]  ;;  %v46_v20 = vld [vmem:[%s4200_s0 + $0x90] sm:$0xff]  ;;  %v2347_v22 = vor.u32 %v2694_v14, %v2344_v15 }
  0x23   :  { %776 = vmatpush.bf16.msra.mxu3 %v2431_v43  ;;  %690 = vmatmul.bf16.vlgmr.msra.gmra.mxu0 %v3181_v48  ;;  %v2518_v23 = vld [vmem:[%s4199_s1 + $0x230] sm:$0xf]  ;;  %v2590_v24 = vld [vmem:[%s4199_s1 + $0x2c0] sm:$0xf]  ;;  %v2757_v25 = vld [vmem:[%s4199_s1 + $0x2c4] sm:$0xf0]  ;;  %v2275_v28 = vor.u32 %v2676_v16, %v2272_v17 }
  0x24   :  { %798 = vmatpush.bf16.msrb.mxu0 %v2551_v44  ;;  %719 = vmatmul.bf16.vlgmr.msra.gmra.mxu1 %v3192_v53  ;;  %v41_v26 = vld [vmem:[%s4200_s0 + $0x68] sm:$0xff]  ;;  %v47_v27 = vld [vmem:[%s4200_s0 + $0x98] sm:$0xff]  ;;  %v2692_v30 = vld [vmem:[%s4199_s1 + $0xc4] sm:$0xf]  ;;  %v2591_v38 = vor.u32 %v2757_v25, %v2590_v24  ;;  %v3313_v44 = vpack.c.bf16 %v46_v20, %v40_v19 }
  0x25   :  { %748 = vmatmul.bf16.vlgmr.msra.gmra.mxu2 %v3194_v54  ;;  %827 = vmatpush.bf16.msrb.mxu1 %v2615_v58  ;;  %v2739_v29 = vld [vmem:[%s4199_s1 + $0x234] sm:$0xf0]  ;;  %v2336_v31 = vld [vmem:[%s4199_s1 + $0xc8] sm:$0xf0]  ;;  %v42_v32 = vld [vmem:[%s4200_s0 + $0x70] sm:$0xff]  ;;  %v3324_v50 = vpack.c.bf16 %v47_v27, %v41_v26 }
  0x26   :  { %856 = vmatpush.bf16.msrb.mxu2 %v2299_v49  ;;  %777 = vmatmul.bf16.vlgmr.msra.gmra.mxu3 %v3202_v57  ;;  %v2674_v33 = vld [vmem:[%s4199_s1 + $0x34] sm:$0xf]  ;;  %v2264_v34 = vld [vmem:[%s4199_s1 + $0x38] sm:$0xf0]  ;;  %v48_v35 = vld [vmem:[%s4200_s0 + $0xa0] sm:$0xff]  ;;  %v2519_v39 = vor.u32 %v2739_v29, %v2518_v23  ;;  %v2339_v40 = vor.u32 %v2692_v30, %v2336_v31 }
  0x27   :  { %885 = vmatpush.bf16.msrb.mxu3 %v2363_v60  ;;  %v43_v36 = vld [vmem:[%s4200_s0 + $0x78] sm:$0xff]  ;;  %v49_v37 = vld [vmem:[%s4200_s0 + $0xa8] sm:$0xff]  ;;  %v2510_v41 = vld [vmem:[%s4199_s1 + $0x220] sm:$0xf]  ;;  %v2267_v45 = vor.u32 %v2674_v33, %v2264_v34  ;;  %v3326_v51 = vpack.c.bf16 %v48_v35, %v42_v32 }
  0x28   :  { %799 = vmatpush.bf16.msrb.mxu0 %v2543_v59  ;;  %v2582_v42 = vld [vmem:[%s4199_s1 + $0x2b0] sm:$0xf]  ;;  %v2755_v43 = vld [vmem:[%s4199_s1 + $0x2b4] sm:$0xf0]  ;;  %v2737_v46 = vld [vmem:[%s4199_s1 + $0x224] sm:$0xf0]  ;;  %v3334_v56 = vpack.c.bf16 %v49_v37, %v43_v36 }
  0x29   :  { %828 = vmatpush.bf16.msrb.mxu1 %v2607_v6  ;;  %v2690_v47 = vld [vmem:[%s4199_s1 + $0xb4] sm:$0xf]  ;;  %v2328_v49 = vld [vmem:[%s4199_s1 + $0xb8] sm:$0xf0]  ;;  %v2672_v52 = vld [vmem:[%s4199_s1 + $0x24] sm:$0xf]  ;;  %v2583_v58 = vor.u32 %v2755_v43, %v2582_v42  ;;  %v2511_v59 = vor.u32 %v2737_v46, %v2510_v41 }
  0x2a   :  { %857 = vmatpush.bf16.msrb.mxu2 %v2291_v0  ;;  %v2256_v55 = vld [vmem:[%s4199_s1 + $0x28] sm:$0xf0]  ;;  %v2331_v60 = vor.u32 %v2690_v47, %v2328_v49  ;;  %v2502_v62 = vld [vmem:[%s4199_s1 + $0x210] sm:$0xf]  ;;  %v2735_v63 = vld [vmem:[%s4199_s1 + $0x214] sm:$0xf0] }
  0x2b   :  { %886 = vmatpush.bf16.msrb.mxu3 %v2355_v8  ;;  %v2259_v61 = vor.u32 %v2672_v52, %v2256_v55  ;;  %v2574_v0 = vld [vmem:[%s4199_s1 + $0x2a0] sm:$0xf]  ;;  %v2503_v1 = vor.u32 %v2735_v63, %v2502_v62  ;;  %v2753_v2 = vld [vmem:[%s4199_s1 + $0x2a4] sm:$0xf0]  ;;  %v2688_v3 = vld [vmem:[%s4199_s1 + $0xa4] sm:$0xf] }
  0x2c   :  { %800 = vmatpush.bf16.msrb.mxu0 %v2535_v7  ;;  %v2320_v4 = vld [vmem:[%s4199_s1 + $0xa8] sm:$0xf0]  ;;  %v2575_v5 = vor.u32 %v2753_v2, %v2574_v0  ;;  %v2670_v7 = vld [vmem:[%s4199_s1 + $0x14] sm:$0xf]  ;;  %v2248_v8 = vld [vmem:[%s4199_s1 + $0x18] sm:$0xf0] }
  0x2d   :  { %829 = vmatpush.bf16.msrb.mxu1 %v2599_v18  ;;  %v2323_v6 = vor.u32 %v2688_v3, %v2320_v4  ;;  %v2494_v9 = vld [vmem:[%s4199_s1 + $0x200] sm:$0xf]  ;;  %v2251_v10 = vor.u32 %v2670_v7, %v2248_v8  ;;  %v2733_v11 = vld [vmem:[%s4199_s1 + $0x204] sm:$0xf0]  ;;  %v2751_v13 = vld [vmem:[%s4199_s1 + $0x294] sm:$0xf0] }
  0x2e   :  { %858 = vmatpush.bf16.msrb.mxu2 %v2283_v12  ;;  %v2566_v12 = vld [vmem:[%s4199_s1 + $0x290] sm:$0xf]  ;;  %v2686_v15 = vld [vmem:[%s4199_s1 + $0x94] sm:$0xf]  ;;  %v2312_v16 = vld [vmem:[%s4199_s1 + $0x98] sm:$0xf0]  ;;  %v2495_v18 = vor.u32 %v2733_v11, %v2494_v9 }
  0x2f   :  { %887 = vmatpush.bf16.msrb.mxu3 %v2347_v22  ;;  %v2567_v14 = vor.u32 %v2751_v13, %v2566_v12  ;;  %v2558_v17 = vld [vmem:[%s4199_s1 + $0x280] sm:$0xf]  ;;  %v2315_v19 = vor.u32 %v2686_v15, %v2312_v16  ;;  %v2749_v20 = vld [vmem:[%s4199_s1 + $0x284] sm:$0xf0]  ;;  %v2240_v22 = vld [vmem:[%s4199_s1 + $0x8] sm:$0xf0] }
  0x30   :  { %801 = vmatpush.bf16.msrb.mxu0 %v2527_v21  ;;  %v2668_v21 = vld [vmem:[%s4199_s1 + $0x4] sm:$0xf]  ;;  %v2304_v25 = vld [vmem:[%s4199_s1 + $0x88] sm:$0xf0]  ;;  %v58_v27 = vld [vmem:[%s4200_s0 + $0xf0] sm:$0xff]  ;;  %v2559_v32 = vor.u32 %v2749_v20, %v2558_v17 }
  0x31   :  { %830 = vmatpush.bf16.msrb.mxu1 %v2591_v38  ;;  %v2243_v23 = vor.u32 %v2668_v21, %v2240_v22  ;;  %v2684_v24 = vld [vmem:[%s4199_s1 + $0x84] sm:$0xf]  ;;  %v59_v29 = vld [vmem:[%s4200_s0 + $0xf8] sm:$0xff]  ;;  %v54_v30 = vld [vmem:[%s4200_s0 + $0xd0] sm:$0xff] }
  0x32   :  { %859 = vmatpush.bf16.msrb.mxu2 %v2275_v28  ;;  %v52_v26 = vld [vmem:[%s4200_s0 + $0xc0] sm:$0xff]  ;;  %v53_v28 = vld [vmem:[%s4200_s0 + $0xc8] sm:$0xff]  ;;  %v55_v33 = vld [vmem:[%s4200_s0 + $0xd8] sm:$0xff]  ;;  %v2307_v35 = vor.u32 %v2684_v24, %v2304_v25 }
  0x33   :  { %888 = vmatpush.bf16.msrb.mxu3 %v2339_v40  ;;  %695 = vmatmul.bf16.gmra.mxu0 %v3313_v44  ;;  %v60_v31 = vld [vmem:[%s4200_s0 + $0x100] sm:$0xff]  ;;  %v61_v34 = vld [vmem:[%s4200_s0 + $0x108] sm:$0xff]  ;;  %v3424_v36 = vpack.c.bf16 %v58_v27, %v52_v26  ;;  %v3426_v37 = vpack.c.bf16 %v59_v29, %v53_v28  ;;  %v2714_v40 = vld [vmem:[%s4199_s1 + $0x174] sm:$0xf] }
  0x34   :  { %802 = vmatpush.bf16.msrb.mxu0 %v2519_v39  ;;  %724 = vmatmul.bf16.gmra.mxu1 %v3324_v50  ;;  %v3428_v38 = vpack.c.bf16 %v60_v31, %v54_v30  ;;  %v3430_v39 = vpack.c.bf16 %v61_v34, %v55_v33  ;;  %v2424_v41 = vld [vmem:[%s4199_s1 + $0x178] sm:$0xf0]  ;;  %v2746_v42 = vld [vmem:[%s4199_s1 + $0x274] sm:$0xf]  ;;  %v2712_v46 = vld [vmem:[%s4199_s1 + $0x164] sm:$0xf] }
  0x35   :  { %753 = vmatmul.bf16.gmra.mxu2 %v3326_v51  ;;  %831 = vmatpush.bf16.msrb.mxu1 %v2583_v58  ;;  %v2427_v43 = vor.u32 %v2714_v40, %v2424_v41  ;;  %v2416_v47 = vld [vmem:[%s4199_s1 + $0x168] sm:$0xf0]  ;;  %v2730_v52 = vld [vmem:[%s4199_s1 + $0x1f4] sm:$0xf]  ;;  %v2488_v55 = vld [vmem:[%s4199_s1 + $0x1f8] sm:$0xf0] }
  0x36   :  { %860 = vmatpush.bf16.msrb.mxu2 %v2267_v45  ;;  %782 = vmatmul.bf16.gmra.mxu3 %v3334_v56  ;;  %v2552_v45 = vld [vmem:[%s4199_s1 + $0x278] sm:$0xf0]  ;;  %v2762_v58 = vld [vmem:[%s4199_s1 + $0x2f4] sm:$0xf]  ;;  %v2744_v62 = vld [vmem:[%s4199_s1 + $0x264] sm:$0xf] }
  0x37   :  { %889 = vmatpush.bf16.msrb.mxu3 %v2331_v60  ;;  %v2555_v49 = vor.u32 %v2746_v42, %v2552_v45  ;;  %v2491_v60 = vor.u32 %v2730_v52, %v2488_v55  ;;  %v2544_v63 = vld [vmem:[%s4199_s1 + $0x268] sm:$0xf0]  ;;  %v64_v2 = vld [vmem:[%s4200_s0 + $0x120] sm:$0xff]  ;;  %v70_v3 = vld [vmem:[%s4200_s0 + $0x150] sm:$0xff] }
  0x38   :  { %803 = vmatpush.bf16.msrb.mxu0 %v2511_v59  ;;  %v2419_v59 = vor.u32 %v2712_v46, %v2416_v47  ;;  %v65_v4 = vld [vmem:[%s4200_s0 + $0x128] sm:$0xff]  ;;  %v72_v7 = vld [vmem:[%s4200_s0 + $0x160] sm:$0xff]  ;;  %v67_v8 = vld [vmem:[%s4200_s0 + $0x138] sm:$0xff] }
  0x39   :  { %832 = vmatpush.bf16.msrb.mxu1 %v2575_v5  ;;  %v71_v5 = vld [vmem:[%s4200_s0 + $0x158] sm:$0xff]  ;;  %v73_v9 = vld [vmem:[%s4200_s0 + $0x168] sm:$0xff]  ;;  %v2728_v16 = vld [vmem:[%s4199_s1 + $0x1e4] sm:$0xf] }
  0x3a   :  { %861 = vmatpush.bf16.msrb.mxu2 %v2259_v61  ;;  %v2616_v61 = vld [vmem:[%s4199_s1 + $0x2f8] sm:$0xf0]  ;;  %v3498_v11 = vpack.c.bf16 %v71_v5, %v65_v4  ;;  %v3502_v13 = vpack.c.bf16 %v73_v9, %v67_v8  ;;  %v2608_v20 = vld [vmem:[%s4199_s1 + $0x2e8] sm:$0xf0]  ;;  %v2708_v25 = vld [vmem:[%s4199_s1 + $0x144] sm:$0xf] }
  0x3b   :  { %890 = vmatpush.bf16.msrb.mxu3 %v2323_v6  ;;  %v2619_v0 = vor.u32 %v2762_v58, %v2616_v61  ;;  %v66_v6 = vld [vmem:[%s4200_s0 + $0x130] sm:$0xff]  ;;  %v2408_v15 = vld [vmem:[%s4199_s1 + $0x158] sm:$0xf0]  ;;  %v2400_v27 = vld [vmem:[%s4199_s1 + $0x148] sm:$0xf0] }
  0x3c   :  { %804 = vmatpush.bf16.msrb.mxu0 %v2503_v1  ;;  %v2547_v1 = vor.u32 %v2744_v62, %v2544_v63  ;;  %v3500_v12 = vpack.c.bf16 %v72_v7, %v66_v6  ;;  %v2536_v24 = vld [vmem:[%s4199_s1 + $0x258] sm:$0xf0]  ;;  %v2726_v28 = vld [vmem:[%s4199_s1 + $0x1d4] sm:$0xf]  ;;  %v2403_v30 = vor.u32 %v2708_v25, %v2400_v27  ;;  %v2740_v34 = vld [vmem:[%s4199_s1 + $0x244] sm:$0xf] }
  0x3d   :  { %833 = vmatpush.bf16.msrb.mxu1 %v2567_v14  ;;  %v2710_v14 = vld [vmem:[%s4199_s1 + $0x154] sm:$0xf]  ;;  %v2472_v29 = vld [vmem:[%s4199_s1 + $0x1d8] sm:$0xf0]  ;;  %v2528_v40 = vld [vmem:[%s4199_s1 + $0x248] sm:$0xf0] }
  0x3e   :  { %862 = vmatpush.bf16.msrb.mxu2 %v2251_v10  ;;  %v3496_v10 = vpack.c.bf16 %v70_v3, %v64_v2  ;;  %v2411_v17 = vor.u32 %v2710_v14, %v2408_v15  ;;  %v2475_v31 = vor.u32 %v2726_v28, %v2472_v29  ;;  %v2600_v33 = vld [vmem:[%s4199_s1 + $0x2d8] sm:$0xf0]  ;;  %v2531_v41 = vor.u32 %v2740_v34, %v2528_v40  ;;  %v32_v42 = vld [vmem:[%s4200_s0 + $0x20] sm:$0xff]  ;;  %v33_v45 = vld [vmem:[%s4200_s0 + $0x28] sm:$0xff] }
  0x3f   :  { %891 = vmatpush.bf16.msrb.mxu3 %v2315_v19  ;;  %v2760_v19 = vld [vmem:[%s4199_s1 + $0x2e4] sm:$0xf]  ;;  %v39_v46 = vld [vmem:[%s4200_s0 + $0x58] sm:$0xff]  ;;  %v2706_v52 = vld [vmem:[%s4199_s1 + $0x134] sm:$0xf] }
  0x40   :  { %805 = vmatpush.bf16.msrb.mxu0 %v2495_v18  ;;  %v2480_v18 = vld [vmem:[%s4199_s1 + $0x1e8] sm:$0xf0]  ;;  %v2611_v22 = vor.u32 %v2760_v19, %v2608_v20  ;;  %v2392_v55 = vld [vmem:[%s4199_s1 + $0x138] sm:$0xf0]  ;;  %v2724_v58 = vld [vmem:[%s4199_s1 + $0x1c4] sm:$0xf] }
  0x41   :  { %834 = vmatpush.bf16.msrb.mxu1 %v2559_v32  ;;  %v2483_v21 = vor.u32 %v2728_v16, %v2480_v18  ;;  %v2758_v32 = vld [vmem:[%s4199_s1 + $0x2d4] sm:$0xf]  ;;  %v2384_v3 = vld [vmem:[%s4199_s1 + $0x128] sm:$0xf0]  ;;  %v2456_v5 = vld [vmem:[%s4199_s1 + $0x1b8] sm:$0xf0] }
  0x42   :  { %863 = vmatpush.bf16.msrb.mxu2 %v2243_v23  ;;  %v2742_v23 = vld [vmem:[%s4199_s1 + $0x254] sm:$0xf]  ;;  %v2584_v9 = vld [vmem:[%s4199_s1 + $0x2b8] sm:$0xf0]  ;;  %v2736_v14 = vld [vmem:[%s4199_s1 + $0x224] sm:$0xf] }
  0x43   :  { %892 = vmatpush.bf16.msrb.mxu3 %v2307_v35  ;;  %700 = vmatmul.bf16.gmra.mxu0 %v3424_v36  ;;  %v2539_v26 = vor.u32 %v2742_v23, %v2536_v24  ;;  %v2603_v35 = vor.u32 %v2758_v32, %v2600_v33  ;;  %v2738_v63 = vld [vmem:[%s4199_s1 + $0x234] sm:$0xf]  ;;  %v2512_v16 = vld [vmem:[%s4199_s1 + $0x228] sm:$0xf0]  ;;  %v44_v18 = vld [vmem:[%s4200_s0 + $0x80] sm:$0xff] }
  0x44   :  { %729 = vmatmul.bf16.gmra.mxu1 %v3426_v37  ;;  %914 = vmatpush.bf16.msra.mxu0 %v2427_v43  ;;  %v38_v43 = vld [vmem:[%s4200_s0 + $0x50] sm:$0xff]  ;;  %v45_v20 = vld [vmem:[%s4200_s0 + $0x88] sm:$0xff]  ;;  %v2376_v25 = vld [vmem:[%s4199_s1 + $0x118] sm:$0xf0] }
  0x45   :  { %758 = vmatmul.bf16.gmra.mxu2 %v3428_v38  ;;  %943 = vmatpush.bf16.msra.mxu1 %v2491_v60  ;;  %v3568_v47 = vpack.c.bf16 %v38_v43, %v32_v42  ;;  %v2464_v60 = vld [vmem:[%s4199_s1 + $0x1c8] sm:$0xf0]  ;;  %v2722_v4 = vld [vmem:[%s4199_s1 + $0x1b4] sm:$0xf]  ;;  %v2504_v32 = vld [vmem:[%s4199_s1 + $0x218] sm:$0xf0] }
  0x46   :  { %787 = vmatmul.bf16.gmra.mxu3 %v3430_v39  ;;  %972 = vmatpush.bf16.msra.mxu2 %v2555_v49  ;;  %v3570_v49 = vpack.c.bf16 %v39_v46, %v33_v45  ;;  %v2467_v61 = vor.u32 %v2724_v58, %v2464_v60  ;;  %v2459_v7 = vor.u32 %v2722_v4, %v2456_v5  ;;  %v2754_v8 = vld [vmem:[%s4199_s1 + $0x2b4] sm:$0xf]  ;;  %v2448_v28 = vld [vmem:[%s4199_s1 + $0x1a8] sm:$0xf0]  ;;  %v2700_v33 = vld [vmem:[%s4199_s1 + $0x104] sm:$0xf] }
  0x47   :  { %1001 = vmatpush.bf16.msra.mxu3 %v2619_v0  ;;  %v2520_v0 = vld [vmem:[%s4199_s1 + $0x238] sm:$0xf0]  ;;  %v2587_v15 = vor.u32 %v2754_v8, %v2584_v9  ;;  %v50_v19 = vld [vmem:[%s4200_s0 + $0xb0] sm:$0xff]  ;;  %v68_v8 = vld [vmem:[%s4200_s0 + $0x140] sm:$0xff] }
  0x48   :  { %915 = vmatpush.bf16.msra.mxu0 %v2419_v59  ;;  %v2395_v59 = vor.u32 %v2706_v52, %v2392_v55  ;;  %v2523_v2 = vor.u32 %v2738_v63, %v2520_v0  ;;  %v2702_v24 = vld [vmem:[%s4199_s1 + $0x114] sm:$0xf]  ;;  %v2568_v46 = vld [vmem:[%s4199_s1 + $0x298] sm:$0xf0]  ;;  %v56_v55 = vld [vmem:[%s4200_s0 + $0xe0] sm:$0xff] }
  0x49   :  { %944 = vmatpush.bf16.msra.mxu1 %v2483_v21  ;;  %v51_v21 = vld [vmem:[%s4200_s0 + $0xb8] sm:$0xff]  ;;  %v2379_v27 = vor.u32 %v2702_v24, %v2376_v25  ;;  %v2718_v40 = vld [vmem:[%s4199_s1 + $0x194] sm:$0xf] }
  0x4a   :  { %973 = vmatpush.bf16.msra.mxu2 %v2547_v1  ;;  %v2704_v1 = vld [vmem:[%s4199_s1 + $0x124] sm:$0xf]  ;;  %v3638_v23 = vpack.c.bf16 %v51_v21, %v45_v20  ;;  %v2750_v45 = vld [vmem:[%s4199_s1 + $0x294] sm:$0xf]  ;;  %v63_v60 = vld [vmem:[%s4200_s0 + $0x118] sm:$0xff] }
  0x4b   :  { %1002 = vmatpush.bf16.msra.mxu3 %v2611_v22  ;;  %v2387_v6 = vor.u32 %v2704_v1, %v2384_v3  ;;  %v3636_v22 = vpack.c.bf16 %v50_v19, %v44_v18  ;;  %v2571_v52 = vor.u32 %v2750_v45, %v2568_v46  ;;  %v62_v58 = vld [vmem:[%s4200_s0 + $0x110] sm:$0xff]  ;;  %v2496_v1 = vld [vmem:[%s4199_s1 + $0x208] sm:$0xf0]  ;;  %v75_v9 = vld [vmem:[%s4200_s0 + $0x178] sm:$0xff] }
  0x4c   :  { %916 = vmatpush.bf16.msra.mxu0 %v2411_v17  ;;  %v2515_v17 = vor.u32 %v2736_v14, %v2512_v16  ;;  %v2560_v3 = vld [vmem:[%s4199_s1 + $0x288] sm:$0xf0]  ;;  %v1062_v16 = vld [vmem:[%s4201_s3 + $0x10] sm:$0xff] }
  0x4d   :  { %945 = vmatpush.bf16.msra.mxu1 %v2475_v31  ;;  %v2734_v31 = vld [vmem:[%s4199_s1 + $0x214] sm:$0xf] }
  0x4e   :  { %974 = vmatpush.bf16.msra.mxu2 %v2539_v26  ;;  %v2720_v26 = vld [vmem:[%s4199_s1 + $0x1a4] sm:$0xf]  ;;  %v2507_v34 = vor.u32 %v2734_v31, %v2504_v32 }
  0x4f   :  { %1003 = vmatpush.bf16.msra.mxu3 %v2603_v35  ;;  %v2451_v29 = vor.u32 %v2720_v26, %v2448_v28  ;;  %v2368_v35 = vld [vmem:[%s4199_s1 + $0x108] sm:$0xf0]  ;;  %v1060_v26 = vld [vmem:[%s4201_s3] sm:$0xff] }
  0x50   :  { %917 = vmatpush.bf16.msra.mxu0 %v2403_v30  ;;  %v2371_v42 = vor.u32 %v2700_v33, %v2368_v35 }
  0x51   :  { %946 = vmatpush.bf16.msra.mxu1 %v2467_v61  ;;  %v2432_v61 = vld [vmem:[%s4199_s1 + $0x188] sm:$0xf0] }
  0x52   :  { %975 = vmatpush.bf16.msra.mxu2 %v2531_v41  ;;  %v2440_v41 = vld [vmem:[%s4199_s1 + $0x198] sm:$0xf0] }
  0x53   :  { %705 = vmatmul.bf16.gmra.mxu0 %v3496_v10  ;;  %v2443_v43 = vor.u32 %v2718_v40, %v2440_v41 }
  0x54   :  { %734 = vmatmul.bf16.gmra.mxu1 %v3498_v11  ;;  %918 = vmatpush.bf16.msra.mxu0 %v2395_v59  ;;  %v57_v59 = vld [vmem:[%s4200_s0 + $0xe8] sm:$0xff] }
  0x55   :  { %763 = vmatmul.bf16.gmra.mxu2 %v3500_v12  ;;  %947 = vmatpush.bf16.msra.mxu1 %v2459_v7  ;;  %v3709_v63 = vpack.c.bf16 %v63_v60, %v57_v59  ;;  %v3730_v7 = vld [vmem:[%s4202_s4 + $0x18] sm:$0xff] }
  0x56   :  { %792 = vmatmul.bf16.gmra.mxu3 %v3502_v13  ;;  %976 = vmatpush.bf16.msra.mxu2 %v2523_v2  ;;  %v2748_v2 = vld [vmem:[%s4199_s1 + $0x284] sm:$0xf] }
  0x57   :  { %v2563_v5 = vor.u32 %v2748_v2, %v2560_v3 }
  0x58   :  { %919 = vmatpush.bf16.msra.mxu0 %v2387_v6  ;;  %v1063_v6 = vld [vmem:[%s4201_s3 + $0x18] sm:$0xff] }
  0x59   :  { %948 = vmatpush.bf16.msra.mxu1 %v2451_v29 }
  0x5a   :  { %977 = vmatpush.bf16.msra.mxu2 %v2515_v17  ;;  %v1091_v17 = vld [vmem:[%s4202_s4 + $0x10] sm:$0xff] }
  0x5c   :  { %920 = vmatpush.bf16.msra.mxu0 %v2379_v27 }
  0x5d   :  { %949 = vmatpush.bf16.msra.mxu1 %v2443_v43 }
  0x5e   :  { %978 = vmatpush.bf16.msra.mxu2 %v2507_v34 }
  0x60   :  { %921 = vmatpush.bf16.msra.mxu0 %v2371_v42 }
  0x63   :  { %806 = vmatmul.bf16.vlgmr.msrb.gmra.mxu0 %v3568_v47 }
  0x64   :  { %835 = vmatmul.bf16.vlgmr.msrb.gmra.mxu1 %v3570_v49  ;;  %1080 = vmatpush.msrb.mxu0 %v1063_v6 }
  0x65   :  { %864 = vmatmul.bf16.vlgmr.msrb.gmra.mxu2 %v3181_v48  ;;  %v2756_v48 = vld [vmem:[%s4199_s1 + $0x2c4] sm:$0xf] }
  0x66   :  { %893 = vmatmul.bf16.vlgmr.msrb.gmra.mxu3 %v3192_v53  ;;  %v2592_v53 = vld [vmem:[%s4199_s1 + $0x2c8] sm:$0xf0]  ;;  %1081 = vmatpush.msrb.mxu0 %v1062_v16 }
  0x67   :  { %v2595_v62 = vor.u32 %v2756_v48, %v2592_v53  ;;  %v3698_v48 = vpack.c.bf16 %v62_v58, %v56_v55  ;;  %v2716_v53 = vld [vmem:[%s4199_s1 + $0x184] sm:$0xf] }
  0x68   :  { %v2435_v0 = vor.u32 %v2716_v53, %v2432_v61 }
  0x69   :  { %1004 = vmatpush.bf16.msra.mxu3 %v2595_v62  ;;  %v2732_v62 = vld [vmem:[%s4199_s1 + $0x204] sm:$0xf] }
  0x6a   :  { %v2499_v4 = vor.u32 %v2732_v62, %v2496_v1  ;;  %950 = vmatpush.bf16.msra.mxu1 %v2435_v0 }
  0x6c   :  { %979 = vmatpush.bf16.msra.mxu2 %v2499_v4 }
  0x6d   :  { %1005 = vmatpush.bf16.msra.mxu3 %v2587_v15 }
  0x6e   :  { %1108 = vmatpush.msrb.mxu1 %v3730_v7 }
  0x70   :  { %1236 = vmatpush.msrb.mxu2 %v1063_v6  ;;  %1109 = vmatpush.msrb.mxu1 %v1091_v17 }
  0x72   :  { %1237 = vmatpush.msrb.mxu2 %v1062_v16 }
  0x73   :  { %811 = vmatmul.bf16.gmra.mxu0 %v3636_v22 }
  0x74   :  { %840 = vmatmul.bf16.gmra.mxu1 %v3638_v23 }
  0x75   :  { %869 = vmatmul.bf16.gmra.mxu2 %v3313_v44  ;;  %v2752_v44 = vld [vmem:[%s4199_s1 + $0x2a4] sm:$0xf] }
  0x76   :  { %898 = vmatmul.bf16.gmra.mxu3 %v3324_v50  ;;  %v2576_v50 = vld [vmem:[%s4199_s1 + $0x2a8] sm:$0xf0] }
  0x77   :  { %v2579_v30 = vor.u32 %v2752_v44, %v2576_v50 }
  0x79   :  { %1006 = vmatpush.bf16.msra.mxu3 %v2579_v30 }
  0x7d   :  { %1007 = vmatpush.bf16.msra.mxu3 %v2571_v52 }
  0x81   :  { %1008 = vmatpush.bf16.msra.mxu3 %v2563_v5 }
  0x83   :  { %816 = vmatmul.bf16.gmra.mxu0 %v3698_v48 }
  0x84   :  { %845 = vmatmul.bf16.gmra.mxu1 %v3709_v63 }
  0x85   :  { %874 = vmatmul.bf16.gmra.mxu2 %v3424_v36  ;;  %v74_v36 = vld [vmem:[%s4200_s0 + $0x170] sm:$0xff]  ;;  %1263 = vmatpush.msrb.mxu3 %v3730_v7 }
  0x86   :  { %903 = vmatmul.bf16.gmra.mxu3 %v3426_v37  ;;  %v69_v37 = vld [vmem:[%s4200_s0 + $0x148] sm:$0xff]  ;;  %v3746_v14 = vpack.c.bf16 %v74_v36, %v68_v8 }
  0x87   :  { %v3748_v15 = vpack.c.bf16 %v75_v9, %v69_v37  ;;  %1264 = vmatpush.msrb.mxu3 %v1091_v17  ;;  %v1046_v9 = vld [vmem:[%s4204_s5] sm:$0xff] }
  0x93   :  { %821 = vmatmul.bf16.gmra.mxu0 %v3746_v14 }
  0x94   :  { %850 = vmatmul.bf16.gmra.mxu1 %v3748_v15 }
  0x95   :  { %879 = vmatmul.bf16.gmra.mxu2 %v3496_v10  ;;  %v1061_v10 = vld [vmem:[%s4201_s3 + $0x8] sm:$0xff] }
  0x96   :  { %908 = vmatmul.bf16.gmra.mxu3 %v3498_v11  ;;  %1082 = vmatpush.msrb.mxu0 %v1061_v10 }
  0x97   :  { %1238 = vmatpush.msrb.mxu2 %v1061_v10 }
  0x98   :  { %1083 = vmatpush.msrb.mxu0 %v1060_v26 }
  0x99   :  { %1239 = vmatpush.msrb.mxu2 %v1060_v26 }
  0xa0   :  { %v3760_v18 = vpop.f32.mrf.mxu0 }
  0xa1   :  { %v3762_v19 = vpop.f32.mrf.mxu1 }
  0xa3   :  { %922 = vmatmul.bf16.vlgmr.msra.gmra.mxu0 %v3194_v54  ;;  %v1090_v54 = vld [vmem:[%s4202_s4 + $0x8] sm:$0xff] }
  0xa4   :  { %951 = vmatmul.bf16.vlgmr.msra.gmra.mxu1 %v3202_v57  ;;  %1265 = vmatpush.msrb.mxu3 %v1090_v54 }
  0xa5   :  { %980 = vmatmul.bf16.vlgmr.msra.gmra.mxu2 %v3568_v47  ;;  %1110 = vmatpush.msrb.mxu1 %v1090_v54 }
  0xa6   :  { %1009 = vmatmul.bf16.vlgmr.msra.gmra.mxu3 %v3570_v49  ;;  %1384 = vmatpush.msra.mxu0 %v1063_v6 }
  0xa7   :  { %1532 = vmatpush.msra.mxu2 %v1063_v6 }
  0xa8   :  { %v3771_v11 = vpop.f32.mrf.mxu2  ;;  %v3775_v21 = vpop.f32.mrf.mxu0  ;;  %1385 = vmatpush.msra.mxu0 %v1062_v16 }
  0xa9   :  { %v3773_v20 = vpop.f32.mrf.mxu3  ;;  %v3777_v24 = vpop.f32.mrf.mxu1  ;;  %1533 = vmatpush.msra.mxu2 %v1062_v16 }
  0xaa   :  { %1386 = vmatpush.msra.mxu0 %v1061_v10 }
  0xab   :  { %1534 = vmatpush.msra.mxu2 %v1061_v10 }
  0xac   :  { %1387 = vmatpush.msra.mxu0 %v1060_v26 }
  0xad   :  { %1535 = vmatpush.msra.mxu2 %v1060_v26 }
  0xb0   :  { %v3782_v57 = vpop.f32.mrf.mxu2  ;;  %v3786_v49 = vpop.f32.mrf.mxu0 }
  0xb1   :  { %v3784_v47 = vpop.f32.mrf.mxu3  ;;  %v3788_v25 = vpop.f32.mrf.mxu1 }
  0xb3   :  { %927 = vmatmul.bf16.gmra.mxu0 %v3326_v51 }
  0xb4   :  { %956 = vmatmul.bf16.gmra.mxu1 %v3334_v56  ;;  %v1089_v56 = vld [vmem:[%s4202_s4] sm:$0xff] }
  0xb5   :  { %985 = vmatmul.bf16.gmra.mxu2 %v3636_v22  ;;  %v3811_v22 = vld [vmem:[%s4203_s2] sm:$0x3]  ;;  %1111 = vmatpush.msrb.mxu1 %v1089_v56 }
  0xb6   :  { %1014 = vmatmul.bf16.gmra.mxu3 %v3638_v23  ;;  %v3816_v23 = vperm.slane %v3811_v22, 0 }
  0xb7   :  { %1266 = vmatpush.msrb.mxu3 %v1089_v56  ;;  %1411 = vmatpush.msra.mxu1 %v3730_v7 }
  0xb8   :  { %v3797_v27 = vpop.f32.mrf.mxu2  ;;  %v3801_v44 = vpop.f32.mrf.mxu0  ;;  %v692_v53 = vadd.f32 %v3760_v18, %v3816_v23  ;;  %v694_v5 = vadd.f32 %v3775_v21, %v3816_v23  ;;  %v697_v21 = vadd.f32 %v3786_v49, %v3816_v23  ;;  %v2621_v49 = vld [vmem:[%s4205_s6 + $0x8] sm:$0xff] }
  0xb9   :  { %v3799_v28 = vpop.f32.mrf.mxu3  ;;  %v3803_v51 = vpop.f32.mrf.mxu1  ;;  %1559 = vmatpush.msra.mxu3 %v3730_v7  ;;  %1412 = vmatpush.msra.mxu1 %v1091_v17 }
  0xba   :  { %v721_v1 = vadd.f32 %v3762_v19, %v692_v53 }
  0xbb   :  { %1560 = vmatpush.msra.mxu3 %v1091_v17  ;;  %1413 = vmatpush.msra.mxu1 %v1090_v54  ;;  %v2620_v17 = vld [vmem:[%s4204_s5 + $0x8] sm:$0xff] }
  0xbd   :  { %1561 = vmatpush.msra.mxu3 %v1090_v54  ;;  %1414 = vmatpush.msra.mxu1 %v1089_v56 }
  0xbf   :  { %1562 = vmatpush.msra.mxu3 %v1089_v56 }
  0xc0   :  { %v3818_v50 = vpop.f32.mrf.mxu2  ;;  %v701_v30 = vpop.f32.mrf.mxu0 }
  0xc1   :  { %v3820_v29 = vpop.f32.mrf.mxu3  ;;  %v702_v31 = vadd.f32 %v701_v30, %v3816_v23  ;;  %v730_v32 = vpop.f32.mrf.mxu1  ;;  %v726_v30 = vadd.f32 %v3788_v25, %v697_v21 }
  0xc3   :  { %v731_v33 = vadd.f32 %v730_v32, %v702_v31  ;;  %932 = vmatmul.bf16.gmra.mxu0 %v3428_v38 }
  0xc4   :  { %961 = vmatmul.bf16.gmra.mxu1 %v3430_v39 }
  0xc5   :  { %990 = vmatmul.bf16.gmra.mxu2 %v3698_v48 }
  0xc6   :  { %1019 = vmatmul.bf16.gmra.mxu3 %v3709_v63 }
  0xc8   :  { %v759_v34 = vpop.f32.mrf.mxu2  ;;  %v703_v41 = vpop.f32.mrf.mxu0 }
  0xc9   :  { %v760_v35 = vadd.f32 %v759_v34, %v731_v33  ;;  %v788_v40 = vpop.f32.mrf.mxu3  ;;  %v704_v42 = vadd.f32 %v703_v41, %v3816_v23  ;;  %v732_v43 = vpop.f32.mrf.mxu1 }
  0xcb   :  { %v3828_v45 = vadd.f32 %v788_v40, %v760_v35  ;;  %v733_v46 = vadd.f32 %v732_v43, %v704_v42 }
  0xd0   :  { %v761_v52 = vpop.f32.mrf.mxu2  ;;  %v706_v58 = vpop.f32.mrf.mxu0 }
  0xd1   :  { %v762_v38 = vadd.f32 %v761_v52, %v733_v46  ;;  %v790_v55 = vpop.f32.mrf.mxu3  ;;  %v707_v39 = vadd.f32 %v706_v58, %v3816_v23  ;;  %v735_v59 = vpop.f32.mrf.mxu1 }
  0xd3   :  { %v3831_v60 = vadd.f32 %v790_v55, %v762_v38  ;;  %v736_v48 = vadd.f32 %v735_v59, %v707_v39  ;;  %937 = vmatmul.bf16.gmra.mxu0 %v3500_v12  ;;  %v750_v12 = vadd.f32 %v3771_v11, %v721_v1  ;;  %v1047_v11 = vld [vmem:[%s4205_s6] sm:$0xff]  ;;  %s2898_s6 = smov 64  }
  0xd4   :  { %966 = vmatmul.bf16.gmra.mxu1 %v3502_v13  ;;  %1138 = vrot.lane.b32.xlu1 %v1047_v11, %s2897_s21 }
  0xd5   :  { %995 = vmatmul.bf16.gmra.mxu2 %v3746_v14  ;;  %v779_v6 = vadd.f32 %v3773_v20, %v750_v12  ;;  %v723_v14 = vadd.f32 %v3777_v24, %v694_v5  ;;  %v3865_v20 = vperm.slane %v3811_v22, 1  ;;  %v755_v22 = vadd.f32 %v3797_v27, %v726_v30 }
  0xd6   :  { %1024 = vmatmul.bf16.gmra.mxu3 %v3748_v15 }
  0xd7   :  { %v752_v19 = vadd.f32 %v3782_v57, %v723_v14  ;;  %v784_v35 = vadd.f32 %v3799_v28, %v755_v22 }
  0xd8   :  { %v764_v61 = vpop.f32.mrf.mxu2  ;;  %v708_v0 = vpop.f32.mrf.mxu0 }
  0xd9   :  { %v765_v62 = vadd.f32 %v764_v61, %v736_v48  ;;  %v793_v63 = vpop.f32.mrf.mxu3  ;;  %v709_v2 = vadd.f32 %v708_v0, %v3816_v23  ;;  %v737_v3 = vpop.f32.mrf.mxu1  ;;  %v781_v24 = vadd.f32 %v3784_v47, %v752_v19  ;;  %v699_v47 = vadd.f32 %v3801_v44, %v3816_v23 }
  0xdb   :  { %v3841_v4 = vadd.f32 %v793_v63, %v765_v62  ;;  %v738_v13 = vadd.f32 %v737_v3, %v709_v2  ;;  %v728_v27 = vadd.f32 %v3803_v51, %v699_v47 }
  0xdc   :  { %1179 = vrot.lane.b32.xlu1 %v2621_v49, %s2897_s21 }
  0xdd   :  { %v757_v38 = vadd.f32 %v3818_v50, %v728_v27 }
  0xdf   :  { %v786_v58 = vadd.f32 %v3820_v29, %v757_v38 }
  0xe0   :  { %v766_v7 = vpop.f32.mrf.mxu2  ;;  %v807_v37 = vpop.f32.mrf.mxu0 }
  0xe1   :  { %v767_v8 = vadd.f32 %v766_v7, %v738_v13  ;;  %v795_v36 = vpop.f32.mrf.mxu3  ;;  %v808_v15 = vadd.f32 %v807_v37, %v779_v6  ;;  %v836_v16 = vpop.f32.mrf.mxu1 }
  0xe3   :  { %v3854_v18 = vadd.f32 %v795_v36, %v767_v8  ;;  %v3857_v10 = vadd.f32 %v836_v16, %v808_v15  ;;  %2622 = vmatmul.msk.f32.vlgmr.msrb.gmra.mxu0 %vm1064_vm0, %v1046_v9 }
  0xe4   :  { %2623 = vmatmul.msk.f32.vlgmr.msrb.gmra.mxu1 %vm1064_vm0, %v2620_v17 }
  0xe8   :  { %v865_v54 = vpop.f32.mrf.mxu2  ;;  %v809_v56 = vpop.f32.mrf.mxu0 }
  0xe9   :  { %v866_v57 = vadd.f32 %v865_v54, %v3865_v20  ;;  %v894_v26 = vpop.f32.mrf.mxu3  ;;  %v810_v31 = vadd.f32 %v809_v56, %v781_v24  ;;  %v838_v32 = vpop.f32.mrf.mxu1 }
  0xeb   :  { %v895_v33 = vadd.f32 %v894_v26, %v866_v57  ;;  %v3874_v34 = vadd.f32 %v838_v32, %v810_v31 }
  0xf0   :  { %v867_v40 = vpop.f32.mrf.mxu2  ;;  %v812_v42 = vpop.f32.mrf.mxu0 }
  0xf1   :  { %v868_v25 = vadd.f32 %v867_v40, %v3865_v20  ;;  %v896_v41 = vpop.f32.mrf.mxu3  ;;  %v813_v43 = vadd.f32 %v812_v42, %v784_v35  ;;  %v841_v46 = vpop.f32.mrf.mxu1 }
  0xf3   :  { %v897_v52 = vadd.f32 %v896_v41, %v868_v25  ;;  %v3886_v55 = vadd.f32 %v841_v46, %v813_v43 }
  0xf8   :  { %v870_v39 = vpop.f32.mrf.mxu2  ;;  %v814_v23 = vpop.f32.mrf.mxu0 }
  0xf9   :  { %v871_v44 = vadd.f32 %v870_v39, %v3865_v20  ;;  %v899_v28 = vpop.f32.mrf.mxu3  ;;  %v815_v59 = vadd.f32 %v814_v23, %v786_v58  ;;  %v843_v48 = vpop.f32.mrf.mxu1 }
  0xfb   :  { %v900_v53 = vadd.f32 %v899_v28, %v871_v44  ;;  %v3890_v61 = vadd.f32 %v843_v48, %v815_v59 }
 0x100   :  { %v872_v51 = vpop.f32.mrf.mxu2  ;;  %v817_v0 = vpop.f32.mrf.mxu0 }
 0x101   :  { %v873_v62 = vadd.f32 %v872_v51, %v3865_v20  ;;  %v901_v63 = vpop.f32.mrf.mxu3  ;;  %v818_v50 = vadd.f32 %v817_v0, %v3828_v45  ;;  %v846_v1 = vpop.f32.mrf.mxu1 }
 0x103   :  { %v902_v2 = vadd.f32 %v901_v63, %v873_v62  ;;  %v3894_v29 = vadd.f32 %v846_v1, %v818_v50 }
 0x108   :  { %v875_v3 = vpop.f32.mrf.mxu2  ;;  %v819_v5 = vpop.f32.mrf.mxu0 }
 0x109   :  { %v876_v12 = vadd.f32 %v875_v3, %v3865_v20  ;;  %v904_v13 = vpop.f32.mrf.mxu3  ;;  %v820_v6 = vadd.f32 %v819_v5, %v3831_v60  ;;  %v848_v7 = vpop.f32.mrf.mxu1 }
 0x10b   :  { %v905_v8 = vadd.f32 %v904_v13, %v876_v12  ;;  %v3898_v36 = vadd.f32 %v848_v7, %v820_v6 }
 0x110   :  { %v877_v37 = vpop.f32.mrf.mxu2  ;;  %v822_v45 = vpop.f32.mrf.mxu0 }
 0x111   :  { %v878_v9 = vadd.f32 %v877_v37, %v3865_v20  ;;  %v906_v14 = vpop.f32.mrf.mxu3  ;;  %v823_v15 = vadd.f32 %v822_v45, %v3841_v4  ;;  %v851_v16 = vpop.f32.mrf.mxu1 }
 0x113   :  { %v907_v17 = vadd.f32 %v906_v14, %v878_v9  ;;  %v3902_v19 = vadd.f32 %v851_v16, %v823_v15 }
 0x118   :  { %v880_v11 = vpop.f32.mrf.mxu2  ;;  %v824_v60 = vpop.f32.mrf.mxu0 }
 0x119   :  { %v881_v21 = vadd.f32 %v880_v11, %v3865_v20  ;;  %v909_v24 = vpop.f32.mrf.mxu3  ;;  %v825_v54 = vadd.f32 %v824_v60, %v3854_v18  ;;  %v853_v57 = vpop.f32.mrf.mxu1 }
 0x11b   :  { %v910_v26 = vadd.f32 %v909_v24, %v881_v21  ;;  %v3906_v56 = vadd.f32 %v853_v57, %v825_v54 }
 0x120   :  { %v882_v30 = vpop.f32.mrf.mxu2  ;;  %v923_v32 = vpop.f32.mrf.mxu0 }
 0x121   :  { %v911_v31 = vpop.f32.mrf.mxu3  ;;  %v924_v22 = vadd.f32 %v923_v32, %v895_v33  ;;  %v952_v4 = vpop.f32.mrf.mxu1 }
 0x123   :  { %v953_v49 = vadd.f32 %v952_v4, %v924_v22  ;;  %v883_v22 = vadd.f32 %v882_v30, %v3865_v20 }
 0x128   :  { %v981_v47 = vpop.f32.mrf.mxu2  ;;  %v925_v25 = vpop.f32.mrf.mxu0 }
 0x129   :  { %v982_v35 = vadd.f32 %v981_v47, %v953_v49  ;;  %v1010_v40 = vpop.f32.mrf.mxu3  ;;  %v926_v41 = vadd.f32 %v925_v25, %v897_v52  ;;  %v954_v42 = vpop.f32.mrf.mxu1  ;;  %v912_v49 = vadd.f32 %v911_v31, %v883_v22 }
 0x12b   :  { %v3908_v27 = vadd.f32 %v1010_v40, %v982_v35  ;;  %v955_v43 = vadd.f32 %v954_v42, %v926_v41 }
 0x130   :  { %v983_v18 = vpop.f32.mrf.mxu2  ;;  %v928_v58 = vpop.f32.mrf.mxu0 }
 0x131   :  { %v984_v46 = vadd.f32 %v983_v18, %v955_v43  ;;  %v1012_v38 = vpop.f32.mrf.mxu3  ;;  %v929_v39 = vadd.f32 %v928_v58, %v900_v53  ;;  %v957_v44 = vpop.f32.mrf.mxu1 }
 0x133   :  { %v3910_v28 = vadd.f32 %v1012_v38, %v984_v46  ;;  %v958_v33 = vadd.f32 %v957_v44, %v929_v39 }
 0x138   :  { %v986_v23 = vpop.f32.mrf.mxu2  ;;  %v930_v51 = vpop.f32.mrf.mxu0 }
 0x139   :  { %v987_v59 = vadd.f32 %v986_v23, %v958_v33  ;;  %v1015_v48 = vpop.f32.mrf.mxu3  ;;  %v931_v62 = vadd.f32 %v930_v51, %v902_v2  ;;  %v959_v63 = vpop.f32.mrf.mxu1 }
 0x13b   :  { %v3912_v52 = vadd.f32 %v1015_v48, %v987_v59  ;;  %v960_v0 = vadd.f32 %v959_v63, %v931_v62 }
 0x140   :  { %v988_v50 = vpop.f32.mrf.mxu2  ;;  %v933_v12 = vpop.f32.mrf.mxu0 }
 0x141   :  { %v989_v1 = vadd.f32 %v988_v50, %v960_v0  ;;  %v1017_v3 = vpop.f32.mrf.mxu3  ;;  %v934_v13 = vadd.f32 %v933_v12, %v905_v8  ;;  %v962_v5 = vpop.f32.mrf.mxu1 }
 0x143   :  { %v3914_v53 = vadd.f32 %v1017_v3, %v989_v1  ;;  %v963_v6 = vadd.f32 %v962_v5, %v934_v13 }
 0x148   :  { %v991_v7 = vpop.f32.mrf.mxu2  ;;  %v935_v14 = vpop.f32.mrf.mxu0 }
 0x149   :  { %v992_v37 = vadd.f32 %v991_v7, %v963_v6  ;;  %v1020_v9 = vpop.f32.mrf.mxu3  ;;  %v936_v45 = vadd.f32 %v935_v14, %v907_v17  ;;  %v964_v15 = vpop.f32.mrf.mxu1 }
 0x14b   :  { %v3916_v2 = vadd.f32 %v1020_v9, %v992_v37  ;;  %v965_v16 = vadd.f32 %v964_v15, %v936_v45 }
 0x150   :  { %v993_v11 = vpop.f32.mrf.mxu2  ;;  %v938_v60 = vpop.f32.mrf.mxu0 }
 0x151   :  { %v994_v21 = vadd.f32 %v993_v11, %v965_v16  ;;  %v1022_v24 = vpop.f32.mrf.mxu3  ;;  %v939_v54 = vadd.f32 %v938_v60, %v910_v26  ;;  %v967_v8 = vpop.f32.mrf.mxu1 }
 0x153   :  { %v3918_v57 = vadd.f32 %v1022_v24, %v994_v21  ;;  %v968_v32 = vadd.f32 %v967_v8, %v939_v54 }
 0x158   :  { %v996_v4 = vpop.f32.mrf.mxu2  ;;  %v940_v17 = vpop.f32.mrf.mxu0 }
 0x159   :  { %v997_v47 = vadd.f32 %v996_v4, %v968_v32  ;;  %v1025_v35 = vpop.f32.mrf.mxu3  ;;  %v941_v25 = vadd.f32 %v940_v17, %v912_v49  ;;  %v969_v41 = vpop.f32.mrf.mxu1 }
 0x15a   :  { %v1139_v32 = vpop.permute.xlu1 %1138 }
 0x15b   :  { %v3921_v40 = vadd.f32 %v1025_v35, %v997_v47  ;;  %v970_v42 = vadd.f32 %v969_v41, %v941_v25 }
 0x160   :  { %v998_v43 = vpop.f32.mrf.mxu2  ;;  %v1085_v46 = vpop.f32.mrf.mxu0 }
 0x161   :  { %v999_v18 = vadd.f32 %v998_v43, %v970_v42  ;;  %v1088_v26 = vadd.f32 %v1085_v46, %v3857_v10  ;;  %v1027_v38 = vpop.f32.mrf.mxu3  ;;  %v1113_v39 = vpop.f32.mrf.mxu1 }
 0x162   :  { %v1180_v47 = vpop.permute.xlu1 %1179 }
 0x163   :  { %v1028_v58 = vadd.f32 %v1027_v38, %v999_v18  ;;  %2766 = vtanh.f32 %v1088_v26  ;;  %v2624_v44 = vmul.f32 -1.442695, %v1088_v26 }
 0x165   :  { %v1116_v20 = vadd.f32 %v1113_v39, %v1028_v58 }
 0x167   :  { %2768 = vtanh.f32 %v1116_v20  ;;  %v2625_v33 = vmul.f32 -1.442695, %v1116_v20 }
 0x168   :  { %2770 = vpow2.f32 %v2624_v44 }
 0x169   :  { %v2767_v30 = vpop.eup %2766  ;;  %2772 = vpow2.f32 %v2625_v33 }
 0x16a   :  { %1143 = vrot.lane.b32.xlu0 %v2767_v30, %s2898_s6 }
 0x16d   :  { %v2769_v31 = vpop.eup %2768 }
 0x16e   :  { %v2771_v23 = vpop.eup %2770 }
 0x16f   :  { %v1120_v59 = vadd.f32 1.0, %v2771_v23  ;;  %v2773_v10 = vpop.eup %2772 }
 0x170   :  { %v1161_v48 = vadd.f32 1.0, %v2773_v10 }
 0x171   :  { %2774 = vrcp.f32 %v1120_v59  ;;  %v1132_v13 = vand.u32 2147483648, %v1120_v59  ;;  %vm1126_vm2 = vweird.f32 %v1120_v59  ;;  %v1130_v5 = vand.u32 2147483647, %v1120_v59 }
 0x172   :  { %1184 = vrot.lane.b32.xlu0 %v2769_v31, %s2898_s6  ;;  %2776 = vrcp.f32 %v1161_v48  ;;  %v1173_v16 = vand.u32 2147483648, %v1161_v48  ;;  %vm1167_vm6 = vweird.f32 %v1161_v48  ;;  %v1171_v11 = vand.u32 2147483647, %v1161_v48 }
 0x173   :  { %v1133_v37 = vor.u32 1.1754944e-38, %v1132_v13  ;;  %vm1131_vm4 = vcmp.eq.f32.partialorder %v1130_v5, 8.507059e+37 }
 0x174   :  { %v1174_v24 = vor.u32 1.1754944e-38, %v1173_v16  ;;  %vm1172_vm8 = vcmp.eq.f32.partialorder %v1171_v11, 8.507059e+37 }
 0x177   :  { %v2775_v51 = vpop.eup %2774 }
 0x178   :  { %v1122_v62 = vmul.f32 %v2775_v51, %v1120_v59  ;;  %v2777_v0 = vpop.eup %2776  ;;  %vm1127_vm1 = vweird.f32 %v2775_v51 }
 0x179   :  { %v1163_v1 = vmul.f32 %v2777_v0, %v1161_v48  ;;  %vm1128_vm3 = vmor %vm1126_vm2, %vm1127_vm1  ;;  %vm1168_vm5 = vweird.f32 %v2777_v0 }
 0x17a   :  { %v1123_v63 = vsub.f32 1.0, %v1122_v62  ;;  %vm1169_vm7 = vmor %vm1167_vm6, %vm1168_vm5 }
 0x17b   :  { %v1164_v12 = vsub.f32 1.0, %v1163_v1 }
 0x17c   :  { %v1124_v50 = vmul.f32 %v2775_v51, %v1123_v63 }
 0x17d   :  { %v1165_v7 = vmul.f32 %v2777_v0, %v1164_v12 }
 0x17e   :  { %v1125_v3 = vadd.f32 %v2775_v51, %v1124_v50 }
 0x17f   :  { %v1166_v45 = vadd.f32 %v2777_v0, %v1165_v7 }
 0x180   :  { %v1129_v6 = vsel %vm1128_vm3, %v2775_v51, %v1125_v3 }
 0x181   :  { %v1134_v9 = vsel %vm1131_vm4, %v1133_v37, %v1129_v6  ;;  %v1170_v21 = vsel %vm1169_vm7, %v2777_v0, %v1166_v45 }
 0x182   :  { %v1175_v60 = vsel %vm1172_vm8, %v1174_v24, %v1170_v21  ;;  %v1141_v22 = vmul.f32 %v1139_v32, %v1134_v9 }
 0x183   :  { %v1182_v35 = vmul.f32 %v1180_v47, %v1175_v60 }
 0x1dc   :  { %v1144_v14 = vpop.permute.xlu0 %1143 }
 0x1dd   :  { %v1146_v15 = vmul.f32 %v1144_v14, %v1134_v9 }
 0x1df   :  { %1148 = vrot.lane.b32.xlu2 %v1146_v15, %s2897_s21 }
 0x1e4   :  { %v1185_v54 = vpop.permute.xlu0 %1184 }
 0x1e5   :  { %v1187_v8 = vmul.f32 %v1185_v54, %v1175_v60 }
 0x1e7   :  { %1189 = vrot.lane.b32.xlu2 %v1187_v8, %s2897_s21 }
 0x239   :  { %v1149_v4 = vpop.permute.xlu2 %1148 }
 0x23a   :  { %v3928_v49 = vadd.f32 %v1149_v4, %v1141_v22 }
 0x23c   :  { %2778 = vtanh.f32 %v3928_v49 }
 0x241   :  { %v1190_v17 = vpop.permute.xlu2 %1189 }
 0x242   :  { %v2779_v25 = vpop.eup %2778  ;;  %v3931_v41 = vadd.f32 %v1190_v17, %v1182_v35 }
 0x243   :  { %1154 = vrot.lane.b32.xlu0 %v2779_v25, %s2898_s6 }
 0x244   :  { %2780 = vtanh.f32 %v3931_v41 }
 0x24a   :  { %v2781_v42 = vpop.eup %2780 }
 0x24b   :  { %1195 = vrot.lane.b32.xlu1 %v2781_v42, %s2898_s6 }
 0x2b5   :  { %v1155_v43 = vpop.permute.xlu0 %1154 }
 0x2b6   :  { %v1157_v18 = vmul.f32 %v1155_v43, %v1134_v9 }
 0x2b8   :  { %1200 = vrot.lane.b32.xlu2 %v1157_v18, %s2897_s21 }
 0x2bd   :  { %v1196_v46 = vpop.permute.xlu1 %1195 }
 0x2be   :  { %v1198_v26 = vmul.f32 %v1196_v46, %v1175_v60 }
 0x2c0   :  { %1205 = vrot.lane.b32.xlu0 %v1198_v26, %s2897_s21 }
 0x312   :  { %v1201_v38 = vpop.permute.xlu2 %1200 }
 0x313   :  { %1203 = vst.msk [vmem:[%s4206_s7] sm:$0xff] %vm1064_vm0, %v1201_v38  ;;  %2627 = vmatmul.msk.f32.vlgmr.msrb.gmra.mxu2 %vm1064_vm0, %v1201_v38 }
 0x332   :  { %v1206_v58 = vpop.permute.xlu0 %1205 }
 0x333   :  { %2626 = vst.msk [vmem:[%s4207_s8 + $0x38] sm:$0xff] %vm1064_vm0, %v1206_v58  ;;  %2628 = vmatmul.msk.f32.vlgmr.msrb.gmra.mxu3 %vm1064_vm0, %v1206_v58 }
 0x396   :  { %v1241_v39 = vpop.f32.mrf.mxu2 }
 0x397   :  { %v1244_v20 = vadd.f32 %v1241_v39, %v3874_v34 }
 0x399   :  { %2782 = vtanh.f32 %v1244_v20  ;;  %v2629_v23 = vmul.f32 -1.442695, %v1244_v20 }
 0x39f   :  { %v2783_v30 = vpop.eup %2782 }
 0x3a0   :  { %1294 = vrot.lane.b32.xlu1 %v2783_v30, %s2898_s6 }
 0x3b6   :  { %v1268_v31 = vpop.f32.mrf.mxu3 }
 0x3b7   :  { %v1271_v44 = vadd.f32 %v1268_v31, %v3921_v40 }
 0x3b9   :  { %2784 = vtanh.f32 %v1271_v44  ;;  %v2630_v59 = vmul.f32 -1.442695, %v1271_v44 }
 0x3ba   :  { %2786 = vpow2.f32 %v2629_v23 }
 0x3bb   :  { %2788 = vpow2.f32 %v2630_v59 }
 0x3bf   :  { %v2785_v33 = vpop.eup %2784 }
 0x3c0   :  { %1331 = vrot.lane.b32.xlu2 %v2785_v33, %s2898_s6  ;;  %v2787_v10 = vpop.eup %2786 }
 0x3c1   :  { %v1275_v48 = vadd.f32 1.0, %v2787_v10  ;;  %v2789_v51 = vpop.eup %2788 }
 0x3c2   :  { %v1312_v34 = vadd.f32 1.0, %v2789_v51 }
 0x3c3   :  { %2790 = vrcp.f32 %v1275_v48  ;;  %v1287_v13 = vand.u32 2147483648, %v1275_v48  ;;  %vm1281_vm10 = vweird.f32 %v1275_v48  ;;  %v1285_v5 = vand.u32 2147483647, %v1275_v48 }
 0x3c4   :  { %2792 = vrcp.f32 %v1312_v34  ;;  %v1324_v16 = vand.u32 2147483648, %v1312_v34  ;;  %vm1318_vm14 = vweird.f32 %v1312_v34  ;;  %v1322_v11 = vand.u32 2147483647, %v1312_v34 }
 0x3c5   :  { %v1288_v37 = vor.u32 1.1754944e-38, %v1287_v13  ;;  %vm1286_vm12 = vcmp.eq.f32.partialorder %v1285_v5, 8.507059e+37 }
 0x3c6   :  { %v1325_v24 = vor.u32 1.1754944e-38, %v1324_v16  ;;  %vm1323_vm1 = vcmp.eq.f32.partialorder %v1322_v11, 8.507059e+37 }
 0x3c9   :  { %v2791_v62 = vpop.eup %2790 }
 0x3ca   :  { %v1277_v63 = vmul.f32 %v2791_v62, %v1275_v48  ;;  %v2793_v50 = vpop.eup %2792  ;;  %vm1282_vm9 = vweird.f32 %v2791_v62 }
 0x3cb   :  { %v1314_v40 = vmul.f32 %v2793_v50, %v1312_v34  ;;  %vm1283_vm11 = vmor %vm1281_vm10, %vm1282_vm9  ;;  %vm1319_vm13 = vweird.f32 %v2793_v50 }
 0x3cc   :  { %v1278_v0 = vsub.f32 1.0, %v1277_v63  ;;  %vm1320_vm15 = vmor %vm1318_vm14, %vm1319_vm13 }
 0x3cd   :  { %v1315_v12 = vsub.f32 1.0, %v1314_v40 }
 0x3ce   :  { %v1279_v1 = vmul.f32 %v2791_v62, %v1278_v0 }
 0x3cf   :  { %v1316_v7 = vmul.f32 %v2793_v50, %v1315_v12 }
 0x3d0   :  { %v1280_v3 = vadd.f32 %v2791_v62, %v1279_v1 }
 0x3d1   :  { %v1317_v15 = vadd.f32 %v2793_v50, %v1316_v7 }
 0x3d2   :  { %v1284_v6 = vsel %vm1283_vm11, %v2791_v62, %v1280_v3 }
 0x3d3   :  { %v1289_v14 = vsel %vm1286_vm12, %v1288_v37, %v1284_v6  ;;  %v1321_v21 = vsel %vm1320_vm15, %v2793_v50, %v1317_v15 }
 0x3d4   :  { %v1326_v54 = vsel %vm1323_vm1, %v1325_v24, %v1321_v21  ;;  %v1292_v32 = vmul.f32 %v1289_v14, %v3928_v49 }
 0x3d5   :  { %v1329_v47 = vmul.f32 %v1326_v54, %v3931_v41 }
 0x412   :  { %v1295_v9 = vpop.permute.xlu1 %1294 }
 0x413   :  { %v1297_v45 = vmul.f32 %v1295_v9, %v1289_v14 }
 0x415   :  { %1299 = vrot.lane.b32.xlu0 %v1297_v45, %s2897_s21 }
 0x41a   :  { %v1332_v60 = vpop.permute.xlu2 %1331 }
 0x41b   :  { %v1334_v8 = vmul.f32 %v1332_v60, %v1326_v54 }
 0x41d   :  { %1336 = vrot.lane.b32.xlu1 %v1334_v8, %s2897_s21 }
 0x487   :  { %v1300_v22 = vpop.permute.xlu0 %1299 }
 0x488   :  { %v3955_v4 = vadd.f32 %v1300_v22, %v1292_v32 }
 0x48a   :  { %2794 = vtanh.f32 %v3955_v4 }
 0x48f   :  { %v1337_v35 = vpop.permute.xlu1 %1336 }
 0x490   :  { %v2795_v17 = vpop.eup %2794  ;;  %v3959_v25 = vadd.f32 %v1337_v35, %v1329_v47 }
 0x491   :  { %1305 = vrot.lane.b32.xlu2 %v2795_v17, %s2898_s6 }
 0x492   :  { %2796 = vtanh.f32 %v3959_v25 }
 0x498   :  { %v2797_v42 = vpop.eup %2796 }
 0x499   :  { %1342 = vrot.lane.b32.xlu0 %v2797_v42, %s2898_s6 }
 0x4eb   :  { %v1306_v43 = vpop.permute.xlu2 %1305 }
 0x4ec   :  { %v1308_v49 = vmul.f32 %v1306_v43, %v1289_v14 }
 0x4ee   :  { %1347 = vrot.lane.b32.xlu1 %v1308_v49, %s2897_s21 }
 0x50b   :  { %v1343_v18 = vpop.permute.xlu0 %1342 }
 0x50c   :  { %v1345_v46 = vmul.f32 %v1343_v18, %v1326_v54 }
 0x50e   :  { %1353 = vrot.lane.b32.xlu2 %v1345_v46, %s2897_s21 }
 0x560   :  { %v1348_v41 = vpop.permute.xlu1 %1347 }
 0x561   :  { %2631 = vst.msk [vmem:[%s4206_s7 + $0x8] sm:$0xff] %vm1064_vm0, %v1348_v41  ;;  %2633 = vmatmul.msk.f32.vlgmr.msra.gmra.mxu0 %vm1064_vm0, %v1348_v41 }
 0x568   :  { %v1354_v26 = vpop.permute.xlu2 %1353 }
 0x569   :  { %2632 = vst.msk [vmem:[%s4207_s8 + $0x30] sm:$0xff] %vm1064_vm0, %v1354_v26  ;;  %2634 = vmatmul.msk.f32.vlgmr.msra.gmra.mxu1 %vm1064_vm0, %v1354_v26 }
 0x5de   :  { %v1389_v38 = vpop.f32.mrf.mxu0 }
 0x5df   :  { %v1392_v58 = vadd.f32 %v1389_v38, %v3886_v55 }
 0x5e1   :  { %2798 = vtanh.f32 %v1392_v58  ;;  %v2635_v44 = vmul.f32 -1.442695, %v1392_v58 }
 0x5e6   :  { %v1416_v39 = vpop.f32.mrf.mxu1 }
 0x5e7   :  { %v2799_v20 = vpop.eup %2798  ;;  %v1419_v30 = vadd.f32 %v1416_v39, %v3918_v57 }
 0x5e8   :  { %1442 = vrot.lane.b32.xlu0 %v2799_v20, %s2898_s6 }
 0x5e9   :  { %2800 = vtanh.f32 %v1419_v30  ;;  %v2636_v33 = vmul.f32 -1.442695, %v1419_v30 }
 0x5ea   :  { %2802 = vpow2.f32 %v2635_v44 }
 0x5eb   :  { %2804 = vpow2.f32 %v2636_v33 }
 0x5ef   :  { %v2801_v31 = vpop.eup %2800 }
 0x5f0   :  { %1479 = vrot.lane.b32.xlu1 %v2801_v31, %s2898_s6  ;;  %v2803_v23 = vpop.eup %2802 }
 0x5f1   :  { %v1423_v59 = vadd.f32 1.0, %v2803_v23  ;;  %v2805_v10 = vpop.eup %2804 }
 0x5f2   :  { %v1460_v55 = vadd.f32 1.0, %v2805_v10 }
 0x5f3   :  { %2806 = vrcp.f32 %v1423_v59  ;;  %v1435_v1 = vand.u32 2147483648, %v1423_v59  ;;  %vm1429_vm3 = vweird.f32 %v1423_v59  ;;  %v1433_v40 = vand.u32 2147483647, %v1423_v59 }
 0x5f4   :  { %2808 = vrcp.f32 %v1460_v55  ;;  %v1472_v9 = vand.u32 2147483648, %v1460_v55  ;;  %vm1466_vm7 = vweird.f32 %v1460_v55  ;;  %v1470_v14 = vand.u32 2147483647, %v1460_v55 }
 0x5f5   :  { %v1436_v13 = vor.u32 1.1754944e-38, %v1435_v1  ;;  %vm1434_vm5 = vcmp.eq.f32.partialorder %v1433_v40, 8.507059e+37 }
 0x5f6   :  { %v1473_v15 = vor.u32 1.1754944e-38, %v1472_v9  ;;  %vm1471_vm9 = vcmp.eq.f32.partialorder %v1470_v14, 8.507059e+37 }
 0x5f9   :  { %v2807_v48 = vpop.eup %2806 }
 0x5fa   :  { %v1425_v51 = vmul.f32 %v2807_v48, %v1423_v59  ;;  %v2809_v57 = vpop.eup %2808  ;;  %vm1430_vm2 = vweird.f32 %v2807_v48 }
 0x5fb   :  { %v1462_v63 = vmul.f32 %v2809_v57, %v1460_v55  ;;  %vm1431_vm4 = vmor %vm1429_vm3, %vm1430_vm2  ;;  %vm1467_vm6 = vweird.f32 %v2809_v57 }
 0x5fc   :  { %v1426_v34 = vsub.f32 1.0, %v1425_v51  ;;  %vm1468_vm8 = vmor %vm1466_vm7, %vm1467_vm6 }
 0x5fd   :  { %v1463_v50 = vsub.f32 1.0, %v1462_v63 }
 0x5fe   :  { %v1427_v62 = vmul.f32 %v2807_v48, %v1426_v34 }
 0x5ff   :  { %v1464_v12 = vmul.f32 %v2809_v57, %v1463_v50 }
 0x600   :  { %v1428_v0 = vadd.f32 %v2807_v48, %v1427_v62 }
 0x601   :  { %v1465_v37 = vadd.f32 %v2809_v57, %v1464_v12 }
 0x602   :  { %v1432_v3 = vsel %vm1431_vm4, %v2807_v48, %v1428_v0 }
 0x603   :  { %v1437_v5 = vsel %vm1434_vm5, %v1436_v13, %v1432_v3  ;;  %v1469_v45 = vsel %vm1468_vm8, %v2809_v57, %v1465_v37 }
 0x604   :  { %v1474_v11 = vsel %vm1471_vm9, %v1473_v15, %v1469_v45  ;;  %v1440_v24 = vmul.f32 %v1437_v5, %v3955_v4 }
 0x605   :  { %v1477_v32 = vmul.f32 %v1474_v11, %v3959_v25 }
 0x65a   :  { %v1443_v6 = vpop.permute.xlu0 %1442 }
 0x65b   :  { %v1445_v7 = vmul.f32 %v1443_v6, %v1437_v5 }
 0x65d   :  { %1447 = vrot.lane.b32.xlu2 %v1445_v7, %s2897_s21 }
 0x662   :  { %v1480_v16 = vpop.permute.xlu1 %1479 }
 0x663   :  { %v1482_v21 = vmul.f32 %v1480_v16, %v1474_v11 }
 0x665   :  { %1484 = vrot.lane.b32.xlu0 %v1482_v21, %s2897_s21 }
 0x6b7   :  { %v1448_v60 = vpop.permute.xlu2 %1447 }
 0x6b8   :  { %v3983_v54 = vadd.f32 %v1448_v60, %v1440_v24 }
 0x6ba   :  { %2810 = vtanh.f32 %v3983_v54 }
 0x6c0   :  { %v2811_v8 = vpop.eup %2810 }
 0x6c1   :  { %1453 = vrot.lane.b32.xlu1 %v2811_v8, %s2898_s6  ;;  %v4028_v8 = vld [vmem:[%s4201_s3 + $0x10] sm:$0xff] }
 0x6d7   :  { %v1485_v22 = vpop.permute.xlu0 %1484 }
 0x6d8   :  { %v3988_v47 = vadd.f32 %v1485_v22, %v1477_v32  ;;  %v2894_v32 = vld [vmem:[%s4201_s3 + $0x8] sm:$0xff]  ;;  %v2895_v22 = vld [vmem:[%s4201_s3] sm:$0xff] }
 0x6da   :  { %2812 = vtanh.f32 %v3988_v47 }
 0x6e0   :  { %v2813_v35 = vpop.eup %2812 }
 0x6e1   :  { %1490 = vrot.lane.b32.xlu2 %v2813_v35, %s2898_s6 }
 0x733   :  { %v1454_v17 = vpop.permute.xlu1 %1453 }
 0x734   :  { %v1456_v4 = vmul.f32 %v1454_v17, %v1437_v5 }
 0x736   :  { %1495 = vrot.lane.b32.xlu0 %v1456_v4, %s2897_s21 }
 0x73b   :  { %v1491_v42 = vpop.permute.xlu2 %1490 }
 0x73c   :  { %v1493_v43 = vmul.f32 %v1491_v42, %v1474_v11  ;;  %v4047_v42 = vld [vmem:[%s4202_s4 + $0x18] sm:$0xff] }
 0x73d   :  { %1701 = vmatpush.msrb.mxu1 %v4047_v42  ;;  %1843 = vmatpush.msrb.mxu3 %v4047_v42 }
 0x73e   :  { %1501 = vrot.lane.b32.xlu1 %v1493_v43, %s2897_s21  ;;  %v4052_v43 = vld [vmem:[%s4202_s4 + $0x10] sm:$0xff] }
 0x73f   :  { %1702 = vmatpush.msrb.mxu1 %v4052_v43  ;;  %1844 = vmatpush.msrb.mxu3 %v4052_v43 }
 0x7a8   :  { %v1496_v49 = vpop.permute.xlu0 %1495 }
 0x7a9   :  { %2637 = vst.msk [vmem:[%s4206_s7 + $0x10] sm:$0xff] %vm1064_vm0, %v1496_v49  ;;  %2639 = vmatmul.msk.f32.vlgmr.msra.gmra.mxu2 %vm1064_vm0, %v1496_v49  ;;  %v4059_v49 = vld [vmem:[%s4202_s4 + $0x8] sm:$0xff] }
 0x7aa   :  { %1703 = vmatpush.msrb.mxu1 %v4059_v49  ;;  %1845 = vmatpush.msrb.mxu3 %v4059_v49 }
 0x7b0   :  { %v1502_v25 = vpop.permute.xlu1 %1501 }
 0x7b1   :  { %2638 = vst.msk [vmem:[%s4207_s8 + $0x28] sm:$0xff] %vm1064_vm0, %v1502_v25  ;;  %2640 = vmatmul.msk.f32.vlgmr.msra.gmra.mxu3 %vm1064_vm0, %v1502_v25  ;;  %v2896_v25 = vld [vmem:[%s4202_s4] sm:$0xff] }
 0x7b2   :  { %1704 = vmatpush.msrb.mxu1 %v2896_v25  ;;  %v1825_v25 = vld [vmem:[%s4202_s4] sm:$0xff] }
 0x7b3   :  { %1846 = vmatpush.msrb.mxu3 %v1825_v25 }
 0x7b4   :  { %1985 = vmatpush.msra.mxu1 %v4047_v42 }
 0x7b5   :  { %2127 = vmatpush.msra.mxu3 %v4047_v42 }
 0x7b6   :  { %1986 = vmatpush.msra.mxu1 %v4052_v43 }
 0x7b7   :  { %2128 = vmatpush.msra.mxu3 %v4052_v43 }
 0x7b8   :  { %1987 = vmatpush.msra.mxu1 %v4059_v49 }
 0x7b9   :  { %2129 = vmatpush.msra.mxu3 %v4059_v49 }
 0x7ba   :  { %1988 = vmatpush.msra.mxu1 %v1825_v25 }
 0x7bb   :  { %2130 = vmatpush.msra.mxu3 %v1825_v25 }
 0x82c   :  { %v1537_v18 = vpop.f32.mrf.mxu2 }
 0x82d   :  { %v1540_v46 = vadd.f32 %v1537_v18, %v3890_v61 }
 0x82f   :  { %2814 = vtanh.f32 %v1540_v46  ;;  %v2641_v39 = vmul.f32 -1.442695, %v1540_v46 }
 0x834   :  { %v1564_v41 = vpop.f32.mrf.mxu3 }
 0x835   :  { %v2815_v26 = vpop.eup %2814  ;;  %v1567_v38 = vadd.f32 %v1564_v41, %v3916_v2 }
 0x836   :  { %1590 = vrot.lane.b32.xlu2 %v2815_v26, %s2898_s6 }
 0x837   :  { %2816 = vtanh.f32 %v1567_v38  ;;  %v2642_v61 = vmul.f32 -1.442695, %v1567_v38 }
 0x838   :  { %2818 = vpow2.f32 %v2641_v39 }
 0x83d   :  { %v2817_v58 = vpop.eup %2816 }
 0x83e   :  { %1627 = vrot.lane.b32.xlu0 %v2817_v58, %s2898_s6  ;;  %v2819_v20 = vpop.eup %2818 }
 0x83f   :  { %v1571_v30 = vadd.f32 1.0, %v2819_v20 }
 0x841   :  { %2820 = vrcp.f32 %v1571_v30  ;;  %v1583_v2 = vand.u32 2147483648, %v1571_v30  ;;  %vm1577_vm11 = vweird.f32 %v1571_v30  ;;  %v1581_v10 = vand.u32 2147483647, %v1571_v30 }
 0x842   :  { %2822 = vpow2.f32 %v2642_v61 }
 0x843   :  { %v1584_v51 = vor.u32 1.1754944e-38, %v1583_v2  ;;  %vm1582_vm13 = vcmp.eq.f32.partialorder %v1581_v10, 8.507059e+37 }
 0x847   :  { %v2821_v31 = vpop.eup %2820 }
 0x848   :  { %v1573_v44 = vmul.f32 %v2821_v31, %v1571_v30  ;;  %vm1578_vm10 = vweird.f32 %v2821_v31  ;;  %v2823_v55 = vpop.eup %2822 }
 0x849   :  { %vm1579_vm12 = vmor %vm1577_vm11, %vm1578_vm10  ;;  %v1608_v34 = vadd.f32 1.0, %v2823_v55 }
 0x84a   :  { %v1574_v33 = vsub.f32 1.0, %v1573_v44 }
 0x84b   :  { %2824 = vrcp.f32 %v1608_v34  ;;  %v1620_v12 = vand.u32 2147483648, %v1608_v34  ;;  %vm1614_vm15 = vweird.f32 %v1608_v34  ;;  %v1618_v13 = vand.u32 2147483647, %v1608_v34 }
 0x84c   :  { %v1575_v23 = vmul.f32 %v2821_v31, %v1574_v33 }
 0x84d   :  { %v1621_v6 = vor.u32 1.1754944e-38, %v1620_v12  ;;  %vm1619_vm2 = vcmp.eq.f32.partialorder %v1618_v13, 8.507059e+37 }
 0x84e   :  { %v1576_v59 = vadd.f32 %v2821_v31, %v1575_v23 }
 0x850   :  { %v1580_v48 = vsel %vm1579_vm12, %v2821_v31, %v1576_v59 }
 0x851   :  { %v1585_v62 = vsel %vm1582_vm13, %v1584_v51, %v1580_v48  ;;  %v2825_v0 = vpop.eup %2824 }
 0x852   :  { %v1610_v50 = vmul.f32 %v2825_v0, %v1608_v34  ;;  %vm1615_vm14 = vweird.f32 %v2825_v0  ;;  %v1588_v14 = vmul.f32 %v1585_v62, %v3983_v54  ;;  %v4023_v54 = vld [vmem:[%s4201_s3 + $0x18] sm:$0xff] }
 0x853   :  { %vm1616_vm1 = vmor %vm1614_vm15, %vm1615_vm14  ;;  %1674 = vmatpush.msrb.mxu0 %v4023_v54  ;;  %1816 = vmatpush.msrb.mxu2 %v4023_v54 }
 0x854   :  { %v1611_v1 = vsub.f32 1.0, %v1610_v50 }
 0x855   :  { %1675 = vmatpush.msrb.mxu0 %v4028_v8  ;;  %1817 = vmatpush.msrb.mxu2 %v4028_v8 }
 0x856   :  { %v1612_v40 = vmul.f32 %v2825_v0, %v1611_v1 }
 0x857   :  { %1676 = vmatpush.msrb.mxu0 %v2894_v32 }
 0x858   :  { %v1613_v3 = vadd.f32 %v2825_v0, %v1612_v40 }
 0x859   :  { %1677 = vmatpush.msrb.mxu0 %v2895_v22 }
 0x85a   :  { %v1617_v5 = vsel %vm1616_vm1, %v2825_v0, %v1613_v3 }
 0x85b   :  { %v1622_v7 = vsel %vm1619_vm2, %v1621_v6, %v1617_v5  ;;  %1958 = vmatpush.msra.mxu0 %v4023_v54 }
 0x85c   :  { %v1625_v16 = vmul.f32 %v1622_v7, %v3988_v47 }
 0x85d   :  { %1959 = vmatpush.msra.mxu0 %v4028_v8 }
 0x890   :  { %v1591_v57 = vpop.permute.xlu2 %1590 }
 0x891   :  { %v1593_v63 = vmul.f32 %v1591_v57, %v1585_v62 }
 0x893   :  { %1595 = vrot.lane.b32.xlu1 %v1593_v63, %s2897_s21 }
 0x8b0   :  { %v1628_v37 = vpop.permute.xlu0 %1627 }
 0x8b1   :  { %v1630_v9 = vmul.f32 %v1628_v37, %v1622_v7 }
 0x8b3   :  { %1632 = vrot.lane.b32.xlu2 %v1630_v9, %s2897_s21 }
 0x905   :  { %v1596_v45 = vpop.permute.xlu1 %1595 }
 0x906   :  { %v4011_v15 = vadd.f32 %v1596_v45, %v1588_v14 }
 0x908   :  { %2826 = vtanh.f32 %v4011_v15 }
 0x90d   :  { %v1633_v11 = vpop.permute.xlu2 %1632 }
 0x90e   :  { %v2827_v21 = vpop.eup %2826  ;;  %v4015_v24 = vadd.f32 %v1633_v11, %v1625_v16 }
 0x90f   :  { %1601 = vrot.lane.b32.xlu0 %v2827_v21, %s2898_s6 }
 0x910   :  { %2828 = vtanh.f32 %v4015_v24 }
 0x916   :  { %v2829_v60 = vpop.eup %2828 }
 0x917   :  { %1638 = vrot.lane.b32.xlu1 %v2829_v60, %s2898_s6 }
 0x981   :  { %v1602_v47 = vpop.permute.xlu0 %1601 }
 0x982   :  { %v1604_v35 = vmul.f32 %v1602_v47, %v1585_v62 }
 0x984   :  { %1643 = vrot.lane.b32.xlu2 %v1604_v35, %s2897_s21  ;;  %v1799_v35 = vld [vmem:[%s4201_s3 + $0x8] sm:$0xff] }
 0x985   :  { %1818 = vmatpush.msrb.mxu2 %v1799_v35  ;;  %1960 = vmatpush.msra.mxu0 %v1799_v35 }
 0x989   :  { %v1639_v17 = vpop.permute.xlu1 %1638 }
 0x98a   :  { %v1641_v4 = vmul.f32 %v1639_v17, %v1622_v7 }
 0x98c   :  { %1649 = vrot.lane.b32.xlu0 %v1641_v4, %s2897_s21 }
 0x9de   :  { %v1644_v18 = vpop.permute.xlu2 %1643 }
 0x9df   :  { %2643 = vst.msk [vmem:[%s4206_s7 + $0x18] sm:$0xff] %vm1064_vm0, %v1644_v18  ;;  %2645 = vmatmul.msk.f32.vlgmr.msrb.gmra.mxu0 %vm1064_vm0, %v1644_v18 }
 0x9fe   :  { %v1650_v46 = vpop.permute.xlu0 %1649 }
 0x9ff   :  { %2644 = vst.msk [vmem:[%s4207_s8 + $0x20] sm:$0xff] %vm1064_vm0, %v1650_v46  ;;  %2646 = vmatmul.msk.f32.vlgmr.msrb.gmra.mxu1 %vm1064_vm0, %v1650_v46 }
 0xa5c   :  { %v1679_v41 = vpop.f32.mrf.mxu0 }
 0xa5d   :  { %v1682_v26 = vadd.f32 %v1679_v41, %v3894_v29 }
 0xa5f   :  { %2830 = vtanh.f32 %v1682_v26  ;;  %v2647_v30 = vmul.f32 -1.442695, %v1682_v26 }
 0xa65   :  { %v2831_v38 = vpop.eup %2830 }
 0xa66   :  { %1732 = vrot.lane.b32.xlu1 %v2831_v38, %s2898_s6 }
 0xa7c   :  { %v1706_v58 = vpop.f32.mrf.mxu1 }
 0xa7d   :  { %v1709_v39 = vadd.f32 %v1706_v58, %v3914_v53 }
 0xa7f   :  { %2832 = vtanh.f32 %v1709_v39  ;;  %v2648_v31 = vmul.f32 -1.442695, %v1709_v39 }
 0xa80   :  { %2834 = vpow2.f32 %v2647_v30 }
 0xa81   :  { %2836 = vpow2.f32 %v2648_v31 }
 0xa85   :  { %v2833_v20 = vpop.eup %2832 }
 0xa86   :  { %1769 = vrot.lane.b32.xlu2 %v2833_v20, %s2898_s6  ;;  %v2835_v44 = vpop.eup %2834 }
 0xa87   :  { %v1713_v33 = vadd.f32 1.0, %v2835_v44  ;;  %v2837_v61 = vpop.eup %2836 }
 0xa88   :  { %v1750_v29 = vadd.f32 1.0, %v2837_v61 }
 0xa89   :  { %2838 = vrcp.f32 %v1713_v33  ;;  %v1725_v34 = vand.u32 2147483648, %v1713_v33  ;;  %vm1719_vm4 = vweird.f32 %v1713_v33  ;;  %v1723_v57 = vand.u32 2147483647, %v1713_v33 }
 0xa8a   :  { %2840 = vrcp.f32 %v1750_v29  ;;  %v1762_v12 = vand.u32 2147483648, %v1750_v29  ;;  %vm1756_vm8 = vweird.f32 %v1750_v29  ;;  %v1760_v13 = vand.u32 2147483647, %v1750_v29 }
 0xa8b   :  { %v1726_v0 = vor.u32 1.1754944e-38, %v1725_v34  ;;  %vm1724_vm6 = vcmp.eq.f32.partialorder %v1723_v57, 8.507059e+37 }
 0xa8c   :  { %v1763_v6 = vor.u32 1.1754944e-38, %v1762_v12  ;;  %vm1761_vm10 = vcmp.eq.f32.partialorder %v1760_v13, 8.507059e+37 }
 0xa8f   :  { %v2839_v23 = vpop.eup %2838 }
 0xa90   :  { %v1715_v59 = vmul.f32 %v2839_v23, %v1713_v33  ;;  %v2841_v10 = vpop.eup %2840  ;;  %vm1720_vm3 = vweird.f32 %v2839_v23 }
 0xa91   :  { %v1752_v53 = vmul.f32 %v2841_v10, %v1750_v29  ;;  %vm1721_vm5 = vmor %vm1719_vm4, %vm1720_vm3  ;;  %vm1757_vm7 = vweird.f32 %v2841_v10 }
 0xa92   :  { %v1716_v2 = vsub.f32 1.0, %v1715_v59  ;;  %vm1758_vm9 = vmor %vm1756_vm8, %vm1757_vm7 }
 0xa93   :  { %v1753_v51 = vsub.f32 1.0, %v1752_v53 }
 0xa94   :  { %v1717_v55 = vmul.f32 %v2839_v23, %v1716_v2 }
 0xa95   :  { %v1754_v63 = vmul.f32 %v2841_v10, %v1753_v51 }
 0xa96   :  { %v1718_v48 = vadd.f32 %v2839_v23, %v1717_v55 }
 0xa97   :  { %v1755_v3 = vadd.f32 %v2841_v10, %v1754_v63 }
 0xa98   :  { %v1722_v62 = vsel %vm1721_vm5, %v2839_v23, %v1718_v48 }
 0xa99   :  { %v1727_v1 = vsel %vm1724_vm6, %v1726_v0, %v1722_v62  ;;  %v1759_v5 = vsel %vm1758_vm9, %v2841_v10, %v1755_v3 }
 0xa9a   :  { %v1764_v37 = vsel %vm1761_vm10, %v1763_v6, %v1759_v5  ;;  %v1730_v14 = vmul.f32 %v1727_v1, %v4011_v15 }
 0xa9b   :  { %v1767_v11 = vmul.f32 %v1764_v37, %v4015_v24  ;;  %v1798_v24 = vld [vmem:[%s4201_s3] sm:$0xff] }
 0xa9c   :  { %1819 = vmatpush.msrb.mxu2 %v1798_v24  ;;  %1961 = vmatpush.msra.mxu0 %v1798_v24 }
 0xa9e   :  { %2100 = vmatpush.msra.mxu2 %v4023_v54 }
 0xaa0   :  { %2101 = vmatpush.msra.mxu2 %v4028_v8 }
 0xaa2   :  { %2102 = vmatpush.msra.mxu2 %v1799_v35 }
 0xaa4   :  { %2103 = vmatpush.msra.mxu2 %v1798_v24 }
 0xad8   :  { %v1733_v50 = vpop.permute.xlu1 %1732 }
 0xad9   :  { %v1735_v40 = vmul.f32 %v1733_v50, %v1727_v1 }
 0xadb   :  { %1737 = vrot.lane.b32.xlu0 %v1735_v40, %s2897_s21 }
 0xae0   :  { %v1770_v7 = vpop.permute.xlu2 %1769 }
 0xae1   :  { %v1772_v9 = vmul.f32 %v1770_v7, %v1764_v37 }
 0xae3   :  { %1774 = vrot.lane.b32.xlu1 %v1772_v9, %s2897_s21 }
 0xb4d   :  { %v1738_v45 = vpop.permute.xlu0 %1737 }
 0xb4e   :  { %v4088_v16 = vadd.f32 %v1738_v45, %v1730_v14 }
 0xb50   :  { %2842 = vtanh.f32 %v4088_v16 }
 0xb55   :  { %v1775_v21 = vpop.permute.xlu1 %1774 }
 0xb56   :  { %v2843_v60 = vpop.eup %2842  ;;  %v4092_v32 = vadd.f32 %v1775_v21, %v1767_v11 }
 0xb57   :  { %1743 = vrot.lane.b32.xlu2 %v2843_v60, %s2898_s6 }
 0xb58   :  { %2844 = vtanh.f32 %v4092_v32 }
 0xb5e   :  { %v2845_v22 = vpop.eup %2844 }
 0xb5f   :  { %1780 = vrot.lane.b32.xlu0 %v2845_v22, %s2898_s6 }
 0xbb1   :  { %v1744_v47 = vpop.permute.xlu2 %1743 }
 0xbb2   :  { %v1746_v15 = vmul.f32 %v1744_v47, %v1727_v1 }
 0xbb4   :  { %1785 = vrot.lane.b32.xlu1 %v1746_v15, %s2897_s21 }
 0xbd1   :  { %v1781_v17 = vpop.permute.xlu0 %1780 }
 0xbd2   :  { %v1783_v4 = vmul.f32 %v1781_v17, %v1764_v37 }
 0xbd4   :  { %1791 = vrot.lane.b32.xlu2 %v1783_v4, %s2897_s21 }
 0xc26   :  { %v1786_v54 = vpop.permute.xlu1 %1785 }
 0xc27   :  { %2649 = vst.msk [vmem:[%s4206_s7 + $0x20] sm:$0xff] %vm1064_vm0, %v1786_v54  ;;  %2651 = vmatmul.msk.f32.vlgmr.msrb.gmra.mxu2 %vm1064_vm0, %v1786_v54 }
 0xc2e   :  { %v1792_v8 = vpop.permute.xlu2 %1791 }
 0xc2f   :  { %2650 = vst.msk [vmem:[%s4207_s8 + $0x18] sm:$0xff] %vm1064_vm0, %v1792_v8  ;;  %2652 = vmatmul.msk.f32.vlgmr.msrb.gmra.mxu3 %vm1064_vm0, %v1792_v8 }
 0xcaa   :  { %v1821_v42 = vpop.f32.mrf.mxu2 }
 0xcab   :  { %v1824_v43 = vadd.f32 %v1821_v42, %v3898_v36 }
 0xcad   :  { %2846 = vtanh.f32 %v1824_v43  ;;  %v2653_v26 = vmul.f32 -1.442695, %v1824_v43 }
 0xcb2   :  { %v1848_v49 = vpop.f32.mrf.mxu3 }
 0xcb3   :  { %v2847_v18 = vpop.eup %2846  ;;  %v1851_v46 = vadd.f32 %v1848_v49, %v3912_v52 }
 0xcb4   :  { %1874 = vrot.lane.b32.xlu0 %v2847_v18, %s2898_s6 }
 0xcb5   :  { %2848 = vtanh.f32 %v1851_v46  ;;  %v2654_v38 = vmul.f32 -1.442695, %v1851_v46 }
 0xcb6   :  { %2850 = vpow2.f32 %v2653_v26 }
 0xcb7   :  { %2852 = vpow2.f32 %v2654_v38 }
 0xcbb   :  { %v2849_v41 = vpop.eup %2848 }
 0xcbc   :  { %1911 = vrot.lane.b32.xlu1 %v2849_v41, %s2898_s6  ;;  %v2851_v58 = vpop.eup %2850 }
 0xcbd   :  { %v1855_v39 = vadd.f32 1.0, %v2851_v58  ;;  %v2853_v20 = vpop.eup %2852 }
 0xcbe   :  { %v1892_v36 = vadd.f32 1.0, %v2853_v20 }
 0xcbf   :  { %2854 = vrcp.f32 %v1855_v39  ;;  %v1867_v59 = vand.u32 2147483648, %v1855_v39  ;;  %vm1861_vm12 = vweird.f32 %v1855_v39  ;;  %v1865_v2 = vand.u32 2147483647, %v1855_v39 }
 0xcc0   :  { %2856 = vrcp.f32 %v1892_v36  ;;  %v1904_v62 = vand.u32 2147483648, %v1892_v36  ;;  %vm1898_vm1 = vweird.f32 %v1892_v36  ;;  %v1902_v63 = vand.u32 2147483647, %v1892_v36 }
 0xcc1   :  { %v1868_v53 = vor.u32 1.1754944e-38, %v1867_v59  ;;  %vm1866_vm14 = vcmp.eq.f32.partialorder %v1865_v2, 8.507059e+37 }
 0xcc2   :  { %v1905_v50 = vor.u32 1.1754944e-38, %v1904_v62  ;;  %vm1903_vm3 = vcmp.eq.f32.partialorder %v1902_v63, 8.507059e+37 }
 0xcc5   :  { %v2855_v30 = vpop.eup %2854 }
 0xcc6   :  { %v1857_v31 = vmul.f32 %v2855_v30, %v1855_v39  ;;  %v2857_v52 = vpop.eup %2856  ;;  %vm1862_vm11 = vweird.f32 %v2855_v30 }
 0xcc7   :  { %v1894_v61 = vmul.f32 %v2857_v52, %v1892_v36  ;;  %vm1863_vm13 = vmor %vm1861_vm12, %vm1862_vm11  ;;  %vm1899_vm15 = vweird.f32 %v2857_v52 }
 0xcc8   :  { %v1858_v44 = vsub.f32 1.0, %v1857_v31  ;;  %vm1900_vm2 = vmor %vm1898_vm1, %vm1899_vm15 }
 0xcc9   :  { %v1895_v23 = vsub.f32 1.0, %v1894_v61 }
 0xcca   :  { %v1859_v33 = vmul.f32 %v2855_v30, %v1858_v44 }
 0xccb   :  { %v1896_v55 = vmul.f32 %v2857_v52, %v1895_v23 }
 0xccc   :  { %v1860_v29 = vadd.f32 %v2855_v30, %v1859_v33 }
 0xccd   :  { %v1897_v57 = vadd.f32 %v2857_v52, %v1896_v55 }
 0xcce   :  { %v1864_v10 = vsel %vm1863_vm13, %v2855_v30, %v1860_v29 }
 0xccf   :  { %v1869_v48 = vsel %vm1866_vm14, %v1868_v53, %v1864_v10  ;;  %v1901_v0 = vsel %vm1900_vm2, %v2857_v52, %v1897_v57 }
 0xcd0   :  { %v1906_v40 = vsel %vm1903_vm3, %v1905_v50, %v1901_v0  ;;  %v1872_v12 = vmul.f32 %v1869_v48, %v4088_v16 }
 0xcd1   :  { %v1909_v7 = vmul.f32 %v1906_v40, %v4092_v32 }
 0xd26   :  { %v1875_v51 = vpop.permute.xlu0 %1874 }
 0xd27   :  { %v1877_v34 = vmul.f32 %v1875_v51, %v1869_v48 }
 0xd29   :  { %1879 = vrot.lane.b32.xlu2 %v1877_v34, %s2897_s21 }
 0xd2e   :  { %v1912_v1 = vpop.permute.xlu1 %1911 }
 0xd2f   :  { %v1914_v3 = vmul.f32 %v1912_v1, %v1906_v40 }
 0xd31   :  { %1916 = vrot.lane.b32.xlu0 %v1914_v3, %s2897_s21 }
 0xd83   :  { %v1880_v13 = vpop.permute.xlu2 %1879 }
 0xd84   :  { %v4130_v5 = vadd.f32 %v1880_v13, %v1872_v12 }
 0xd86   :  { %2858 = vtanh.f32 %v4130_v5 }
 0xd8c   :  { %v2859_v6 = vpop.eup %2858 }
 0xd8d   :  { %1885 = vrot.lane.b32.xlu1 %v2859_v6, %s2898_s6 }
 0xda3   :  { %v1917_v37 = vpop.permute.xlu0 %1916 }
 0xda4   :  { %v4135_v9 = vadd.f32 %v1917_v37, %v1909_v7 }
 0xda6   :  { %2860 = vtanh.f32 %v4135_v9 }
 0xdac   :  { %v2861_v14 = vpop.eup %2860 }
 0xdad   :  { %1922 = vrot.lane.b32.xlu2 %v2861_v14, %s2898_s6 }
 0xdff   :  { %v1886_v45 = vpop.permute.xlu1 %1885 }
 0xe00   :  { %v1888_v16 = vmul.f32 %v1886_v45, %v1869_v48 }
 0xe02   :  { %1927 = vrot.lane.b32.xlu0 %v1888_v16, %s2897_s21 }
 0xe07   :  { %v1923_v11 = vpop.permute.xlu2 %1922 }
 0xe08   :  { %v1925_v21 = vmul.f32 %v1923_v11, %v1906_v40 }
 0xe0a   :  { %1933 = vrot.lane.b32.xlu1 %v1925_v21, %s2897_s21 }
 0xe74   :  { %v1928_v60 = vpop.permute.xlu0 %1927 }
 0xe75   :  { %2655 = vst.msk [vmem:[%s4206_s7 + $0x28] sm:$0xff] %vm1064_vm0, %v1928_v60  ;;  %2657 = vmatmul.msk.f32.vlgmr.msra.gmra.mxu0 %vm1064_vm0, %v1928_v60 }
 0xe7c   :  { %v1934_v32 = vpop.permute.xlu1 %1933 }
 0xe7d   :  { %2656 = vst.msk [vmem:[%s4207_s8 + $0x10] sm:$0xff] %vm1064_vm0, %v1934_v32  ;;  %2658 = vmatmul.msk.f32.vlgmr.msra.gmra.mxu1 %vm1064_vm0, %v1934_v32 }
 0xef2   :  { %v1963_v22 = vpop.f32.mrf.mxu0 }
 0xef3   :  { %v1966_v47 = vadd.f32 %v1963_v22, %v3902_v19 }
 0xef5   :  { %2862 = vtanh.f32 %v1966_v47  ;;  %v2659_v4 = vmul.f32 -1.442695, %v1966_v47 }
 0xefa   :  { %v1990_v15 = vpop.f32.mrf.mxu1 }
 0xefb   :  { %v2863_v35 = vpop.eup %2862  ;;  %v1993_v24 = vadd.f32 %v1990_v15, %v3910_v28 }
 0xefc   :  { %2016 = vrot.lane.b32.xlu2 %v2863_v35, %s2898_s6 }
 0xefd   :  { %2864 = vtanh.f32 %v1993_v24  ;;  %v2660_v19 = vmul.f32 -1.442695, %v1993_v24 }
 0xefe   :  { %2866 = vpow2.f32 %v2659_v4 }
 0xf03   :  { %v2865_v17 = vpop.eup %2864 }
 0xf04   :  { %2053 = vrot.lane.b32.xlu0 %v2865_v17, %s2898_s6  ;;  %v2867_v25 = vpop.eup %2866 }
 0xf05   :  { %v1997_v54 = vadd.f32 1.0, %v2867_v25 }
 0xf07   :  { %2868 = vrcp.f32 %v1997_v54  ;;  %v2009_v28 = vand.u32 2147483648, %v1997_v54  ;;  %vm2003_vm5 = vweird.f32 %v1997_v54  ;;  %v2007_v46 = vand.u32 2147483647, %v1997_v54 }
 0xf08   :  { %2870 = vpow2.f32 %v2660_v19 }
 0xf09   :  { %v2010_v38 = vor.u32 1.1754944e-38, %v2009_v28  ;;  %vm2008_vm7 = vcmp.eq.f32.partialorder %v2007_v46, 8.507059e+37 }
 0xf0d   :  { %v2869_v8 = vpop.eup %2868 }
 0xf0e   :  { %v1999_v42 = vmul.f32 %v2869_v8, %v1997_v54  ;;  %vm2004_vm4 = vweird.f32 %v2869_v8  ;;  %v2871_v41 = vpop.eup %2870 }
 0xf0f   :  { %vm2005_vm6 = vmor %vm2003_vm5, %vm2004_vm4  ;;  %v2034_v58 = vadd.f32 1.0, %v2871_v41 }
 0xf10   :  { %v2000_v43 = vsub.f32 1.0, %v1999_v42 }
 0xf11   :  { %2872 = vrcp.f32 %v2034_v58  ;;  %v2046_v61 = vand.u32 2147483648, %v2034_v58  ;;  %vm2040_vm9 = vweird.f32 %v2034_v58  ;;  %v2044_v29 = vand.u32 2147483647, %v2034_v58 }
 0xf12   :  { %v2001_v49 = vmul.f32 %v2869_v8, %v2000_v43 }
 0xf13   :  { %v2047_v59 = vor.u32 1.1754944e-38, %v2046_v61  ;;  %vm2045_vm11 = vcmp.eq.f32.partialorder %v2044_v29, 8.507059e+37 }
 0xf14   :  { %v2002_v18 = vadd.f32 %v2869_v8, %v2001_v49 }
 0xf16   :  { %v2006_v26 = vsel %vm2005_vm6, %v2869_v8, %v2002_v18 }
 0xf17   :  { %v2011_v20 = vsel %vm2008_vm7, %v2010_v38, %v2006_v26  ;;  %v2873_v30 = vpop.eup %2872 }
 0xf18   :  { %v2036_v31 = vmul.f32 %v2873_v30, %v2034_v58  ;;  %vm2041_vm8 = vweird.f32 %v2873_v30  ;;  %v2014_v53 = vmul.f32 %v2011_v20, %v4130_v5 }
 0xf19   :  { %vm2042_vm10 = vmor %vm2040_vm9, %vm2041_vm8 }
 0xf1a   :  { %v2037_v44 = vsub.f32 1.0, %v2036_v31 }
 0xf1c   :  { %v2038_v52 = vmul.f32 %v2873_v30, %v2037_v44 }
 0xf1e   :  { %v2039_v33 = vadd.f32 %v2873_v30, %v2038_v52 }
 0xf20   :  { %v2043_v23 = vsel %vm2042_vm10, %v2873_v30, %v2039_v33 }
 0xf21   :  { %v2048_v2 = vsel %vm2045_vm11, %v2047_v59, %v2043_v23 }
 0xf22   :  { %v2051_v34 = vmul.f32 %v2048_v2, %v4135_v9 }
 0xf56   :  { %v2017_v39 = vpop.permute.xlu2 %2016 }
 0xf57   :  { %v2019_v36 = vmul.f32 %v2017_v39, %v2011_v20 }
 0xf59   :  { %2021 = vrot.lane.b32.xlu1 %v2019_v36, %s2897_s21 }
 0xf76   :  { %v2054_v10 = vpop.permute.xlu0 %2053 }
 0xf77   :  { %v2056_v55 = vmul.f32 %v2054_v10, %v2048_v2 }
 0xf79   :  { %2058 = vrot.lane.b32.xlu2 %v2056_v55, %s2897_s21 }
 0xfcb   :  { %v2022_v48 = vpop.permute.xlu1 %2021 }
 0xfcc   :  { %v4158_v51 = vadd.f32 %v2022_v48, %v2014_v53 }
 0xfce   :  { %2874 = vtanh.f32 %v4158_v51 }
 0xfd3   :  { %v2059_v57 = vpop.permute.xlu2 %2058 }
 0xfd4   :  { %v2875_v62 = vpop.eup %2874  ;;  %v4162_v63 = vadd.f32 %v2059_v57, %v2051_v34 }
 0xfd5   :  { %2027 = vrot.lane.b32.xlu0 %v2875_v62, %s2898_s6 }
 0xfd6   :  { %2876 = vtanh.f32 %v4162_v63 }
 0xfdc   :  { %v2877_v0 = vpop.eup %2876 }
 0xfdd   :  { %2064 = vrot.lane.b32.xlu1 %v2877_v0, %s2898_s6 }
0x1047   :  { %v2028_v50 = vpop.permute.xlu0 %2027 }
0x1048   :  { %v2030_v1 = vmul.f32 %v2028_v50, %v2011_v20 }
0x104a   :  { %2069 = vrot.lane.b32.xlu2 %v2030_v1, %s2897_s21 }
0x104f   :  { %v2065_v40 = vpop.permute.xlu1 %2064 }
0x1050   :  { %v2067_v3 = vmul.f32 %v2065_v40, %v2048_v2 }
0x1052   :  { %2075 = vrot.lane.b32.xlu0 %v2067_v3, %s2897_s21 }
0x10a4   :  { %v2070_v12 = vpop.permute.xlu2 %2069 }
0x10a5   :  { %2661 = vst.msk [vmem:[%s4206_s7 + $0x30] sm:$0xff] %vm1064_vm0, %v2070_v12  ;;  %2663 = vmatmul.msk.f32.vlgmr.msra.gmra.mxu2 %vm1064_vm0, %v2070_v12 }
0x10c4   :  { %v2076_v13 = vpop.permute.xlu0 %2075 }
0x10c5   :  { %2662 = vst.msk [vmem:[%s4207_s8 + $0x8] sm:$0xff] %vm1064_vm0, %v2076_v13  ;;  %2664 = vmatmul.msk.f32.vlgmr.msra.gmra.mxu3 %vm1064_vm0, %v2076_v13 }
0x1128   :  { %v2105_v5 = vpop.f32.mrf.mxu2 }
0x1129   :  { %v2108_v6 = vadd.f32 %v2105_v5, %v3906_v56 }
0x112b   :  { %2878 = vtanh.f32 %v2108_v6  ;;  %v2665_v45 = vmul.f32 -1.442695, %v2108_v6 }
0x1131   :  { %v2879_v7 = vpop.eup %2878 }
0x1132   :  { %2158 = vrot.lane.b32.xlu1 %v2879_v7, %s2898_s6 }
0x1148   :  { %v2132_v37 = vpop.f32.mrf.mxu3 }
0x1149   :  { %v2135_v9 = vadd.f32 %v2132_v37, %v3908_v27 }
0x114b   :  { %2880 = vtanh.f32 %v2135_v9  ;;  %v2666_v16 = vmul.f32 -1.442695, %v2135_v9 }
0x114c   :  { %2882 = vpow2.f32 %v2665_v45 }
0x114d   :  { %2884 = vpow2.f32 %v2666_v16 }
0x1151   :  { %v2881_v14 = vpop.eup %2880 }
0x1152   :  { %2195 = vrot.lane.b32.xlu2 %v2881_v14, %s2898_s6  ;;  %v2883_v11 = vpop.eup %2882 }
0x1153   :  { %v2139_v21 = vadd.f32 1.0, %v2883_v11  ;;  %v2885_v60 = vpop.eup %2884 }
0x1154   :  { %v2176_v56 = vadd.f32 1.0, %v2885_v60 }
0x1155   :  { %2886 = vrcp.f32 %v2139_v21  ;;  %v2151_v4 = vand.u32 2147483648, %v2139_v21  ;;  %vm2145_vm13 = vweird.f32 %v2139_v21  ;;  %v2149_v25 = vand.u32 2147483647, %v2139_v21 }
0x1156   :  { %2888 = vrcp.f32 %v2176_v56  ;;  %v2188_v28 = vand.u32 2147483648, %v2176_v56  ;;  %vm2182_vm2 = vweird.f32 %v2176_v56  ;;  %v2186_v46 = vand.u32 2147483647, %v2176_v56 }
0x1157   :  { %v2152_v42 = vor.u32 1.1754944e-38, %v2151_v4  ;;  %vm2150_vm15 = vcmp.eq.f32.partialorder %v2149_v25, 8.507059e+37 }
0x1158   :  { %v2189_v26 = vor.u32 1.1754944e-38, %v2188_v28  ;;  %vm2187_vm4 = vcmp.eq.f32.partialorder %v2186_v46, 8.507059e+37 }
0x115b   :  { %v2887_v32 = vpop.eup %2886 }
0x115c   :  { %v2141_v22 = vmul.f32 %v2887_v32, %v2139_v21  ;;  %v2889_v15 = vpop.eup %2888  ;;  %vm2146_vm12 = vweird.f32 %v2887_v32 }
0x115d   :  { %v2178_v27 = vmul.f32 %v2889_v15, %v2176_v56  ;;  %vm2147_vm14 = vmor %vm2145_vm13, %vm2146_vm12  ;;  %vm2183_vm1 = vweird.f32 %v2889_v15 }
0x115e   :  { %v2142_v47 = vsub.f32 1.0, %v2141_v22  ;;  %vm2184_vm3 = vmor %vm2182_vm2, %vm2183_vm1 }
0x115f   :  { %v2179_v17 = vsub.f32 1.0, %v2178_v27 }
0x1160   :  { %v2143_v35 = vmul.f32 %v2887_v32, %v2142_v47 }
0x1161   :  { %v2180_v8 = vmul.f32 %v2889_v15, %v2179_v17 }
0x1162   :  { %v2144_v24 = vadd.f32 %v2887_v32, %v2143_v35 }
0x1163   :  { %v2181_v18 = vadd.f32 %v2889_v15, %v2180_v8 }
0x1164   :  { %v2148_v54 = vsel %vm2147_vm14, %v2887_v32, %v2144_v24 }
0x1165   :  { %v2153_v19 = vsel %vm2150_vm15, %v2152_v42, %v2148_v54  ;;  %v2185_v41 = vsel %vm2184_vm3, %v2889_v15, %v2181_v18 }
0x1166   :  { %v2190_v58 = vsel %vm2187_vm4, %v2189_v26, %v2185_v41  ;;  %v2156_v20 = vmul.f32 %v2153_v19, %v4158_v51 }
0x1167   :  { %v2193_v31 = vmul.f32 %v2190_v58, %v4162_v63 }
0x11a4   :  { %v2159_v43 = vpop.permute.xlu1 %2158 }
0x11a5   :  { %v2161_v49 = vmul.f32 %v2159_v43, %v2153_v19 }
0x11a7   :  { %2163 = vrot.lane.b32.xlu0 %v2161_v49, %s2897_s21 }
0x11ac   :  { %v2196_v38 = vpop.permute.xlu2 %2195 }
0x11ad   :  { %v2198_v39 = vmul.f32 %v2196_v38, %v2190_v58 }
0x11af   :  { %2200 = vrot.lane.b32.xlu1 %v2198_v39, %s2897_s21 }
0x1219   :  { %v2164_v36 = vpop.permute.xlu0 %2163 }
0x121a   :  { %v2166_v30 = vadd.f32 %v2164_v36, %v2156_v20 }
0x121c   :  { %2890 = vtanh.f32 %v2166_v30 }
0x1221   :  { %v2201_v44 = vpop.permute.xlu1 %2200 }
0x1222   :  { %v2891_v52 = vpop.eup %2890  ;;  %v2203_v33 = vadd.f32 %v2201_v44, %v2193_v31 }
0x1223   :  { %2169 = vrot.lane.b32.xlu2 %v2891_v52, %s2898_s6 }
0x1224   :  { %2892 = vtanh.f32 %v2203_v33 }
0x122a   :  { %v2893_v61 = vpop.eup %2892 }
0x122b   :  { %2206 = vrot.lane.b32.xlu0 %v2893_v61, %s2898_s6 }
0x127d   :  { %v2170_v29 = vpop.permute.xlu2 %2169 }
0x127e   :  { %v2172_v23 = vmul.f32 %v2170_v29, %v2153_v19 }
0x1280   :  { %2211 = vrot.lane.b32.xlu1 %v2172_v23, %s2897_s21 }
0x129d   :  { %v2207_v59 = vpop.permute.xlu0 %2206 }
0x129e   :  { %v2209_v2 = vmul.f32 %v2207_v59, %v2190_v58 }
0x12a0   :  { %2217 = vrot.lane.b32.xlu2 %v2209_v2, %s2897_s21 }
0x12f2   :  { %v2212_v10 = vpop.permute.xlu1 %2211 }
0x12f3   :  { %2667 = vst.msk [vmem:[%s4206_s7 + $0x38] sm:$0xff] %vm1064_vm0, %v2212_v10 }
0x12fa   :  { %v2218_v55 = vpop.permute.xlu2 %2217 }
0x12fb   :  { %2220 = vst.msk [vmem:[%s4207_s8] sm:$0xff] %vm1064_vm0, %v2218_v55 }

</bundles_post_ra>
